<compile_context>
chip_gen: v7x
topology: tpu7x:2x2x1
jax: 0.10.0
libtpu: 0.0.40
codegen_flags: <defaults>
</compile_context>

<pallas_src>
import functools
import math

import jax
import jax.numpy as jnp
from jax import lax
from jax.experimental import pallas as pl
from jax.experimental.pallas import tpu as pltpu


# ----------------------------------------------------------------------------
# Helpers
# ----------------------------------------------------------------------------
def _round_up(x, m):
    return ((x + m - 1) // m) * m


def _padded_bytes(shape, dtype):
    """VMEM footprint of one buffer of `shape` after (sublane, lane) padding."""
    itemsize = jnp.dtype(dtype).itemsize
    if len(shape) == 0:
        return itemsize
    shape = list(shape)
    packing = max(1, 4 // itemsize)               # bf16 packs 2 rows / sublane
    shape[-1] = _round_up(shape[-1], 128)
    if len(shape) >= 2:
        shape[-2] = _round_up(shape[-2], 8 * packing)
    n = 1
    for s in shape:
        n *= s
    return n * itemsize


# ----------------------------------------------------------------------------
# Kernel: full forward pass for one feature-major batch tile, processed in
# lane-chunks so big tiles don't blow the 64-vreg file.
# ----------------------------------------------------------------------------
def basenet5b_kernel(x_ref, w0_ref, b0_ref, w1_ref, b1_ref, w2_ref, b2_ref,
                     o_ref, *, n_layers, chunk_n, n_chunks):
    w_dtype = w0_ref.dtype

    def compute_chunk(c):
        start = c * chunk_n
        if not isinstance(start, int):
            start = pl.multiple_of(start, chunk_n)
        cols = pl.ds(start, chunk_n)
        # x is feature-major bf16: (x_dim, chunk_n) columns of this batch tile.
        xb = x_ref[:, cols]
        # layer0: x_scale already folded into w0 -> W0 @ x + b0, sin in f32.
        h = jnp.sin(jnp.dot(w0_ref[...], xb,
                            preferred_element_type=jnp.float32) + b0_ref[...])
        # Hidden Sin layers: alpha folded into w1[n].  Weights/biases are read
        # per layer (VMEM loads are cheap) so the live vreg set stays bounded
        # at large h_dim/n_layers instead of pinning every layer's weights.
        for n in range(n_layers):
            h = jnp.sin(jnp.dot(w1_ref[n], h.astype(w_dtype),
                                preferred_element_type=jnp.float32)
                        + b1_ref[n])
        # Final linear into the feature-major (y_pad8, tile_n) slab: batch on
        # the lane axis keeps stores dense while writing only y_pad8 sublanes.
        o_ref[:, cols] = (jnp.dot(w2_ref[...], h.astype(w_dtype),
                                  preferred_element_type=jnp.float32)
                          + b2_ref[...])

    if n_chunks <= 8:
        for c in range(n_chunks):          # static starts -> static lane slices
            compute_chunk(c)
    else:
        def body(c, carry):
            compute_chunk(c)
            return carry
        lax.fori_loop(0, n_chunks, body, 0)


# ----------------------------------------------------------------------------
# Wrapper: tiles the batch (lane) dimension; weights are broadcast, single-
# buffered when the jax build supports pipeline_mode=pl.Buffered(1).
# ----------------------------------------------------------------------------
def basenet5b_forward(x, kernel_params, *, n_layers, y_dim,
                      tile_n=2048, chunk_n=256, interpret=False):
    w0, b0, w1, b1, w2, b2 = kernel_params
    N, x_dim = x.shape
    h_dim = w0.shape[0]
    y_pad = w2.shape[0]                     # round_up(y_dim, 8)
    LANE = 128

    # ---- batch-tile sizing ---------------------------------------------------
    # Large tiles amortize the ~0.35us/grid-step overhead; cap so the grid still
    # has >=4 steps (>=2 per TensorCore on 2-TC chips) when N allows.
    n_ceil = _round_up(N, LANE)
    tile_cap = _round_up(-(-N // 4), LANE)
    tile_n = max(LANE, min(_round_up(tile_n, LANE), tile_cap, n_ceil))
    # chunk_n: largest 128-multiple divisor of tile_n not above the request;
    # keeps lane slices aligned and the per-matmul batch dim >= 128.
    chunk_req = max(LANE, min(_round_up(chunk_n, LANE), tile_n))
    divisors = [d for d in range(LANE, tile_n + 1, LANE) if tile_n % d == 0]
    fitting = [d for d in divisors if d <= chunk_req]
    chunk_n = max(fitting) if fitting else min(divisors)
    n_chunks = tile_n // chunk_n

    n_pad = _round_up(N, tile_n)
    grid = (n_pad // tile_n,)

    # Feature-major bf16 input: contiguous x DMA, half the HBM read.
    x_t = x.T.astype(w0.dtype)
    if n_pad != N:
        x_t = jnp.pad(x_t, ((0, 0), (0, n_pad - N)))

    kernel = functools.partial(basenet5b_kernel, n_layers=n_layers,
                               chunk_n=chunk_n, n_chunks=n_chunks)

    # Accurate VMEM budget: double-buffered x/out tiles + (single|double)
    # buffered weight blocks, capped at 3/4 of physical VMEM (v7x headroom).
    weight_bytes = (_padded_bytes(w0.shape, w0.dtype)
                    + _padded_bytes(b0.shape, b0.dtype)
                    + _padded_bytes(w1.shape, w1.dtype)
                    + _padded_bytes(b1.shape, b1.dtype)
                    + _padded_bytes(w2.shape, w2.dtype)
                    + _padded_bytes(b2.shape, b2.dtype))
    io_bytes = (_padded_bytes((x_dim, tile_n), x_t.dtype)
                + _padded_bytes((y_pad, tile_n), jnp.float32))
    try:
        vmem_cap = int(pltpu.get_tpu_info().vmem_capacity_bytes)
    except Exception:
        vmem_cap = 64 * 1024 * 1024          # v7x per-TC size: safe lower bound
    vmem_cap = (vmem_cap * 3) // 4

    def run(single_buffer_weights):
        wbuf = 1 if single_buffer_weights else 2
        need = 2 * io_bytes + wbuf * weight_bytes
        vmem_limit = int(min(vmem_cap, max(need + (4 << 20), 16 << 20)))

        def wspec(shape):
            kwargs = {}
            if single_buffer_weights:
                # Constant index_map -> one pipeline buffer is enough.
                kwargs["pipeline_mode"] = pl.Buffered(1)
            return pl.BlockSpec(shape, lambda i, _r=len(shape): (0,) * _r,
                                **kwargs)

        f = pl.pallas_call(
            kernel,
            out_shape=jax.ShapeDtypeStruct((y_pad, n_pad), jnp.float32),
            grid_spec=pltpu.PrefetchScalarGridSpec(
                num_scalar_prefetch=0,
                grid=grid,
                in_specs=[
                    pl.BlockSpec((x_dim, tile_n), lambda i: (0, i)),  # x tile (fm, bf16)
                    wspec(w0.shape),   # W0 (h, x_dim), x_scale folded, bf16
                    wspec(b0.shape),   # b0 (h, 1) f32
                    wspec(w1.shape),   # W1 stack (L, h, h), alpha folded, bf16
                    wspec(b1.shape),   # b1 stack (L, h, 1) f32
                    wspec(w2.shape),   # W2 (y_pad8, h) bf16
                    wspec(b2.shape),   # b2 (y_pad8, 1) f32
                ],
                out_specs=pl.BlockSpec((y_pad, tile_n), lambda i: (0, i)),
            ),
            compiler_params=pltpu.CompilerParams(
                dimension_semantics=("parallel",),
                vmem_limit_bytes=vmem_limit),
            interpret=interpret,
        )
        return jax.block_until_ready(f(x_t, w0, b0, w1, b1, w2, b2))

    try:
        out = run(True)
    except Exception:
        # pipeline_mode=pl.Buffered(1) unsupported in this jax build; fall back
        # to the (semantically identical) default double-buffered weight blocks.
        out = run(False)

    return out[:y_dim, :N].T


# ----------------------------------------------------------------------------
# Deterministic parameter init mirroring BaseNet5b.__init__ semantics
# (PyTorch (out, in) layout; synthetic, not a checkpoint load).
# ----------------------------------------------------------------------------
def init_raw_params(key, x_dim, h_dim, n_layers, alpha, gamma, y_dim):
    ks = jax.random.split(key, 6)

    def uniform(k, shape, bound):
        return jax.random.uniform(k, shape, jnp.float32, -bound, bound)

    # layer0 (is_first=True): weight ~ U(-1/x_dim, 1/x_dim); bias = Linear default
    w0 = uniform(ks[0], (h_dim, x_dim), 1.0 / x_dim)
    b0 = uniform(ks[1], (h_dim,), 1.0 / math.sqrt(x_dim))
    # hidden (is_first=False): weight ~ U(-sqrt(6/h)/alpha, sqrt(6/h)/alpha)
    w1 = uniform(ks[2], (n_layers, h_dim, h_dim), math.sqrt(6.0 / h_dim) / alpha)
    b1 = uniform(ks[3], (n_layers, h_dim), 1.0 / math.sqrt(h_dim))
    # layer2: default Linear init, weight scaled by gamma, bias zeroed
    w2 = uniform(ks[4], (y_dim, h_dim), 1.0 / math.sqrt(h_dim)) * gamma
    b2 = jnp.zeros((y_dim,), jnp.float32)
    return w0, b0, w1, b1, w2, b2


def prepare_kernel_params(raw, *, x_scale, alpha, mxu_dtype=jnp.bfloat16):
    """Fold activation scales into the weights (PyTorch (out, in) layout kept,
    feature-major kernel computes W @ x), pad the final layer to an 8-sublane
    slab, cast matmul weights to bf16, keep biases f32 as (out, 1) columns."""
    w0, b0, w1, b1, w2, b2 = raw
    h_dim = w0.shape[0]
    y_dim = w2.shape[0]
    y_pad = _round_up(y_dim, 8)

    w0_k = (x_scale * w0).astype(mxu_dtype)                          # (h, x_dim)
    w1_k = (alpha * w1).astype(mxu_dtype)                            # (L, h, h)
    w2_k = jnp.zeros((y_pad, h_dim), jnp.float32).at[:y_dim, :].set(w2)
    w2_k = w2_k.astype(mxu_dtype)                                    # (y_pad8, h)
    b2_k = jnp.zeros((y_pad, 1), jnp.float32).at[:y_dim, 0].set(b2)

    return (w0_k,
            b0.reshape(h_dim, 1).astype(jnp.float32),
            w1_k,
            b1.reshape(-1, h_dim, 1).astype(jnp.float32),
            w2_k,
            b2_k)


# ----------------------------------------------------------------------------
# References
# ----------------------------------------------------------------------------
def reference_forward_module(x, raw, *, x_scale, alpha):
    """Pure-f32 reference with the exact PyTorch module semantics (unfolded)."""
    w0, b0, w1, b1, w2, b2 = raw
    h = jnp.sin((x_scale * x) @ w0.T + b0)
    for n in range(w1.shape[0]):
        h = jnp.sin((alpha * h) @ w1[n].T + b1[n])
    return h @ w2.T + b2


def reference_forward_kernel_numerics(x, kparams, *, y_dim):
    """Reference using the kernel's folded bf16 weights / feature-major order."""
    w0, b0, w1, b1, w2, b2 = kparams
    h = jnp.sin(jnp.dot(w0, x.T.astype(w0.dtype),
                        preferred_element_type=jnp.float32) + b0)
    for n in range(w1.shape[0]):
        h = jnp.sin(jnp.dot(w1[n], h.astype(w1.dtype),
                            preferred_element_type=jnp.float32) + b1[n])
    y = jnp.dot(w2, h.astype(w2.dtype),
                preferred_element_type=jnp.float32) + b2
    return y[:y_dim, :].T


if __name__ == "__main__":
    # Small, deterministic config consistent with the module's constructor.
    x_dim, h_dim, n_layers, y_dim = 3, 32, 2, 3
    x_scale, alpha, gamma = 10.0, 2.0, 0.1

    key = jax.random.PRNGKey(0)
    k_x1, k_x2, k_p = jax.random.split(key, 3)

    raw = init_raw_params(k_p, x_dim, h_dim, n_layers, alpha, gamma, y_dim)
    kparams = prepare_kernel_params(raw, x_scale=x_scale, alpha=alpha)

    # Case 1: small N, not a tile multiple -> padded tail, single chunk/tile.
    N1 = 300
    x1 = jax.random.uniform(k_x1, (N1, x_dim), jnp.float32, -1.0, 1.0)
    y1 = jax.block_until_ready(
        basenet5b_forward(x1, kparams, n_layers=n_layers, y_dim=y_dim))
    assert y1.shape == (N1, y_dim)

    # Case 2: larger N -> multi-chunk tiles, >=4 grid steps (2 per TC on v7x).
    N2 = 3000
    x2 = jax.random.uniform(k_x2, (N2, x_dim), jnp.float32, -1.0, 1.0)
    y2 = jax.block_until_ready(
        basenet5b_forward(x2, kparams, n_layers=n_layers, y_dim=y_dim))
    assert y2.shape == (N2, y_dim)

    for x, y in ((x1, y1), (x2, y2)):
        # (1) numerics-matched reference (same folded bf16 weights / cast points)
        y_kn = reference_forward_kernel_numerics(x, kparams, y_dim=y_dim)
        assert jnp.allclose(y, y_kn, atol=1e-3, rtol=1e-3), \
            float(jnp.max(jnp.abs(y - y_kn)))
        # (2) module-semantics f32 reference: loose tolerance bounds bf16 error
        y_f32 = reference_forward_module(x, raw, x_scale=x_scale, alpha=alpha)
        assert float(jnp.max(jnp.abs(y - y_f32))) < 5e-2

    print("KERNEL_OK")
</pallas_src>

<mosaic_0001>
module attributes {stable_mosaic.version = 11 : i64} {
  func.func @basenet5b_kernel(%arg0: i32, %arg1: memref<3x128xbf16, #tpu.memory_space<vmem>>, %arg2: memref<32x3xbf16, #tpu.memory_space<vmem>>, %arg3: memref<32x1xf32, #tpu.memory_space<vmem>>, %arg4: memref<2x32x32xbf16, #tpu.memory_space<vmem>>, %arg5: memref<2x32x1xf32, #tpu.memory_space<vmem>>, %arg6: memref<8x32xbf16, #tpu.memory_space<vmem>>, %arg7: memref<8x1xf32, #tpu.memory_space<vmem>>, %arg8: memref<8x128xf32, #tpu.memory_space<vmem>>) attributes {dimension_semantics = [#tpu.dimension_semantics<parallel>], iteration_bounds = array<i64: 3>, scalar_prefetch = 0 : i64, scratch_operands = 0 : i64, tpu.core_type = #tpu.core_type<tc>, window_params = [{transform_indices = @transform_0, window_bounds = array<i64: 3, 128>}, {pipeline_mode = #tpu.pipeline_mode<synchronous>, transform_indices = @transform_1, window_bounds = array<i64: 32, 3>}, {pipeline_mode = #tpu.pipeline_mode<synchronous>, transform_indices = @transform_2, window_bounds = array<i64: 32, 1>}, {pipeline_mode = #tpu.pipeline_mode<synchronous>, transform_indices = @transform_3, window_bounds = array<i64: 2, 32, 32>}, {pipeline_mode = #tpu.pipeline_mode<synchronous>, transform_indices = @transform_4, window_bounds = array<i64: 2, 32, 1>}, {pipeline_mode = #tpu.pipeline_mode<synchronous>, transform_indices = @transform_5, window_bounds = array<i64: 8, 32>}, {pipeline_mode = #tpu.pipeline_mode<synchronous>, transform_indices = @transform_6, window_bounds = array<i64: 8, 1>}, {transform_indices = @transform_7, window_bounds = array<i64: 8, 128>}]} {
    %c0 = arith.constant 0 : index
    %c0_0 = arith.constant 0 : index
    %0 = vector.load %arg1[%c0, %c0_0] : memref<3x128xbf16, #tpu.memory_space<vmem>>, vector<3x128xbf16>
    %c0_1 = arith.constant 0 : index
    %c0_2 = arith.constant 0 : index
    %1 = vector.load %arg2[%c0_1, %c0_2] : memref<32x3xbf16, #tpu.memory_space<vmem>>, vector<32x3xbf16>
    %cst = arith.constant dense<0.000000e+00> : vector<32x128xf32>
    %2 = tpu.matmul %1, %0, %cst {dimension_numbers = #tpu.dot_dimension_numbers<[1], [0], [0], [1], [0, 0, 1, 1], [], []>} : vector<32x3xbf16>, vector<3x128xbf16>, vector<32x128xf32> -> vector<32x128xf32>
    %c0_3 = arith.constant 0 : index
    %c0_4 = arith.constant 0 : index
    %3 = vector.load %arg3[%c0_3, %c0_4] : memref<32x1xf32, #tpu.memory_space<vmem>>, vector<32x1xf32>
    %4 = vector.broadcast %3 : vector<32x1xf32> to vector<32x128xf32>
    %5 = arith.addf %2, %4 : vector<32x128xf32>
    %6 = math.sin %5 : vector<32x128xf32>
    %c0_5 = arith.constant 0 : index
    %c0_6 = arith.constant 0 : index
    %c0_7 = arith.constant 0 : index
    %7 = vector.load %arg4[%c0_5, %c0_6, %c0_7] : memref<2x32x32xbf16, #tpu.memory_space<vmem>>, vector<1x32x32xbf16>
    %8 = vector.shape_cast %7 : vector<1x32x32xbf16> to vector<32x32xbf16>
    %9 = arith.truncf %6 : vector<32x128xf32> to vector<32x128xbf16>
    %cst_8 = arith.constant dense<0.000000e+00> : vector<32x128xf32>
    %10 = tpu.matmul %8, %9, %cst_8 {dimension_numbers = #tpu.dot_dimension_numbers<[1], [0], [0], [1], [0, 0, 1, 1], [], []>} : vector<32x32xbf16>, vector<32x128xbf16>, vector<32x128xf32> -> vector<32x128xf32>
    %c0_9 = arith.constant 0 : index
    %c0_10 = arith.constant 0 : index
    %c0_11 = arith.constant 0 : index
    %11 = vector.load %arg5[%c0_9, %c0_10, %c0_11] : memref<2x32x1xf32, #tpu.memory_space<vmem>>, vector<1x32x1xf32>
    %12 = vector.shape_cast %11 : vector<1x32x1xf32> to vector<32x1xf32>
    %13 = vector.broadcast %12 : vector<32x1xf32> to vector<32x128xf32>
    %14 = arith.addf %10, %13 : vector<32x128xf32>
    %15 = math.sin %14 : vector<32x128xf32>
    %c1 = arith.constant 1 : index
    %c0_12 = arith.constant 0 : index
    %c0_13 = arith.constant 0 : index
    %16 = vector.load %arg4[%c1, %c0_12, %c0_13] : memref<2x32x32xbf16, #tpu.memory_space<vmem>>, vector<1x32x32xbf16>
    %17 = vector.shape_cast %16 : vector<1x32x32xbf16> to vector<32x32xbf16>
    %18 = arith.truncf %15 : vector<32x128xf32> to vector<32x128xbf16>
    %cst_14 = arith.constant dense<0.000000e+00> : vector<32x128xf32>
    %19 = tpu.matmul %17, %18, %cst_14 {dimension_numbers = #tpu.dot_dimension_numbers<[1], [0], [0], [1], [0, 0, 1, 1], [], []>} : vector<32x32xbf16>, vector<32x128xbf16>, vector<32x128xf32> -> vector<32x128xf32>
    %c1_15 = arith.constant 1 : index
    %c0_16 = arith.constant 0 : index
    %c0_17 = arith.constant 0 : index
    %20 = vector.load %arg5[%c1_15, %c0_16, %c0_17] : memref<2x32x1xf32, #tpu.memory_space<vmem>>, vector<1x32x1xf32>
    %21 = vector.shape_cast %20 : vector<1x32x1xf32> to vector<32x1xf32>
    %22 = vector.broadcast %21 : vector<32x1xf32> to vector<32x128xf32>
    %23 = arith.addf %19, %22 : vector<32x128xf32>
    %24 = math.sin %23 : vector<32x128xf32>
    %c0_18 = arith.constant 0 : index
    %c0_19 = arith.constant 0 : index
    %25 = vector.load %arg6[%c0_18, %c0_19] : memref<8x32xbf16, #tpu.memory_space<vmem>>, vector<8x32xbf16>
    %26 = arith.truncf %24 : vector<32x128xf32> to vector<32x128xbf16>
    %cst_20 = arith.constant dense<0.000000e+00> : vector<8x128xf32>
    %27 = tpu.matmul %25, %26, %cst_20 {dimension_numbers = #tpu.dot_dimension_numbers<[1], [0], [0], [1], [0, 0, 1, 1], [], []>} : vector<8x32xbf16>, vector<32x128xbf16>, vector<8x128xf32> -> vector<8x128xf32>
    %c0_21 = arith.constant 0 : index
    %c0_22 = arith.constant 0 : index
    %28 = vector.load %arg7[%c0_21, %c0_22] : memref<8x1xf32, #tpu.memory_space<vmem>>, vector<8x1xf32>
    %29 = vector.broadcast %28 : vector<8x1xf32> to vector<8x128xf32>
    %30 = arith.addf %27, %29 : vector<8x128xf32>
    %c0_23 = arith.constant 0 : index
    %c0_24 = arith.constant 0 : index
    %31 = vector.load %arg8[%c0_23, %c0_24] : memref<8x128xf32, #tpu.memory_space<vmem>>, vector<8x128xf32>
    tpu.vector_store %arg8[%c0_23, %c0_24], %30 {strides = array<i32>} : memref<8x128xf32, #tpu.memory_space<vmem>>, vector<8x128xf32>,
    return
  }
  func.func @transform_0(%arg0: i32) -> (i32, i32) {
    %c0_i32 = arith.constant 0 : i32
    %c0_i32_0 = arith.constant 0 : i32
    return %c0_i32, %arg0 : i32, i32
  }
  func.func @transform_1(%arg0: i32) -> (i32, i32) {
    %c0_i32 = arith.constant 0 : i32
    %c0_i32_0 = arith.constant 0 : i32
    %c0_i32_1 = arith.constant 0 : i32
    return %c0_i32, %c0_i32_0 : i32, i32
  }
  func.func @transform_2(%arg0: i32) -> (i32, i32) {
    %c0_i32 = arith.constant 0 : i32
    %c0_i32_0 = arith.constant 0 : i32
    %c0_i32_1 = arith.constant 0 : i32
    return %c0_i32, %c0_i32_0 : i32, i32
  }
  func.func @transform_3(%arg0: i32) -> (i32, i32, i32) {
    %c0_i32 = arith.constant 0 : i32
    %c0_i32_0 = arith.constant 0 : i32
    %c0_i32_1 = arith.constant 0 : i32
    %c0_i32_2 = arith.constant 0 : i32
    return %c0_i32, %c0_i32_0, %c0_i32_1 : i32, i32, i32
  }
  func.func @transform_4(%arg0: i32) -> (i32, i32, i32) {
    %c0_i32 = arith.constant 0 : i32
    %c0_i32_0 = arith.constant 0 : i32
    %c0_i32_1 = arith.constant 0 : i32
    %c0_i32_2 = arith.constant 0 : i32
    return %c0_i32, %c0_i32_0, %c0_i32_1 : i32, i32, i32
  }
  func.func @transform_5(%arg0: i32) -> (i32, i32) {
    %c0_i32 = arith.constant 0 : i32
    %c0_i32_0 = arith.constant 0 : i32
    %c0_i32_1 = arith.constant 0 : i32
    return %c0_i32, %c0_i32_0 : i32, i32
  }
  func.func @transform_6(%arg0: i32) -> (i32, i32) {
    %c0_i32 = arith.constant 0 : i32
    %c0_i32_0 = arith.constant 0 : i32
    %c0_i32_1 = arith.constant 0 : i32
    return %c0_i32, %c0_i32_0 : i32, i32
  }
  func.func @transform_7(%arg0: i32) -> (i32, i32) {
    %c0_i32 = arith.constant 0 : i32
    %c0_i32_0 = arith.constant 0 : i32
    return %c0_i32, %arg0 : i32, i32
  }
}

module attributes {stable_mosaic.version = 11 : i64} {
  func.func @basenet5b_kernel(%arg0: i32, %arg1: memref<3x128xbf16, #tpu.memory_space<vmem>>, %arg2: memref<32x3xbf16, #tpu.memory_space<vmem>>, %arg3: memref<32x1xf32, #tpu.memory_space<vmem>>, %arg4: memref<2x32x32xbf16, #tpu.memory_space<vmem>>, %arg5: memref<2x32x1xf32, #tpu.memory_space<vmem>>, %arg6: memref<8x32xbf16, #tpu.memory_space<vmem>>, %arg7: memref<8x1xf32, #tpu.memory_space<vmem>>, %arg8: memref<8x128xf32, #tpu.memory_space<vmem>>) attributes {dimension_semantics = [#tpu.dimension_semantics<parallel>], iteration_bounds = array<i64: 3>, scalar_prefetch = 0 : i64, scratch_operands = 0 : i64, tpu.core_type = #tpu.core_type<tc>, window_params = [{transform_indices = @transform_0, window_bounds = array<i64: 3, 128>}, {pipeline_mode = #tpu.pipeline_mode<synchronous>, transform_indices = @transform_1, window_bounds = array<i64: 32, 3>}, {pipeline_mode = #tpu.pipeline_mode<synchronous>, transform_indices = @transform_2, window_bounds = array<i64: 32, 1>}, {pipeline_mode = #tpu.pipeline_mode<synchronous>, transform_indices = @transform_3, window_bounds = array<i64: 2, 32, 32>}, {pipeline_mode = #tpu.pipeline_mode<synchronous>, transform_indices = @transform_4, window_bounds = array<i64: 2, 32, 1>}, {pipeline_mode = #tpu.pipeline_mode<synchronous>, transform_indices = @transform_5, window_bounds = array<i64: 8, 32>}, {pipeline_mode = #tpu.pipeline_mode<synchronous>, transform_indices = @transform_6, window_bounds = array<i64: 8, 1>}, {transform_indices = @transform_7, window_bounds = array<i64: 8, 128>}]} {
    %c0 = arith.constant 0 : index
    %c0_0 = arith.constant 0 : index
    %0 = vector.load %arg1[%c0, %c0_0] : memref<3x128xbf16, #tpu.memory_space<vmem>>, vector<3x128xbf16>
    %c0_1 = arith.constant 0 : index
    %c0_2 = arith.constant 0 : index
    %1 = vector.load %arg2[%c0_1, %c0_2] : memref<32x3xbf16, #tpu.memory_space<vmem>>, vector<32x3xbf16>
    %cst = arith.constant dense<0.000000e+00> : vector<32x128xf32>
    %2 = tpu.matmul %1, %0, %cst {dimension_numbers = #tpu.dot_dimension_numbers<[1], [0], [0], [1], [0, 0, 1, 1], [], []>} : vector<32x3xbf16>, vector<3x128xbf16>, vector<32x128xf32> -> vector<32x128xf32>
    %c0_3 = arith.constant 0 : index
    %c0_4 = arith.constant 0 : index
    %3 = vector.load %arg3[%c0_3, %c0_4] : memref<32x1xf32, #tpu.memory_space<vmem>>, vector<32x1xf32>
    %4 = vector.broadcast %3 : vector<32x1xf32> to vector<32x128xf32>
    %5 = arith.addf %2, %4 : vector<32x128xf32>
    %6 = math.sin %5 : vector<32x128xf32>
    %c0_5 = arith.constant 0 : index
    %c0_6 = arith.constant 0 : index
    %c0_7 = arith.constant 0 : index
    %7 = vector.load %arg4[%c0_5, %c0_6, %c0_7] : memref<2x32x32xbf16, #tpu.memory_space<vmem>>, vector<1x32x32xbf16>
    %8 = vector.shape_cast %7 : vector<1x32x32xbf16> to vector<32x32xbf16>
    %9 = arith.truncf %6 : vector<32x128xf32> to vector<32x128xbf16>
    %cst_8 = arith.constant dense<0.000000e+00> : vector<32x128xf32>
    %10 = tpu.matmul %8, %9, %cst_8 {dimension_numbers = #tpu.dot_dimension_numbers<[1], [0], [0], [1], [0, 0, 1, 1], [], []>} : vector<32x32xbf16>, vector<32x128xbf16>, vector<32x128xf32> -> vector<32x128xf32>
    %c0_9 = arith.constant 0 : index
    %c0_10 = arith.constant 0 : index
    %c0_11 = arith.constant 0 : index
    %11 = vector.load %arg5[%c0_9, %c0_10, %c0_11] : memref<2x32x1xf32, #tpu.memory_space<vmem>>, vector<1x32x1xf32>
    %12 = vector.shape_cast %11 : vector<1x32x1xf32> to vector<32x1xf32>
    %13 = vector.broadcast %12 : vector<32x1xf32> to vector<32x128xf32>
    %14 = arith.addf %10, %13 : vector<32x128xf32>
    %15 = math.sin %14 : vector<32x128xf32>
    %c1 = arith.constant 1 : index
    %c0_12 = arith.constant 0 : index
    %c0_13 = arith.constant 0 : index
    %16 = vector.load %arg4[%c1, %c0_12, %c0_13] : memref<2x32x32xbf16, #tpu.memory_space<vmem>>, vector<1x32x32xbf16>
    %17 = vector.shape_cast %16 : vector<1x32x32xbf16> to vector<32x32xbf16>
    %18 = arith.truncf %15 : vector<32x128xf32> to vector<32x128xbf16>
    %cst_14 = arith.constant dense<0.000000e+00> : vector<32x128xf32>
    %19 = tpu.matmul %17, %18, %cst_14 {dimension_numbers = #tpu.dot_dimension_numbers<[1], [0], [0], [1], [0, 0, 1, 1], [], []>} : vector<32x32xbf16>, vector<32x128xbf16>, vector<32x128xf32> -> vector<32x128xf32>
    %c1_15 = arith.constant 1 : index
    %c0_16 = arith.constant 0 : index
    %c0_17 = arith.constant 0 : index
    %20 = vector.load %arg5[%c1_15, %c0_16, %c0_17] : memref<2x32x1xf32, #tpu.memory_space<vmem>>, vector<1x32x1xf32>
    %21 = vector.shape_cast %20 : vector<1x32x1xf32> to vector<32x1xf32>
    %22 = vector.broadcast %21 : vector<32x1xf32> to vector<32x128xf32>
    %23 = arith.addf %19, %22 : vector<32x128xf32>
    %24 = math.sin %23 : vector<32x128xf32>
    %c0_18 = arith.constant 0 : index
    %c0_19 = arith.constant 0 : index
    %25 = vector.load %arg6[%c0_18, %c0_19] : memref<8x32xbf16, #tpu.memory_space<vmem>>, vector<8x32xbf16>
    %26 = arith.truncf %24 : vector<32x128xf32> to vector<32x128xbf16>
    %cst_20 = arith.constant dense<0.000000e+00> : vector<8x128xf32>
    %27 = tpu.matmul %25, %26, %cst_20 {dimension_numbers = #tpu.dot_dimension_numbers<[1], [0], [0], [1], [0, 0, 1, 1], [], []>} : vector<8x32xbf16>, vector<32x128xbf16>, vector<8x128xf32> -> vector<8x128xf32>
    %c0_21 = arith.constant 0 : index
    %c0_22 = arith.constant 0 : index
    %28 = vector.load %arg7[%c0_21, %c0_22] : memref<8x1xf32, #tpu.memory_space<vmem>>, vector<8x1xf32>
    %29 = vector.broadcast %28 : vector<8x1xf32> to vector<8x128xf32>
    %30 = arith.addf %27, %29 : vector<8x128xf32>
    %c0_23 = arith.constant 0 : index
    %c0_24 = arith.constant 0 : index
    %31 = vector.load %arg8[%c0_23, %c0_24] : memref<8x128xf32, #tpu.memory_space<vmem>>, vector<8x128xf32>
    tpu.vector_store %arg8[%c0_23, %c0_24], %30 {strides = array<i32>} : memref<8x128xf32, #tpu.memory_space<vmem>>, vector<8x128xf32>,
    return
  }
  func.func @transform_0(%arg0: i32) -> (i32, i32) {
    %c0_i32 = arith.constant 0 : i32
    %c0_i32_0 = arith.constant 0 : i32
    return %c0_i32, %arg0 : i32, i32
  }
  func.func @transform_1(%arg0: i32) -> (i32, i32) {
    %c0_i32 = arith.constant 0 : i32
    %c0_i32_0 = arith.constant 0 : i32
    %c0_i32_1 = arith.constant 0 : i32
    return %c0_i32, %c0_i32_0 : i32, i32
  }
  func.func @transform_2(%arg0: i32) -> (i32, i32) {
    %c0_i32 = arith.constant 0 : i32
    %c0_i32_0 = arith.constant 0 : i32
    %c0_i32_1 = arith.constant 0 : i32
    return %c0_i32, %c0_i32_0 : i32, i32
  }
  func.func @transform_3(%arg0: i32) -> (i32, i32, i32) {
    %c0_i32 = arith.constant 0 : i32
    %c0_i32_0 = arith.constant 0 : i32
    %c0_i32_1 = arith.constant 0 : i32
    %c0_i32_2 = arith.constant 0 : i32
    return %c0_i32, %c0_i32_0, %c0_i32_1 : i32, i32, i32
  }
  func.func @transform_4(%arg0: i32) -> (i32, i32, i32) {
    %c0_i32 = arith.constant 0 : i32
    %c0_i32_0 = arith.constant 0 : i32
    %c0_i32_1 = arith.constant 0 : i32
    %c0_i32_2 = arith.constant 0 : i32
    return %c0_i32, %c0_i32_0, %c0_i32_1 : i32, i32, i32
  }
  func.func @transform_5(%arg0: i32) -> (i32, i32) {
    %c0_i32 = arith.constant 0 : i32
    %c0_i32_0 = arith.constant 0 : i32
    %c0_i32_1 = arith.constant 0 : i32
    return %c0_i32, %c0_i32_0 : i32, i32
  }
  func.func @transform_6(%arg0: i32) -> (i32, i32) {
    %c0_i32 = arith.constant 0 : i32
    %c0_i32_0 = arith.constant 0 : i32
    %c0_i32_1 = arith.constant 0 : i32
    return %c0_i32, %c0_i32_0 : i32, i32
  }
  func.func @transform_7(%arg0: i32) -> (i32, i32) {
    %c0_i32 = arith.constant 0 : i32
    %c0_i32_0 = arith.constant 0 : i32
    return %c0_i32, %arg0 : i32, i32
  }
}

</mosaic_0001>

<bundles_post_ra>
// kernel: tpu_custom_call.1
= control target key start
LH: loop header
LB: loop body
LE: loop exit
PB: predicated region body
PF: predicated region fallthrough
CT: control target
= control target key end

     0   :  { %12 = vsyncpa [#allocation3], 0  ;;  %s3341_s0 = inlined_call_operand.vmem [shape: bf16[3,384], index: 0, kind: input, shape index: {}]   ;;  %s3342_s1 = inlined_call_operand.vmem [shape: bf16[32,3], index: 1, kind: input, shape index: {}]   ;;  %s3343_s2 = inlined_call_operand.vmem [shape: f32[32,1], index: 2, kind: input, shape index: {}]   ;;  %s3344_s3 = inlined_call_operand.vmem [shape: bf16[2,32,32], index: 3, kind: input, shape index: {}]   ;;  %s3345_s4 = inlined_call_operand.vmem [shape: f32[2,32,1], index: 4, kind: input, shape index: {}]   ;;  %s3346_s5 = inlined_call_operand.vmem [shape: bf16[8,32], index: 5, kind: input, shape index: {}]   ;;  %s3347_s6 = inlined_call_operand.vmem [shape: f32[8,1], index: 6, kind: input, shape index: {}]   ;;  %s3348_s7 = inlined_call_operand.hbm [shape: f32[8,384], index: 7, kind: output, shape index: {}]  }
   0x1   :  { %14 = vsyncpa [#allocation3 + $0x1], 0  ;;  %s2335_s24 = smov 0   ;;  %s2337_s25 = smov 0  }
   0x2   :  { %s2339_s26 = smov 0   ;;  %s2341_s27 = smov 0  }
   0x3 LB: > { %s2356_s28 = sadd.s32 4294967295, %s2282_s27   ;;  %s1944_s29 = sadd.s32 4294967294, %s2282_s27   ;;  %s2282_s27 = sphi %s2341_s27, %s3376_s27   ;;  %s2278_s26 = sphi %s2339_s26, %s3375_s26   ;;  %s2274_s25 = sphi %s2337_s25, %s3374_s25   ;;  %s2270_s24 = sphi %s2335_s24, %s3373_s24  }
   0x4   : > { %s2360_s30 = sadd.s32 1, %s2282_s27   ;;  %s179_s8 = sadd.s32 1, %s2278_s26 }
   0x5   : > { %s176_s9 = ssub.s32 %s2282_s27, %s2360_s30  ;;  %p189_p0 = scmp.ne.s32.totalorder %s2278_s26, %s2274_s25 }
   0x6   : > { %p177_p1 = scmp.eq.s32.totalorder %s176_s9, 0  ;;  %p190_p2 = scmp.eq.s32.totalorder %s2356_s28, 2 }
   0x7   : > { %p195_p3 = scmp.ne.s32.totalorder %s2274_s25, %s2270_s24  ;;  %p196_p4 = scmp.eq.s32.totalorder %s1944_s29, 2 }
   0x8   : > { %s2371_s10 = scalar_select %p177_p1, %s2278_s26, %s179_s8  }
   0x9   : > { %p2373_p5 = por %p190_p2, %p189_p0  ;;  %p2377_p6 = por %p196_p4, %p195_p3 }
   0xa   : > { %p1947_p7 = scmp.ge.s32.totalorder %s2282_s27, 1  ;;  %p239_p8 = scmp.lt.s32.totalorder %s2282_s27, 4 }
   0xc   : > { %p240_p9 = pnand %p1947_p7, %p239_p8 }
   0xd   : > { %p270_p10 = scmp.lt.s32.totalorder (!%p240_p9), %s2356_s28, 2  ;;  %vm321_vm0 = vcmask (!%p240_p9), 1040384   ;;  %vm322_vm1 = vcmask (!%p240_p9), 1041408   ;;  %v2284_v0 = vmov (!%p240_p9), 65535   ;;  %v2166_v2 = vld [vmem:[%s3342_s1] sm:$0xff] (!%p240_p9)   ;;  %vm314_vm2 = vcmask (!%p240_p9), 23552  }
   0xe   : > { %243 = sbr.rel (%p240_p9) target bundleno = 1291 (0x50b), region = 48  ;;  %v323_v1 = vsel (!%p240_p9), %vm321_vm0, 4294967295, %v2284_v0  ;;  %2039 = vmatprep.mubr.msk.bf16.mxu0 (!%p240_p9), %vm314_vm2, %v2166_v2  ;;  %v280_v3 = vld [vmem:[%s3343_s2] sm:$0xff] (!%p240_p9)  ;;  %v282_v4 = vld [vmem:[%s3343_s2 + $0x10] sm:$0xff] (!%p240_p9)  ;;  %v2285_v6 = vmov (!%p240_p9), 0   ;;  %v281_v8 = vld [vmem:[%s3343_s2 + $0x8] sm:$0xff] (!%p240_p9) }
   0xf   : > { %v324_v5 = vsel (!%p240_p9), %vm322_vm1, %v323_v1, 0  ;;  %2164 = vset.pattern.permute.xlu0 (!%p240_p9), %v2285_v6  ;;  %2165 = vset.pattern.permute.xlu1 (!%p240_p9), %v2285_v6  ;;  %v2167_v10 = vld [vmem:[%s3342_s1 + $0x8] sm:$0xff] (!%p240_p9)   ;;  %v283_v11 = vld [vmem:[%s3343_s2 + $0x18] sm:$0xff] (!%p240_p9)  ;;  %v799_v12 = vld [vmem:[%s3345_s4] sm:$0xff] (!%p240_p9)  ;;  %v2286_v0 = vmov (!%p240_p9), 683565275  }
  0x10   : > { %286 = vperm.xlu0 (!%p240_p9), %2164, %v280_v3   ;;  %296 = vperm.xlu1 (!%p240_p9), %2165, %v282_v4   ;;  %v800_v13 = vld [vmem:[%s3345_s4 + $0x8] sm:$0xff] (!%p240_p9)  ;;  %v801_v14 = vld [vmem:[%s3345_s4 + $0x10] sm:$0xff] (!%p240_p9)  ;;  %v802_v15 = vld [vmem:[%s3345_s4 + $0x18] sm:$0xff] (!%p240_p9)  ;;  %v2287_v2 = vmov (!%p240_p9), 2475754826   ;;  %s267_s16 = sand.u32 (!%p240_p9), 1, %s2274_s25  }
  0x11   : > { %v1994_v16 = vld [vmem:[%s3345_s4 + $0x20] sm:$0xff] (!%p240_p9)  ;;  %v1995_v17 = vld [vmem:[%s3345_s4 + $0x28] sm:$0xff] (!%p240_p9)  ;;  %v1996_v18 = vld [vmem:[%s3345_s4 + $0x30] sm:$0xff] (!%p240_p9)  ;;  %s1948_s17 = sshll.u32 (!%p240_p9), %s267_s16, 3  ;;  %s2020_s18 = sshll.u32 (!%p240_p9), %s2356_s28, 7 }
  0x12   : > { %v1997_v19 = vld [vmem:[%s3345_s4 + $0x38] sm:$0xff] (!%p240_p9)  ;;  %v1821_v20 = vld [vmem:[%s3347_s6] sm:$0xff] (!%p240_p9)  ;;  %s269_s19 = scalar_lea.vmem (!%p240_p9), [#allocation2], %s1948_s17  ;;  %s2294_s8 = smov (!%p240_p9), [#allocation2]  }
  0x13   : > { %s2224_s9 = sshll.u32 (!%p240_p9), %s2294_s8, 4  ;;  %s2225_s9 = int_to_ptr.vmem [resolvable:$false] %s2224_s9 }
  0x14   : > { %291 = vperm.xlu0 (!%p240_p9), %2164, %v281_v8   ;;  %301 = vperm.xlu1 (!%p240_p9), %2165, %v283_v11   ;;  %s2226_s13 = scalar_lea.vmem (!%p240_p9), %s2225_s9, 256 }
  0x15   : > { %s271_s15 = scalar_select %p270_p10, %s2356_s28, 2 }
  0x16   : > { %s1872_s28 = scalar_lea.sflag [#allocation3], %s267_s16 }
  0x17   : > { %s1949_s20 = sshll.u32 %s271_s15, 1 }
  0x18   : > { %s273_s23 = scalar_lea.vmem %s3341_s0, %s1949_s20  ;;  %805 = vperm.xlu0 %2164, %v799_v12   ;;  %810 = vperm.xlu1 %2165, %v800_v13   ;;  %s1885_s20 = sshll.u32 %s269_s19, 4  ;;  %s3301_s20 = int_to_ptr.vmem [resolvable:$true] %s1885_s20 }
  0x19   : > { %v275_v7 = vld [vmem:[%s273_s23] sm:$0x3]  ;;  %s3299_s23 = scalar_lea.hbm %s3348_s7, %s2020_s18  ;;  %s2220_s29 = scalar_lea.vmem %s3301_s20, 128 }
  0x1a   : > { %v326_v9 = vand.u32 %v324_v5, %v275_v7  ;;  %v2288_v5 = vmov 2131351028   ;;  %v2289_v7 = vmov 2102212464   ;;  %p2221_p11 = scmp.ne.s32.totalorder %s3301_s20, %s2220_s29  ;;  %p2227_p0 = scmp.lt.s32.totalorder %s3301_s20, %s2225_s9 }
  0x1b   : > { %p2228_p1 = scmp.lt.s32.totalorder %s2226_s13, %s2220_s29 }
  0x1c   : > { %2037 = vmatprep.subr.bf16.mxu0 %v326_v9  ;;  %815 = vperm.xlu0 %2164, %v801_v14   ;;  %p2222_p12 = pnand %p2221_p11, %p2373_p5 }
  0x1d   : > { %2038 = vmatpush3.bf16.msra.mxu0 %v326_v9  ;;  %820 = vperm.xlu1 %2165, %v802_v15   ;;  %v2290_v9 = vmov 920167782   ;;  %p2229_p2 = por %p2228_p1, %p2227_p0 }
  0x1e   : > { %p2223_p13 = pneg %p2222_p12 }
  0x20   : > { %2040 = vmatmul.mubr.msk.bf16.vlgmr.msra.gmra.mrb[0].mxu0 %vm314_vm2, %v2167_v10  ;;  %1319 = vperm.xlu0 %2164, %v1994_v16   ;;  %v2291_v16 = vmov 1326507024   ;;  %p2230_p3 = pnand %p2229_p2, %p2223_p13 }
  0x21   : > { %1324 = vperm.xlu1 %2165, %v1995_v17  }
  0x24   : > { %1329 = vperm.xlu0 %2164, %v1996_v18  }
  0x25   : > { %1334 = vperm.xlu1 %2165, %v1997_v19  }
  0x28   : > { %1824 = vperm.xlu0 %2164, %v1821_v20  }
  0x8f   : > { %v297_v21 = vpop.permute.xlu1 %296  ;;  %v287_v22 = vpop.permute.xlu0 %286 }
  0x93   : > { %v302_v26 = vpop.permute.xlu1 %301  ;;  %v292_v33 = vpop.permute.xlu0 %291 }
  0xf3   : > { %v2041_v23 = vpop.f32.mrb[0].mxu0 }
  0xf4   : > { %v2435_v24 = vadd.f32 %v2041_v23, %v297_v21  ;;  %v362_v25 = vpop.f32.mrb[1].mxu0 }
  0xf5   : > { %v2437_v27 = vadd.f32 %v362_v25, %v287_v22  ;;  %v2042_v28 = vpop.f32.mrb[2].mxu0 }
  0xf6   : > { %v585_v29 = vand.u32 2147483647, %v2435_v24  ;;  %v588_v30 = vand.u32 2139095040, %v2435_v24  ;;  %v2441_v31 = vadd.f32 %v2042_v28, %v302_v26  ;;  %v365_v32 = vpop.f32.mrb[3].mxu0 }
  0xf7   : > { %v377_v34 = vand.u32 2147483647, %v2437_v27  ;;  %v380_v35 = vand.u32 2139095040, %v2437_v27  ;;  %v2447_v38 = vadd.f32 %v365_v32, %v292_v33 }
  0xf8   : > { %v589_v36 = vshrl.u32 %v588_v30, 23  ;;  %v592_v37 = vand.u32 8388607, %v585_v29  ;;  %v689_v41 = vand.u32 2147483647, %v2441_v31  ;;  %v692_v42 = vand.u32 2139095040, %v2441_v31 }
  0xf9   : > { %v381_v39 = vshrl.u32 %v380_v35, 23  ;;  %v384_v40 = vand.u32 8388607, %v377_v34  ;;  %v484_v52 = vand.u32 2139095040, %v2447_v38 }
  0xfa   : > { %v1962_v43 = vadd.s32 4294967169, %v589_v36  ;;  %v593_v44 = vor.u32 8388608, %v592_v37  ;;  %v693_v46 = vshrl.u32 %v692_v42, 23  ;;  %v2455_v51 = vand.u32 8388607, %v689_v41 }
  0xfb   : > { %v1954_v45 = vadd.s32 4294967169, %v381_v39  ;;  %v385_v48 = vor.u32 8388608, %v384_v40  ;;  %v2467_v62 = vshrl.u32 %v484_v52, 23 }
  0xfc   : > { %v595_v47 = vadd.s32 1, %v1962_v43  ;;  %v1966_v50 = vadd.s32 4294967169, %v693_v46  ;;  %v2458_v54 = vshll.u32 %v593_v44, 8  ;;  %v697_v60 = vor.u32 8388608, %v2455_v51 }
  0xfd   : > { %v387_v49 = vadd.s32 1, %v1954_v45  ;;  %v2460_v58 = vshll.u32 %v385_v48, 8 }
  0xfe   : > { %vm596_vm3 = vcmp.gt.s32.totalorder %v595_v47, 0  ;;  %v2465_v61 = vadd.s32 1, %v1966_v50 }
  0xff   : > { %v597_v53 = vsel %vm596_vm3, %v595_v47, 0  ;;  %vm388_vm4 = vcmp.gt.s32.totalorder %v387_v49, 0 }
 0x100   : > { %v598_v55 = vshrl.u32 %v597_v53, 5  ;;  %v599_v56 = vand.u32 31, %v597_v53  ;;  %v389_v57 = vsel %vm388_vm4, %v387_v49, 0  ;;  %vm700_vm9 = vcmp.gt.s32.totalorder %v2465_v61, 0 }
 0x101   : > { %v2462_v59 = vshrl.u32 %v389_v57, 5  ;;  %v391_v4 = vand.u32 31, %v389_v57 }
 0x102   : > { %v600_v63 = vsub.s32 32, %v599_v56  ;;  %v602_v1 = vshll.u32 %v2286_v0, %v599_v56  ;;  %v605_v3 = vshll.u32 %v2287_v2, %v599_v56  ;;  %v608_v6 = vshll.u32 %v2288_v5, %v599_v56 }
 0x103   : > { %v611_v8 = vshll.u32 %v2289_v7, %v599_v56  ;;  %v614_v10 = vshll.u32 %v2290_v9, %v599_v56  ;;  %vm617_vm5 = vcmp.lt.s32.totalorder %v598_v55, 1  ;;  %vm618_vm6 = vcmp.lt.s32.totalorder %v598_v55, 2 }
 0x104   : > { %v603_v11 = vshrl.u32 %v2287_v2, %v600_v63  ;;  %v606_v12 = vshrl.u32 %v2288_v5, %v600_v63  ;;  %v609_v13 = vshrl.u32 %v2289_v7, %v600_v63  ;;  %v601_v14 = vshrl.u32 %v2286_v0, %v600_v63 }
 0x105   : > { %v612_v15 = vshrl.u32 %v2290_v9, %v600_v63  ;;  %v615_v17 = vshrl.u32 %v2291_v16, %v600_v63  ;;  %vm619_vm7 = vcmp.lt.s32.totalorder %v598_v55, 3  ;;  %v392_v21 = vsub.s32 32, %v391_v4 }
 0x106   : > { %v604_v18 = vor.u32 %v603_v11, %v602_v1  ;;  %v607_v19 = vor.u32 %v606_v12, %v605_v3  ;;  %v610_v20 = vor.u32 %v609_v13, %v608_v6  ;;  %vm620_vm8 = vcmp.lt.s32.totalorder %v598_v55, 4 }
 0x107   : > { %v613_v22 = vor.u32 %v612_v15, %v611_v8  ;;  %v616_v23 = vor.u32 %v615_v17, %v614_v10  ;;  %v394_v25 = vshll.u32 %v2286_v0, %v391_v4  ;;  %v397_v37 = vshll.u32 %v2287_v2, %v391_v4 }
 0x108   : > { %v621_v26 = vsel %vm617_vm5, %v601_v14, %v604_v18  ;;  %v622_v28 = vsel %vm620_vm8, %v610_v20, 2102212464  ;;  %v625_v30 = vsel %vm617_vm5, %v604_v18, %v607_v19  ;;  %v629_v32 = vsel %vm617_vm5, %v607_v19, %v610_v20 }
 0x109   : > { %v623_v33 = vsel %vm619_vm7, %v607_v19, %v622_v28  ;;  %v626_v35 = vsel %vm620_vm8, %v613_v22, 920167782  ;;  %v630_v36 = vsel %vm620_vm8, %v616_v23, 1326507024  ;;  %v393_v42 = vshrl.u32 %v2286_v0, %v392_v21 }
 0x10a   : > { %v627_v39 = vsel %vm619_vm7, %v610_v20, %v626_v35  ;;  %v631_v40 = vsel %vm619_vm7, %v613_v22, %v630_v36  ;;  %v395_v43 = vshrl.u32 %v2287_v2, %v392_v21  ;;  %v624_v44 = vsel %vm618_vm6, %v621_v26, %v623_v33 }
 0x10b   : > { %v628_v45 = vsel %vm618_vm6, %v625_v30, %v627_v39  ;;  %v632_v46 = vsel %vm618_vm6, %v629_v32, %v631_v40  ;;  %v398_v47 = vshrl.u32 %v2288_v5, %v392_v21  ;;  %v400_v57 = vshll.u32 %v2288_v5, %v391_v4 }
 0x10c   : > { %v2496_v48 = vmul.u32.u64.low %v2458_v54, %v632_v46  ;;  %v2497_v49 = vmul.u32.u64.high %v2458_v54, %v632_v46, %v2496_v48  ;;  %v2500_v50 = vmul.u32.u64.low %v2458_v54, %v628_v45  ;;  %v2501_v52 = vmul.u32.u64.high %v2458_v54, %v628_v45, %v2500_v50 }
 0x10d   : > { %v396_v53 = vor.u32 %v395_v43, %v394_v25  ;;  %v399_v56 = vor.u32 %v398_v47, %v397_v37  ;;  %v401_v63 = vshrl.u32 %v2289_v7, %v392_v21  ;;  %v640_v55 = vmul.u32 %v2458_v54, %v624_v44 }
 0x10e   : > { %v403_v1 = vshll.u32 %v2289_v7, %v391_v4  ;;  %v404_v3 = vshrl.u32 %v2290_v9, %v392_v21  ;;  %v407_v6 = vshrl.u32 %v2291_v16, %v392_v21  ;;  %v406_v10 = vshll.u32 %v2290_v9, %v391_v4 }
 0x10f   : > { %v402_v8 = vor.u32 %v401_v63, %v400_v57  ;;  %vm409_vm10 = vcmp.lt.s32.totalorder %v2462_v59, 1  ;;  %vm410_vm11 = vcmp.lt.s32.totalorder %v2462_v59, 2  ;;  %vm642_vm12 = vc.u32 %v2497_v49, %v2500_v50 }
 0x110   : > { %v643_v11 = vadd.s32 1, %v2501_v52  ;;  %v405_v12 = vor.u32 %v404_v3, %v403_v1  ;;  %vm411_vm13 = vcmp.lt.s32.totalorder %v2462_v59, 3  ;;  %v408_v54 = vor.u32 %v407_v6, %v406_v10 }
 0x111   : > { %vm412_vm14 = vcmp.lt.s32.totalorder %v2462_v59, 4  ;;  %v413_v13 = vsel %vm409_vm10, %v393_v42, %v396_v53  ;;  %v417_v14 = vsel %vm409_vm10, %v396_v53, %v399_v56  ;;  %v421_v18 = vsel %vm409_vm10, %v399_v56, %v402_v8 }
 0x112   : > { %v644_v15 = vsel %vm642_vm12, %v643_v11, %v2501_v52  ;;  %v414_v4 = vsel %vm412_vm14, %v402_v8, 2102212464  ;;  %v418_v17 = vsel %vm412_vm14, %v405_v12, 920167782  ;;  %v422_v22 = vsel %vm412_vm14, %v408_v54, 1326507024 }
 0x113   : > { %v645_v19 = vadd.s32 %v644_v15, %v640_v55  ;;  %v415_v20 = vsel %vm411_vm13, %v399_v56, %v414_v4  ;;  %v419_v21 = vsel %vm411_vm13, %v402_v8, %v418_v17  ;;  %v423_v25 = vsel %vm411_vm13, %v405_v12, %v422_v22 }
 0x114   : > { %v420_v23 = vsel %vm410_vm11, %v417_v14, %v419_v21  ;;  %v701_v26 = vsel %vm700_vm9, %v2465_v61, 0  ;;  %v1958_v28 = vadd.s32 4294967169, %v2467_v62  ;;  %v424_v32 = vsel %vm410_vm11, %v421_v18, %v423_v25 }
 0x115   : > { %v646_v30 = vadd.s32 536870912, %v645_v19  ;;  %v2528_v33 = vmul.u32.u64.low %v2460_v58, %v420_v23  ;;  %v2529_v35 = vmul.u32.u64.high %v2460_v58, %v420_v23, %v2528_v33  ;;  %v416_v36 = vsel %vm410_vm11, %v413_v13, %v415_v20 }
 0x116   : > { %v2535_v37 = vmul.u32.u64.low %v2460_v58, %v424_v32  ;;  %v2536_v39 = vmul.u32.u64.high %v2460_v58, %v424_v32, %v2535_v37  ;;  %v702_v40 = vshrl.u32 %v701_v26, 5  ;;  %v703_v62 = vand.u32 31, %v701_v26 }
 0x117   : > { %v2538_v61 = vshrl.u32 %v646_v30, 30  ;;  %v2542_v42 = vshll.u32 %v697_v60, 8  ;;  %v432_v44 = vmul.u32 %v2460_v58, %v416_v36  ;;  %v435_v45 = vadd.s32 1, %v2529_v35 }
 0x118   : > { %v704_v59 = vsub.s32 32, %v703_v62  ;;  %vm434_vm15 = vc.u32 %v2536_v39, %v2528_v33  ;;  %v706_v46 = vshll.u32 %v2286_v0, %v703_v62  ;;  %vm721_vm0 = vcmp.lt.s32.totalorder %v702_v40, 1 }
 0x119   : > { %v648_v43 = vshll.u32 %v2538_v61, 30  ;;  %v491_v47 = vadd.s32 1, %v1958_v28  ;;  %v436_v48 = vsel %vm434_vm15, %v435_v45, %v2529_v35  ;;  %v709_v60 = vshll.u32 %v2287_v2, %v703_v62 }
 0x11a   : > { %v707_v51 = vshrl.u32 %v2287_v2, %v704_v59  ;;  %v712_v52 = vshll.u32 %v2288_v5, %v703_v62  ;;  %v437_v58 = vadd.s32 %v436_v48, %v432_v44  ;;  %v710_v56 = vshrl.u32 %v2288_v5, %v704_v59 }
 0x11b   : > { %v2554_v53 = vsub.s32 %v645_v19, %v648_v43  ;;  %v713_v57 = vshrl.u32 %v2289_v7, %v704_v59  ;;  %v715_v55 = vshll.u32 %v2289_v7, %v703_v62  ;;  %v716_v1 = vshrl.u32 %v2290_v9, %v704_v59 }
 0x11c   : > { %v708_v63 = vor.u32 %v707_v51, %v706_v46  ;;  %v718_v3 = vshll.u32 %v2290_v9, %v703_v62  ;;  %v438_v6 = vadd.s32 536870912, %v437_v58  ;;  %v711_v8 = vor.u32 %v710_v56, %v709_v60 }
 0x11d   : > { %v714_v10 = vor.u32 %v713_v57, %v712_v52  ;;  %v719_v11 = vshrl.u32 %v2291_v16, %v704_v59  ;;  %v717_v12 = vor.u32 %v716_v1, %v715_v55  ;;  %vm722_vm1 = vcmp.lt.s32.totalorder %v702_v40, 2 }
 0x11e   : > { %vm723_vm2 = vcmp.lt.s32.totalorder %v702_v40, 3  ;;  %vm724_vm3 = vcmp.lt.s32.totalorder %v702_v40, 4  ;;  %v2562_v54 = vshrl.u32 %v438_v6, 30  ;;  %v729_v15 = vsel %vm721_vm0, %v708_v63, %v711_v8 }
 0x11f   : > { %v720_v13 = vor.u32 %v719_v11, %v718_v3  ;;  %v726_v14 = vsel %vm724_vm3, %v714_v10, 2102212464  ;;  %v651_v4 = vsub.s32 0, %v2554_v53  ;;  %v705_v17 = vshrl.u32 %v2286_v0, %v704_v59 }
 0x120   : > { %v730_v18 = vsel %vm724_vm3, %v717_v12, 920167782  ;;  %v733_v19 = vsel %vm721_vm0, %v711_v8, %v714_v10  ;;  %v440_v20 = vshll.u32 %v2562_v54, 30  ;;  %vm492_vm4 = vcmp.gt.s32.totalorder %v491_v47, 0 }
 0x121   : > { %v731_v21 = vsel %vm723_vm2, %v714_v10, %v730_v18  ;;  %v734_v22 = vsel %vm724_vm3, %v720_v13, 1326507024  ;;  %v725_v23 = vsel %vm721_vm0, %v705_v17, %v708_v63  ;;  %v727_v25 = vsel %vm723_vm2, %v711_v8, %v726_v14 }
 0x122   : > { %v732_v26 = vsel %vm722_vm1, %v729_v15, %v731_v21  ;;  %v735_v28 = vsel %vm723_vm2, %v717_v12, %v734_v22  ;;  %v2574_v30 = vsub.s32 %v437_v58, %v440_v20  ;;  %v493_v43 = vsel %vm492_vm4, %v491_v47, 0 }
 0x123   : > { %v736_v32 = vsel %vm722_vm1, %v733_v19, %v735_v28  ;;  %v2578_v35 = vmul.u32.u64.low %v2542_v42, %v732_v26  ;;  %v2579_v36 = vmul.u32.u64.high %v2542_v42, %v732_v26, %v2578_v35  ;;  %v1963_v44 = vmin.u32 %v651_v4, %v2554_v53 }
 0x124   : > { %v2583_v37 = vmul.u32.u64.low %v2542_v42, %v736_v32  ;;  %v2584_v62 = vmul.u32.u64.high %v2542_v42, %v736_v32, %v2583_v37  ;;  %v443_v45 = vsub.s32 0, %v2574_v30  ;;  %v728_v59 = vsel %vm722_vm1, %v725_v23, %v727_v25 }
 0x125   : > { %v495_v46 = vand.u32 31, %v493_v43  ;;  %v747_v51 = vadd.s32 1, %v2579_v36  ;;  %v481_v60 = vand.u32 2147483647, %v2447_v38  ;;  %v744_v52 = vmul.u32 %v2542_v42, %v728_v59 }
 0x126   : > { %v1955_v48 = vmin.u32 %v443_v45, %v2574_v30  ;;  %vm746_vm5 = vc.u32 %v2584_v62, %v2578_v35  ;;  %v653_v58 = vclz %v1963_v44  ;;  %v494_v13 = vshrl.u32 %v493_v43, 5 }
 0x127   : > { %v748_v56 = vsel %vm746_vm5, %v747_v51, %v2579_v36  ;;  %v496_v57 = vsub.s32 32, %v495_v46  ;;  %v488_v40 = vand.u32 8388607, %v481_v60  ;;  %v498_v14 = vshll.u32 %v2286_v0, %v495_v46 }
 0x128   : > { %v445_v47 = vclz %v1955_v48  ;;  %v749_v63 = vadd.s32 %v748_v56, %v744_v52  ;;  %v1964_v1 = vadd.s32 4294967294, %v653_v58  ;;  %v501_v15 = vshll.u32 %v2287_v2, %v495_v46 }
 0x129   : > { %v499_v6 = vshrl.u32 %v2287_v2, %v496_v57  ;;  %v502_v8 = vshrl.u32 %v2288_v5, %v496_v57  ;;  %v505_v10 = vshrl.u32 %v2289_v7, %v496_v57  ;;  %v508_v11 = vshrl.u32 %v2290_v9, %v496_v57 }
 0x12a   : > { %v750_v55 = vadd.s32 536870912, %v749_v63  ;;  %v1956_v3 = vadd.s32 4294967294, %v445_v47  ;;  %v489_v12 = vor.u32 8388608, %v488_v40  ;;  %v504_v17 = vshll.u32 %v2288_v5, %v495_v46 }
 0x12b   : > { %v507_v18 = vshll.u32 %v2289_v7, %v495_v46  ;;  %v511_v19 = vshrl.u32 %v2291_v16, %v496_v57  ;;  %vm1965_vm6 = vcmp.lt.s32.totalorder %v1964_v1, 0  ;;  %v500_v20 = vor.u32 %v499_v6, %v498_v14 }
 0x12c   : > { %v2600_v42 = vshrl.u32 %v750_v55, 30  ;;  %vm1957_vm7 = vcmp.lt.s32.totalorder %v1956_v3, 0  ;;  %v503_v21 = vor.u32 %v502_v8, %v501_v15  ;;  %v506_v23 = vor.u32 %v505_v10, %v504_v17 }
 0x12d   : > { %v509_v25 = vor.u32 %v508_v11, %v507_v18  ;;  %v510_v26 = vshll.u32 %v2290_v9, %v495_v46  ;;  %v529_v28 = vshll.u32 %v489_v12, 8  ;;  %v448_v32 = vsel %vm1957_vm7, 0, %v1956_v3 }
 0x12e   : > { %v752_v4 = vshll.u32 %v2600_v42, 30  ;;  %vm513_vm8 = vcmp.lt.s32.totalorder %v494_v13, 1  ;;  %v2614_v43 = vsel %vm1965_vm6, 0, %v1964_v1  ;;  %v497_v44 = vshrl.u32 %v2286_v0, %v496_v57 }
 0x12f   : > { %v512_v37 = vor.u32 %v511_v19, %v510_v26  ;;  %vm516_vm9 = vcmp.lt.s32.totalorder %v494_v13, 4  ;;  %v521_v45 = vsel %vm513_vm8, %v500_v20, %v503_v21  ;;  %vm515_vm10 = vcmp.lt.s32.totalorder %v494_v13, 3 }
 0x130   : > { %v2610_v22 = vsub.s32 %v749_v63, %v752_v4  ;;  %v518_v48 = vsel %vm516_vm9, %v506_v23, 2102212464  ;;  %v522_v51 = vsel %vm516_vm9, %v509_v25, 920167782  ;;  %v453_v52 = vsub.s32 4294967266, %v448_v32 }
 0x131   : > { %vm514_vm11 = vcmp.lt.s32.totalorder %v494_v13, 2  ;;  %v523_v46 = vsel %vm515_vm10, %v506_v23, %v522_v51  ;;  %v525_v58 = vsel %vm513_vm8, %v503_v21, %v506_v23  ;;  %v517_v56 = vsel %vm513_vm8, %v497_v44, %v500_v20 }
 0x132   : > { %v755_v36 = vsub.s32 0, %v2610_v22  ;;  %v524_v63 = vsel %vm514_vm11, %v521_v45, %v523_v46  ;;  %v526_v40 = vsel %vm516_vm9, %v512_v37, 1326507024  ;;  %v519_v55 = vsel %vm515_vm10, %v503_v21, %v518_v48  ;;  %v2168_v45 = vld [vmem:[%s3344_s3] sm:$0xff]  }
 0x133   : > { %v527_v1 = vsel %vm515_vm10, %v509_v25, %v526_v40  ;;  %v2619_v3 = vmul.u32.u64.low %v529_v28, %v524_v63  ;;  %v2620_v57 = vmul.u32.u64.high %v529_v28, %v524_v63, %v2619_v3  ;;  %v661_v12 = vsub.s32 4294967266, %v2614_v43 }
 0x134   : > { %v1967_v59 = vmin.u32 %v755_v36, %v2610_v22  ;;  %v528_v8 = vsel %vm514_vm11, %v525_v58, %v527_v1  ;;  %v520_v14 = vsel %vm514_vm11, %v517_v56, %v519_v55  ;;  %v454_v15 = vadd.s32 127, %v453_v52 }
 0x135   : > { %v2624_v10 = vmul.u32.u64.low %v529_v28, %v528_v8  ;;  %v2625_v11 = vmul.u32.u64.high %v529_v28, %v528_v8, %v2624_v10  ;;  %v539_v17 = vadd.s32 1, %v2620_v57  ;;  %v449_v19 = vsub.s32 32, %v448_v32 }
 0x136   : > { %v757_v47 = vclz %v1967_v59  ;;  %v536_v20 = vmul.u32 %v529_v28, %v520_v14  ;;  %v662_v21 = vadd.s32 127, %v661_v12  ;;  %v433_v26 = vadd.s32 %v2528_v33, %v2536_v39 }
 0x137   : > { %vm538_vm13 = vc.u32 %v2625_v11, %v2619_v3  ;;  %v455_v36 = vshll.u32 %v454_v15, 23  ;;  %v657_v44 = vsub.s32 32, %v2614_v43  ;;  %v745_v59 = vadd.s32 %v2578_v35, %v2584_v62 }
 0x138   : > { %v1968_v6 = vadd.s32 4294967294, %v757_v47  ;;  %v540_v25 = vsel %vm538_vm13, %v539_v17, %v2620_v57  ;;  %v451_v28 = vshrl.u32 %v433_v26, %v449_v19  ;;  %v641_v52 = vadd.s32 %v2500_v50, %v2497_v49 }
 0x139   : > { %v541_v37 = vadd.s32 %v540_v25, %v536_v20  ;;  %v663_v46 = vshll.u32 %v662_v21, 23  ;;  %v450_v33 = vshll.u32 %v2574_v30, %v448_v32  ;;  %v456_v39 = vor.u32 4788187, %v455_v36 }
 0x13a   : > { %vm1969_vm12 = vcmp.lt.s32.totalorder %v1968_v6, 0  ;;  %vm833_vm14 = vcmask 261120   ;;  %v659_v56 = vshrl.u32 %v641_v52, %v657_v44  ;;  %v658_v49 = vshll.u32 %v2554_v53, %v2614_v43 }
 0x13b   : > { %v760_v4 = vsel %vm1969_vm12, 0, %v1968_v6  ;;  %v542_v51 = vadd.s32 536870912, %v541_v37  ;;  %2047 = vmatprep.mubr.msk.bf16.mxu1 %vm833_vm14, %v2168_v45  ;;  %v452_v63 = vor.u32 %v451_v28, %v450_v33  ;;  %v664_v50 = vor.u32 4788187, %v663_v46 }
 0x13c   : > { %v765_v18 = vsub.s32 4294967266, %v760_v4  ;;  %v761_v13 = vsub.s32 32, %v760_v4  ;;  %v762_v40 = vshll.u32 %v2610_v22, %v760_v4  ;;  %v457_v55 = vand.u32 2147483647, %v456_v39 }
 0x13d   : > { %v2644_v47 = vshrl.u32 %v542_v51, 30  ;;  %v660_v1 = vor.u32 %v659_v56, %v658_v49  ;;  %v459_v57 = vcvt.s32.f32 %v452_v63  ;;  %v665_v10 = vand.u32 2147483647, %v664_v50 }
 0x13e   : > { %v766_v23 = vadd.s32 127, %v765_v18  ;;  %v763_v58 = vshrl.u32 %v745_v59, %v761_v13  ;;  %vm379_vm0 = vcmp.lt.s32.totalorder %v2437_v27, 0  ;;  %v537_v25 = vadd.s32 %v2619_v3, %v2625_v11 }
 0x13f   : > { %v544_v62 = vshll.u32 %v2644_v47, 30  ;;  %v460_v12 = vmul.f32 %v459_v57, %v457_v55  ;;  %v667_v17 = vcvt.s32.f32 %v660_v1  ;;  %vm691_vm1 = vcmp.lt.s32.totalorder %v2441_v31, 0 }
 0x140   : > { %v767_v48 = vshll.u32 %v766_v23, 23  ;;  %v764_v30 = vor.u32 %v763_v58, %v762_v40  ;;  %vm2659_vm2 = vcmp.le.f32.partialorder %v377_v34, 0.7853982  ;;  %vm587_vm3 = vcmp.lt.s32.totalorder %v2435_v24, 0 }
 0x141   : > { %v545_v32 = vsub.s32 %v541_v37, %v544_v62  ;;  %v668_v18 = vmul.f32 %v667_v17, %v665_v10  ;;  %v461_v19 = vxor.u32 2147483648, %v460_v12  ;;  %vm2673_vm4 = vcmp.le.f32.partialorder %v689_v41, 0.7853982 }
 0x142   : > { %v768_v35 = vor.u32 4788187, %v767_v48  ;;  %v771_v14 = vcvt.s32.f32 %v764_v30  ;;  %vm2682_vm5 = vcmp.le.f32.partialorder %v585_v29, 0.7853982  ;;  %v463_v33 = vsub.s32 4, %v2562_v54 }
 0x143   : > { %v547_v8 = vsub.s32 0, %v545_v32  ;;  %v669_v53 = vxor.u32 2147483648, %v668_v18  ;;  %v462_v23 = vsel %vm379_vm0, %v461_v19, %v460_v12  ;;  %v671_v39 = vsub.s32 4, %v2538_v61 }
 0x144   : > { %v769_v6 = vand.u32 2147483647, %v768_v35  ;;  %v465_v3 = vsel %vm2659_vm2, %v2437_v27, %v462_v23  ;;  %v775_v58 = vsub.s32 4, %v2600_v42  ;;  %v464_v40 = vsel %vm379_vm0, %v463_v33, %v2562_v54 }
 0x145   : > { %v1959_v15 = vmin.u32 %v547_v8, %v545_v32  ;;  %v670_v11 = vsel %vm587_vm3, %v669_v53, %v668_v18  ;;  %2172 = vcosq.f32 %v465_v3  ;;  %v567_v35 = vsub.s32 4, %v2644_v47 }
 0x146   : > { %v772_v22 = vmul.f32 %v771_v14, %v769_v6  ;;  %v673_v41 = vsel %vm2682_vm5, %v2435_v24, %v670_v11  ;;  %2174 = vsinq.f32 %v465_v3  ;;  %v672_v62 = vsel %vm587_vm3, %v671_v39, %v2538_v61 }
 0x147   : > { %v549_v4 = vclz %v1959_v15  ;;  %v776_v49 = vsel %vm691_vm1, %v775_v58, %v2600_v42  ;;  %vm483_vm6 = vcmp.lt.s32.totalorder %v2447_v38, 0  ;;  %v466_v55 = vsel %vm2659_vm2, 0, %v464_v40 }
 0x148   : > { %v773_v21 = vxor.u32 2147483648, %v772_v22  ;;  %vm2707_vm7 = vcmp.le.f32.partialorder %v481_v60, 0.7853982  ;;  %v674_v61 = vsel %vm2682_vm5, 0, %v672_v62  ;;  %v778_v42 = vsel %vm2673_vm4, 0, %v776_v49 }
 0x149   : > { %v1960_v20 = vadd.s32 4294967294, %v549_v4  ;;  %v470_v6 = vadd.s32 3, %v466_v55  ;;  %v678_v10 = vadd.s32 3, %v674_v61  ;;  %vm469_vm3 = vweird.f32 %v2437_v27  ;;  %v2169_v27 = vld [vmem:[%s3344_s3 + $0x8] sm:$0xff]  }
 0x14a   : > { %v774_v37 = vsel %vm691_vm1, %v773_v21, %v772_v22 }
 0x14b   : > { %vm1961_vm15 = vcmp.lt.s32.totalorder %v1960_v20, 0  ;;  %v777_v51 = vsel %vm2673_vm4, %v2441_v31, %v774_v37  ;;  %v471_v17 = vand.u32 3, %v470_v6  ;;  %v679_v18 = vand.u32 3, %v678_v10 }
 0x14c   : > { %v552_v43 = vsel %vm1961_vm15, 0, %v1960_v20  ;;  %2176 = vcosq.f32 %v777_v51 }
 0x14d   : > { %v553_v26 = vsub.s32 32, %v552_v43  ;;  %v557_v36 = vsub.s32 4294967266, %v552_v43  ;;  %v554_v44 = vshll.u32 %v545_v32, %v552_v43  ;;  %2178 = vsinq.f32 %v777_v51 }
 0x14e   : > { %2180 = vsinq.f32 %v673_v41  ;;  %v568_v32 = vsel %vm483_vm6, %v567_v35, %v2644_v47  ;;  %v782_v47 = vadd.s32 3, %v778_v42  ;;  %vm473_vm8 = vcmp.eq.s32.totalorder %v471_v17, 0 }
 0x14f   : > { %v555_v45 = vshrl.u32 %v537_v25, %v553_v26  ;;  %v558_v28 = vadd.s32 127, %v557_v36  ;;  %2182 = vcosq.f32 %v673_v41  ;;  %v2173_v57 = vpop.eup %2172  ;;  %v570_v8 = vsel %vm2707_vm7, 0, %v568_v32 }
 0x150   : > { %v2175_v60 = vpop.eup %2174  ;;  %v574_v22 = vadd.s32 3, %v570_v8  ;;  %v783_v19 = vand.u32 3, %v782_v47  ;;  %v477_v21 = vxor.u32 2147483648, %v2173_v57  ;;  %vm476_vm9 = vcmp.eq.s32.totalorder %v471_v17, 2 }
 0x151   : > { %v556_v59 = vor.u32 %v555_v45, %v554_v44  ;;  %v559_v48 = vshll.u32 %v558_v28, 23  ;;  %v474_v20 = vxor.u32 2147483648, %v2175_v60  ;;  %vm681_vm10 = vcmp.eq.s32.totalorder %v679_v18, 0 }
 0x152   : > { %v575_v25 = vand.u32 3, %v574_v22  ;;  %vm785_vm11 = vcmp.eq.s32.totalorder %v783_v19, 0  ;;  %vm788_vm12 = vcmp.eq.s32.totalorder %v783_v19, 2  ;;  %v478_v37 = vsel %vm476_vm9, %v477_v21, %v2175_v60 }
 0x153   : > { %v560_v46 = vor.u32 4788187, %v559_v48  ;;  %v563_v63 = vcvt.s32.f32 %v556_v59  ;;  %v475_v13 = vsel %vm473_vm8, %v2173_v57, %v474_v20  ;;  %vm472_vm13 = vcmp.lt.s32.totalorder %v471_v17, 2 }
 0x154   : > { %vm684_vm15 = vcmp.eq.s32.totalorder %v679_v18, 2  ;;  %vm580_vm0 = vcmp.eq.s32.totalorder %v575_v25, 2  ;;  %vm784_vm1 = vcmp.lt.s32.totalorder %v783_v19, 2  ;;  %v479_v48 = vsel %vm472_vm13, %v475_v13, %v478_v37 }
 0x155   : > { %v561_v56 = vand.u32 2147483647, %v560_v46  ;;  %vm577_vm2 = vcmp.eq.s32.totalorder %v575_v25, 0  ;;  %vm576_vm4 = vcmp.lt.s32.totalorder %v575_v25, 2  ;;  %vm680_vm5 = vcmp.lt.s32.totalorder %v679_v18, 2 }
 0x156   : > { %v2177_v12 = vpop.eup %2176  ;;  %v480_v39 = vsel %vm469_vm3, nan, %v479_v48  ;;  %vm677_vm8 = vweird.f32 %v2435_v24 }
 0x157   : > { %v564_v29 = vmul.f32 %v563_v63, %v561_v56  ;;  %v2179_v14 = vpop.eup %2178  ;;  %v789_v43 = vxor.u32 2147483648, %v2177_v12 }
 0x158   : > { %v2181_v15 = vpop.eup %2180  ;;  %v786_v53 = vxor.u32 2147483648, %v2179_v14 }
 0x159   : > { %v565_v50 = vxor.u32 2147483648, %v564_v29  ;;  %v2183_v4 = vpop.eup %2182  ;;  %v682_v23 = vxor.u32 2147483648, %v2181_v15  ;;  %v790_v45 = vsel %vm788_vm12, %v789_v43, %v2179_v14 }
 0x15a   : > { %v685_v26 = vxor.u32 2147483648, %v2183_v4  ;;  %v787_v44 = vsel %vm785_vm11, %v2177_v12, %v786_v53 }
 0x15b   : > { %v566_v30 = vsel %vm483_vm6, %v565_v50, %v564_v29  ;;  %v683_v11 = vsel %vm681_vm10, %v2183_v4, %v682_v23  ;;  %v791_v52 = vsel %vm784_vm1, %v787_v44, %v790_v45  ;;  %vm573_vm6 = vweird.f32 %v2447_v38 }
 0x15c   : > { %v569_v1 = vsel %vm2707_vm7, %v2447_v38, %v566_v30  ;;  %v686_v59 = vsel %vm684_vm15, %v685_v26, %v2181_v15  ;;  %vm781_vm7 = vweird.f32 %v2441_v31  ;;  %v806_v38 = vpop.permute.xlu0 %805  ;;  %v811_v31 = vpop.permute.xlu1 %810  ;;  %v2170_v26 = vld [vmem:[%s3344_s3 + $0x10] sm:$0xff]  }
 0x15d   : > { %2184 = vcosq.f32 %v569_v1  ;;  %v687_v41 = vsel %vm680_vm5, %v683_v11, %v686_v59  ;;  %v792_v56 = vsel %vm781_vm7, nan, %v791_v52  ;;  %2055 = vmatprep.mubr.msk.bf16.mxu0 %vm833_vm14, %v2170_v26 }
 0x15e   : > { %2186 = vsinq.f32 %v569_v1  ;;  %v688_v29 = vsel %vm677_vm8, nan, %v687_v41 }
 0x15f   : > { %v798_v40 = vpack.c.bf16 %v792_v56, %v688_v29 }
 0x160   : > { %v816_v35 = vpop.permute.xlu0 %815  ;;  %v821_v24 = vpop.permute.xlu1 %820 }
 0x167   : > { %v2185_v36 = vpop.eup %2184 }
 0x168   : > { %v2187_v28 = vpop.eup %2186  ;;  %v581_v3 = vxor.u32 2147483648, %v2185_v36 }
 0x169   : > { %v578_v34 = vxor.u32 2147483648, %v2187_v28 }
 0x16a   : > { %v582_v51 = vsel %vm580_vm0, %v581_v3, %v2187_v28 }
 0x16b   : > { %v579_v46 = vsel %vm577_vm2, %v2185_v36, %v578_v34 }
 0x16c   : > { %v583_v33 = vsel %vm576_vm4, %v579_v46, %v582_v51 }
 0x16d   : > { %v584_v58 = vsel %vm573_vm6, nan, %v583_v33 }
 0x16e   : > { %v797_v63 = vpack.c.bf16 %v584_v58, %v480_v39 }
 0x170   : > { %2043 = vmatprep.subr.bf16.mxu1 %v797_v63 }
 0x171   : > { %2044 = vmatpush3.bf16.msra.mxu1 %v797_v63 }
 0x172   : > { %2045 = vmatprep.subr.bf16.mxu1 %v798_v40 }
 0x175   : > { %2046 = vmatpush3.bf16.msra.mxu1 %v798_v40 }
 0x178   : > { %2048 = vmatmul.mubr.msk.bf16.vlgmr.msra.gmra.mrb[0].mxu1 %vm833_vm14, %v2169_v27 }
 0x24b   : > { %v2049_v62 = vpop.f32.mrb[0].mxu1 }
 0x24c   : > { %v2729_v49 = vadd.f32 %v2049_v62, %v816_v35  ;;  %v874_v50 = vpop.f32.mrb[1].mxu1 }
 0x24d   : > { %v2731_v55 = vadd.f32 %v874_v50, %v806_v38  ;;  %v2050_v54 = vpop.f32.mrb[2].mxu1 }
 0x24e   : > { %v1097_v30 = vand.u32 2147483647, %v2729_v49  ;;  %v1100_v32 = vand.u32 2139095040, %v2729_v49  ;;  %v2735_v61 = vadd.f32 %v2050_v54, %v821_v24  ;;  %v877_v42 = vpop.f32.mrb[3].mxu1 }
 0x24f   : > { %v889_v1 = vand.u32 2147483647, %v2731_v55  ;;  %v892_v57 = vand.u32 2139095040, %v2731_v55  ;;  %v2745_v15 = vadd.f32 %v877_v42, %v811_v31 }
 0x250   : > { %v1101_v6 = vshrl.u32 %v1100_v32, 23  ;;  %v1104_v60 = vand.u32 8388607, %v1097_v30  ;;  %v1204_v47 = vand.u32 2139095040, %v2735_v61  ;;  %v1201_v14 = vand.u32 2147483647, %v2735_v61 }
 0x251   : > { %v893_v8 = vshrl.u32 %v892_v57, 23  ;;  %v896_v10 = vand.u32 8388607, %v889_v1  ;;  %v996_v43 = vand.u32 2139095040, %v2745_v15 }
 0x252   : > { %v1982_v12 = vadd.s32 4294967169, %v1101_v6  ;;  %v1105_v17 = vor.u32 8388608, %v1104_v60  ;;  %v1205_v4 = vshrl.u32 %v1204_v47, 23  ;;  %v2749_v53 = vand.u32 8388607, %v1201_v14 }
 0x253   : > { %v1974_v22 = vadd.s32 4294967169, %v893_v8  ;;  %v897_v19 = vor.u32 8388608, %v896_v10  ;;  %v2767_v51 = vshrl.u32 %v996_v43, 23 }
 0x254   : > { %v1107_v18 = vadd.s32 1, %v1982_v12  ;;  %v1986_v21 = vadd.s32 4294967169, %v1205_v4  ;;  %v2752_v25 = vshll.u32 %v1105_v17, 8  ;;  %v1209_v3 = vor.u32 8388608, %v2749_v53 }
 0x255   : > { %v899_v20 = vadd.s32 1, %v1974_v22  ;;  %v2757_v44 = vshll.u32 %v897_v19, 8 }
 0x256   : > { %vm1108_vm9 = vcmp.gt.s32.totalorder %v1107_v18, 0  ;;  %v2762_v11 = vadd.s32 1, %v1986_v21 }
 0x257   : > { %v1109_v23 = vsel %vm1108_vm9, %v1107_v18, 0  ;;  %vm900_vm10 = vcmp.gt.s32.totalorder %v899_v20, 0 }
 0x258   : > { %v1110_v36 = vshrl.u32 %v1109_v23, 5  ;;  %v1111_v13 = vand.u32 31, %v1109_v23  ;;  %v901_v37 = vsel %vm900_vm10, %v899_v20, 0  ;;  %vm1212_vm0 = vcmp.gt.s32.totalorder %v2762_v11, 0 }
 0x259   : > { %v2759_v45 = vshrl.u32 %v901_v37, 5  ;;  %v903_v28 = vand.u32 31, %v901_v37 }
 0x25a   : > { %v1112_v34 = vsub.s32 32, %v1111_v13  ;;  %v1114_v59 = vshll.u32 %v2286_v0, %v1111_v13  ;;  %v1117_v48 = vshll.u32 %v2287_v2, %v1111_v13  ;;  %v1120_v52 = vshll.u32 %v2288_v5, %v1111_v13 }
 0x25b   : > { %v1123_v46 = vshll.u32 %v2289_v7, %v1111_v13  ;;  %v1126_v33 = vshll.u32 %v2290_v9, %v1111_v13  ;;  %vm1129_vm11 = vcmp.lt.s32.totalorder %v1110_v36, 1  ;;  %vm1130_vm12 = vcmp.lt.s32.totalorder %v1110_v36, 2 }
 0x25c   : > { %v1115_v41 = vshrl.u32 %v2287_v2, %v1112_v34  ;;  %v1118_v39 = vshrl.u32 %v2288_v5, %v1112_v34  ;;  %v1121_v58 = vshrl.u32 %v2289_v7, %v1112_v34  ;;  %v1113_v56 = vshrl.u32 %v2286_v0, %v1112_v34 }
 0x25d   : > { %v1124_v63 = vshrl.u32 %v2290_v9, %v1112_v34  ;;  %v1127_v29 = vshrl.u32 %v2291_v16, %v1112_v34  ;;  %vm1131_vm13 = vcmp.lt.s32.totalorder %v1110_v36, 3  ;;  %v904_v31 = vsub.s32 32, %v903_v28 }
 0x25e   : > { %v1116_v40 = vor.u32 %v1115_v41, %v1114_v59  ;;  %v1119_v27 = vor.u32 %v1118_v39, %v1117_v48  ;;  %v1122_v38 = vor.u32 %v1121_v58, %v1120_v52  ;;  %vm1132_vm15 = vcmp.lt.s32.totalorder %v1110_v36, 4 }
 0x25f   : > { %v1125_v35 = vor.u32 %v1124_v63, %v1123_v46  ;;  %v1128_v62 = vor.u32 %v1127_v29, %v1126_v33  ;;  %v906_v50 = vshll.u32 %v2286_v0, %v903_v28  ;;  %v909_v8 = vshll.u32 %v2287_v2, %v903_v28 }
 0x260   : > { %v1133_v24 = vsel %vm1129_vm11, %v1113_v56, %v1116_v40  ;;  %v1134_v54 = vsel %vm1132_vm15, %v1122_v38, 2102212464  ;;  %v1137_v32 = vsel %vm1129_vm11, %v1116_v40, %v1119_v27  ;;  %v1141_v42 = vsel %vm1129_vm11, %v1119_v27, %v1122_v38 }
 0x261   : > { %v1135_v57 = vsel %vm1131_vm13, %v1119_v27, %v1134_v54  ;;  %v1138_v6 = vsel %vm1132_vm15, %v1125_v35, 920167782  ;;  %v1142_v60 = vsel %vm1132_vm15, %v1128_v62, 1326507024  ;;  %v905_v12 = vshrl.u32 %v2286_v0, %v904_v31 }
 0x262   : > { %v1139_v10 = vsel %vm1131_vm13, %v1122_v38, %v1138_v6  ;;  %v1143_v47 = vsel %vm1131_vm13, %v1125_v35, %v1142_v60  ;;  %v907_v17 = vshrl.u32 %v2287_v2, %v904_v31  ;;  %v1136_v22 = vsel %vm1130_vm12, %v1133_v24, %v1135_v57 }
 0x263   : > { %v1140_v4 = vsel %vm1130_vm12, %v1137_v32, %v1139_v10  ;;  %v1144_v18 = vsel %vm1130_vm12, %v1141_v42, %v1143_v47  ;;  %v910_v19 = vshrl.u32 %v2288_v5, %v904_v31  ;;  %v912_v37 = vshll.u32 %v2288_v5, %v903_v28 }
 0x264   : > { %v2794_v20 = vmul.u32.u64.low %v2752_v25, %v1144_v18  ;;  %v2795_v21 = vmul.u32.u64.high %v2752_v25, %v1144_v18, %v2794_v20  ;;  %v2798_v43 = vmul.u32.u64.low %v2752_v25, %v1140_v4  ;;  %v2799_v23 = vmul.u32.u64.high %v2752_v25, %v1140_v4, %v2798_v43 }
 0x265   : > { %v908_v26 = vor.u32 %v907_v17, %v906_v50  ;;  %v911_v13 = vor.u32 %v910_v19, %v909_v8  ;;  %v913_v34 = vshrl.u32 %v2289_v7, %v904_v31  ;;  %v1152_v36 = vmul.u32 %v2752_v25, %v1136_v22 }
 0x266   : > { %v915_v59 = vshll.u32 %v2289_v7, %v903_v28  ;;  %v916_v48 = vshrl.u32 %v2290_v9, %v904_v31  ;;  %v919_v52 = vshrl.u32 %v2291_v16, %v904_v31  ;;  %v918_v33 = vshll.u32 %v2290_v9, %v903_v28 }
 0x267   : > { %v914_v46 = vor.u32 %v913_v34, %v912_v37  ;;  %vm921_vm1 = vcmp.lt.s32.totalorder %v2759_v45, 1  ;;  %vm922_vm2 = vcmp.lt.s32.totalorder %v2759_v45, 2  ;;  %vm1154_vm3 = vc.u32 %v2795_v21, %v2798_v43 }
 0x268   : > { %v1155_v41 = vadd.s32 1, %v2799_v23  ;;  %v917_v39 = vor.u32 %v916_v48, %v915_v59  ;;  %vm923_vm4 = vcmp.lt.s32.totalorder %v2759_v45, 3  ;;  %v920_v25 = vor.u32 %v919_v52, %v918_v33 }
 0x269   : > { %vm924_vm5 = vcmp.lt.s32.totalorder %v2759_v45, 4  ;;  %v925_v58 = vsel %vm921_vm1, %v905_v12, %v908_v26  ;;  %v929_v56 = vsel %vm921_vm1, %v908_v26, %v911_v13  ;;  %v933_v40 = vsel %vm921_vm1, %v911_v13, %v914_v46 }
 0x26a   : > { %v1156_v63 = vsel %vm1154_vm3, %v1155_v41, %v2799_v23  ;;  %v926_v28 = vsel %vm924_vm5, %v914_v46, 2102212464  ;;  %v930_v29 = vsel %vm924_vm5, %v917_v39, 920167782  ;;  %v934_v35 = vsel %vm924_vm5, %v920_v25, 1326507024 }
 0x26b   : > { %v1157_v27 = vadd.s32 %v1156_v63, %v1152_v36  ;;  %v927_v38 = vsel %vm923_vm4, %v911_v13, %v926_v28  ;;  %v931_v31 = vsel %vm923_vm4, %v914_v46, %v930_v29  ;;  %v935_v24 = vsel %vm923_vm4, %v917_v39, %v934_v35 }
 0x26c   : > { %v928_v62 = vsel %vm922_vm2, %v925_v58, %v927_v38  ;;  %v932_v50 = vsel %vm922_vm2, %v929_v56, %v931_v31  ;;  %v1213_v54 = vsel %vm1212_vm0, %v2762_v11, 0  ;;  %v936_v42 = vsel %vm922_vm2, %v933_v40, %v935_v24 }
 0x26d   : > { %v1158_v32 = vadd.s32 536870912, %v1157_v27  ;;  %v2827_v57 = vmul.u32.u64.low %v2757_v44, %v932_v50  ;;  %v2828_v6 = vmul.u32.u64.high %v2757_v44, %v932_v50, %v2827_v57  ;;  %v1214_v10 = vshrl.u32 %v1213_v54, 5 }
 0x26e   : > { %v2832_v60 = vmul.u32.u64.low %v2757_v44, %v936_v42  ;;  %v2833_v8 = vmul.u32.u64.high %v2757_v44, %v936_v42, %v2832_v60  ;;  %v1215_v12 = vand.u32 31, %v1213_v54  ;;  %v944_v17 = vmul.u32 %v2757_v44, %v928_v62 }
 0x26f   : > { %v2835_v47 = vshrl.u32 %v1158_v32, 30  ;;  %v2840_v11 = vshll.u32 %v1209_v3, 8  ;;  %v947_v22 = vadd.s32 1, %v2828_v6  ;;  %v1978_v18 = vadd.s32 4294967169, %v2767_v51 }
 0x270   : > { %v1216_v4 = vsub.s32 32, %v1215_v12  ;;  %vm946_vm6 = vc.u32 %v2833_v8, %v2827_v57  ;;  %v1218_v19 = vshll.u32 %v2286_v0, %v1215_v12  ;;  %v1221_v20 = vshll.u32 %v2287_v2, %v1215_v12 }
 0x271   : > { %v1160_v45 = vshll.u32 %v2835_v47, 30  ;;  %vm1233_vm7 = vcmp.lt.s32.totalorder %v1214_v10, 1  ;;  %v948_v53 = vsel %vm946_vm6, %v947_v22, %v2828_v6  ;;  %v1224_v23 = vshll.u32 %v2288_v5, %v1215_v12 }
 0x272   : > { %v1219_v3 = vshrl.u32 %v2287_v2, %v1216_v4  ;;  %v949_v26 = vadd.s32 %v948_v53, %v944_v17  ;;  %v1222_v13 = vshrl.u32 %v2288_v5, %v1216_v4  ;;  %v1225_v51 = vshrl.u32 %v2289_v7, %v1216_v4 }
 0x273   : > { %v2849_v44 = vsub.s32 %v1157_v27, %v1160_v45  ;;  %v1227_v37 = vshll.u32 %v2289_v7, %v1215_v12  ;;  %v1228_v59 = vshrl.u32 %v2290_v9, %v1216_v4  ;;  %v1230_v48 = vshll.u32 %v2290_v9, %v1215_v12 }
 0x274   : > { %v1220_v36 = vor.u32 %v1219_v3, %v1218_v19  ;;  %v950_v52 = vadd.s32 536870912, %v949_v26  ;;  %v1223_v46 = vor.u32 %v1222_v13, %v1221_v20  ;;  %v1226_v33 = vor.u32 %v1225_v51, %v1224_v23 }
 0x275   : > { %v1163_v34 = vsub.s32 0, %v2849_v44  ;;  %v1231_v41 = vshrl.u32 %v2291_v16, %v1216_v4  ;;  %v1229_v39 = vor.u32 %v1228_v59, %v1227_v37  ;;  %vm1234_vm8 = vcmp.lt.s32.totalorder %v1214_v10, 2 }
 0x276   : > { %vm1235_vm9 = vcmp.lt.s32.totalorder %v1214_v10, 3  ;;  %vm1236_vm10 = vcmp.lt.s32.totalorder %v1214_v10, 4  ;;  %v2861_v25 = vshrl.u32 %v950_v52, 30  ;;  %v1241_v63 = vsel %vm1233_vm7, %v1220_v36, %v1223_v46 }
 0x277   : > { %v1232_v58 = vor.u32 %v1231_v41, %v1230_v48  ;;  %v1238_v56 = vsel %vm1236_vm10, %v1226_v33, 2102212464  ;;  %v1217_v28 = vshrl.u32 %v2286_v0, %v1216_v4  ;;  %v1242_v29 = vsel %vm1236_vm10, %v1229_v39, 920167782 }
 0x278   : > { %v1245_v40 = vsel %vm1233_vm7, %v1223_v46, %v1226_v33  ;;  %v1003_v27 = vadd.s32 1, %v1978_v18  ;;  %v1983_v38 = vmin.u32 %v1163_v34, %v2849_v44  ;;  %v952_v31 = vshll.u32 %v2861_v25, 30 }
 0x279   : > { %v1243_v35 = vsel %vm1235_vm9, %v1226_v33, %v1242_v29  ;;  %v1246_v62 = vsel %vm1236_vm10, %v1232_v58, 1326507024  ;;  %v1237_v50 = vsel %vm1233_vm7, %v1217_v28, %v1220_v36  ;;  %v1239_v24 = vsel %vm1235_vm9, %v1223_v46, %v1238_v56 }
 0x27a   : > { %v1244_v54 = vsel %vm1234_vm8, %v1241_v63, %v1243_v35  ;;  %v1247_v32 = vsel %vm1235_vm9, %v1229_v39, %v1246_v62  ;;  %v2873_v42 = vsub.s32 %v949_v26, %v952_v31  ;;  %vm1004_vm11 = vcmp.gt.s32.totalorder %v1003_v27, 0 }
 0x27b   : > { %v1248_v6 = vsel %vm1234_vm8, %v1245_v40, %v1247_v32  ;;  %v2877_v60 = vmul.u32.u64.low %v2840_v11, %v1244_v54  ;;  %v2878_v12 = vmul.u32.u64.high %v2840_v11, %v1244_v54, %v2877_v60  ;;  %v1240_v4 = vsel %vm1234_vm8, %v1237_v50, %v1239_v24 }
 0x27c   : > { %v2882_v17 = vmul.u32.u64.low %v2840_v11, %v1248_v6  ;;  %v2883_v45 = vmul.u32.u64.high %v2840_v11, %v1248_v6, %v2882_v17  ;;  %v955_v22 = vsub.s32 0, %v2873_v42  ;;  %v1005_v18 = vsel %vm1004_vm11, %v1003_v27, 0 }
 0x27d   : > { %v993_v19 = vand.u32 2147483647, %v2745_v15  ;;  %v1165_v20 = vclz %v1983_v38  ;;  %v1259_v3 = vadd.s32 1, %v2878_v12  ;;  %v1007_v23 = vand.u32 31, %v1005_v18 }
 0x27e   : > { %v1975_v53 = vmin.u32 %v955_v22, %v2873_v42  ;;  %v1256_v26 = vmul.u32 %v2840_v11, %v1240_v4  ;;  %vm1258_vm12 = vc.u32 %v2883_v45, %v2877_v60  ;;  %v1006_v39 = vshrl.u32 %v1005_v18, 5 }
 0x27f   : > { %v1260_v51 = vsel %vm1258_vm12, %v1259_v3, %v2878_v12  ;;  %v1008_v37 = vsub.s32 32, %v1007_v23  ;;  %v1984_v34 = vadd.s32 4294967294, %v1165_v20  ;;  %v1000_v36 = vand.u32 8388607, %v993_v19 }
 0x280   : > { %v957_v13 = vclz %v1975_v53  ;;  %v1261_v10 = vadd.s32 %v1260_v51, %v1256_v26  ;;  %v1010_v58 = vshll.u32 %v2286_v0, %v1007_v23  ;;  %v1013_v63 = vshll.u32 %v2287_v2, %v1007_v23 }
 0x281   : > { %v1011_v52 = vshrl.u32 %v2287_v2, %v1008_v37  ;;  %v1014_v11 = vshrl.u32 %v2288_v5, %v1008_v37  ;;  %v1017_v33 = vshrl.u32 %v2289_v7, %v1008_v37  ;;  %vm1985_vm13 = vcmp.lt.s32.totalorder %v1984_v34, 0 }
 0x282   : > { %v1262_v59 = vadd.s32 536870912, %v1261_v10  ;;  %v1976_v48 = vadd.s32 4294967294, %v957_v13  ;;  %v1001_v41 = vor.u32 8388608, %v1000_v36  ;;  %v1016_v28 = vshll.u32 %v2288_v5, %v1007_v23 }
 0x283   : > { %v1020_v29 = vshrl.u32 %v2290_v9, %v1008_v37  ;;  %v1012_v40 = vor.u32 %v1011_v52, %v1010_v58  ;;  %v1019_v27 = vshll.u32 %v2289_v7, %v1007_v23  ;;  %v1023_v38 = vshrl.u32 %v2291_v16, %v1008_v37 }
 0x284   : > { %v2897_v46 = vshrl.u32 %v1262_v59, 30  ;;  %vm1977_vm15 = vcmp.lt.s32.totalorder %v1976_v48, 0  ;;  %v1015_v35 = vor.u32 %v1014_v11, %v1013_v63  ;;  %v1018_v62 = vor.u32 %v1017_v33, %v1016_v28 }
 0x285   : > { %v1022_v50 = vshll.u32 %v2290_v9, %v1007_v23  ;;  %v1021_v24 = vor.u32 %v1020_v29, %v1019_v27  ;;  %v960_v54 = vsel %vm1977_vm15, 0, %v1976_v48  ;;  %v2913_v12 = vsel %vm1985_vm13, 0, %v1984_v34 }
 0x286   : > { %v1264_v56 = vshll.u32 %v2897_v46, 30  ;;  %vm1025_vm0 = vcmp.lt.s32.totalorder %v1006_v39, 1  ;;  %vm1028_vm1 = vcmp.lt.s32.totalorder %v1006_v39, 4  ;;  %v1041_v17 = vshll.u32 %v1001_v41, 8 }
 0x287   : > { %v1024_v6 = vor.u32 %v1023_v38, %v1022_v50  ;;  %v1009_v4 = vshrl.u32 %v2286_v0, %v1008_v37  ;;  %v1030_v18 = vsel %vm1028_vm1, %v1018_v62, 2102212464  ;;  %v1033_v20 = vsel %vm1025_vm0, %v1012_v40, %v1015_v35 }
 0x288   : > { %v2908_v31 = vsub.s32 %v1261_v10, %v1264_v56  ;;  %v965_v53 = vsub.s32 4294967266, %v960_v54  ;;  %vm1026_vm2 = vcmp.lt.s32.totalorder %v1006_v39, 2  ;;  %vm1027_vm3 = vcmp.lt.s32.totalorder %v1006_v39, 3 }
 0x289   : > { %v1034_v3 = vsel %vm1028_vm1, %v1021_v24, 920167782  ;;  %v1037_v13 = vsel %vm1025_vm0, %v1015_v35, %v1018_v62  ;;  %v1038_v51 = vsel %vm1028_vm1, %v1024_v6, 1326507024  ;;  %v1029_v10 = vsel %vm1025_vm0, %v1009_v4, %v1012_v40 }
 0x28a   : > { %v1267_v32 = vsub.s32 0, %v2908_v31  ;;  %v1035_v26 = vsel %vm1027_vm3, %v1018_v62, %v1034_v3  ;;  %v1031_v34 = vsel %vm1027_vm3, %v1015_v35, %v1030_v18  ;;  %v1039_v59 = vsel %vm1027_vm3, %v1021_v24, %v1038_v51 }
 0x28b   : > { %v1036_v36 = vsel %vm1026_vm2, %v1033_v20, %v1035_v26  ;;  %v1040_v52 = vsel %vm1026_vm2, %v1037_v13, %v1039_v59  ;;  %v1173_v58 = vsub.s32 4294967266, %v2913_v12  ;;  %v1032_v63 = vsel %vm1026_vm2, %v1029_v10, %v1031_v34 }
 0x28c   : > { %v1987_v22 = vmin.u32 %v1267_v32, %v2908_v31  ;;  %v2919_v11 = vmul.u32.u64.low %v1041_v17, %v1036_v36  ;;  %v2920_v37 = vmul.u32.u64.high %v1041_v17, %v1036_v36, %v2919_v11  ;;  %v966_v28 = vadd.s32 127, %v965_v53 }
 0x28d   : > { %v2923_v33 = vmul.u32.u64.low %v1041_v17, %v1040_v52  ;;  %v2924_v41 = vmul.u32.u64.high %v1041_v17, %v1040_v52, %v2923_v33  ;;  %v961_v27 = vsub.s32 32, %v960_v54  ;;  %v1048_v35 = vmul.u32 %v1041_v17, %v1032_v63 }
 0x28e   : > { %v1269_v23 = vclz %v1987_v22  ;;  %v1051_v40 = vadd.s32 1, %v2920_v37  ;;  %v1174_v62 = vadd.s32 127, %v1173_v58  ;;  %v945_v24 = vadd.s32 %v2827_v57, %v2833_v8 }
 0x28f   : > { %vm1050_vm5 = vc.u32 %v2924_v41, %v2919_v11  ;;  %v967_v32 = vshll.u32 %v966_v28, 23  ;;  %v1169_v22 = vsub.s32 32, %v2913_v12  ;;  %v1257_v18 = vadd.s32 %v2877_v60, %v2883_v45 }
 0x290   : > { %v1988_v48 = vadd.s32 4294967294, %v1269_v23  ;;  %v1052_v50 = vsel %vm1050_vm5, %v1051_v40, %v2920_v37  ;;  %v963_v4 = vshrl.u32 %v945_v24, %v961_v27  ;;  %v1153_v17 = vadd.s32 %v2798_v43, %v2795_v21 }
 0x291   : > { %v1053_v39 = vadd.s32 %v1052_v50, %v1048_v35  ;;  %v1175_v3 = vshll.u32 %v1174_v62, 23  ;;  %v962_v23 = vshll.u32 %v2873_v42, %v960_v54  ;;  %v968_v26 = vor.u32 4788187, %v967_v32 }
 0x292   : > { %vm1989_vm4 = vcmp.lt.s32.totalorder %v1988_v48, 0  ;;  %v1171_v8 = vshrl.u32 %v1153_v17, %v1169_v22  ;;  %v1170_v60 = vshll.u32 %v2849_v44, %v2913_v12  ;;  %vm891_vm7 = vcmp.lt.s32.totalorder %v2731_v55, 0 }
 0x293   : > { %v1272_v56 = vsel %vm1989_vm4, 0, %v1988_v48  ;;  %v1054_v53 = vadd.s32 536870912, %v1053_v39  ;;  %v964_v51 = vor.u32 %v963_v4, %v962_v23  ;;  %v1176_v45 = vor.u32 4788187, %v1175_v3 }
 0x294   : > { %v1277_v29 = vsub.s32 4294967266, %v1272_v56  ;;  %v1273_v6 = vsub.s32 32, %v1272_v56  ;;  %v1274_v10 = vshll.u32 %v2908_v31, %v1272_v56  ;;  %v969_v59 = vand.u32 2147483647, %v968_v26 }
 0x295   : > { %v2940_v57 = vshrl.u32 %v1054_v53, 30  ;;  %v1172_v48 = vor.u32 %v1171_v8, %v1170_v60  ;;  %v971_v42 = vcvt.s32.f32 %v964_v51  ;;  %v1177_v37 = vand.u32 2147483647, %v1176_v45 }
 0x296   : > { %v1278_v38 = vadd.s32 127, %v1277_v29  ;;  %v1275_v13 = vshrl.u32 %v1257_v18, %v1273_v6  ;;  %v1049_v62 = vadd.s32 %v2919_v11, %v2924_v41  ;;  %vm2953_vm8 = vcmp.le.f32.partialorder %v889_v1, 0.7853982 }
 0x297   : > { %v1056_v36 = vshll.u32 %v2940_v57, 30  ;;  %v972_v33 = vmul.f32 %v971_v42, %v969_v59  ;;  %v1179_v28 = vcvt.s32.f32 %v1172_v48  ;;  %vm1203_vm9 = vcmp.lt.s32.totalorder %v2735_v61, 0 }
 0x298   : > { %v1279_v20 = vshll.u32 %v1278_v38, 23  ;;  %v1276_v21 = vor.u32 %v1275_v13, %v1274_v10  ;;  %vm1099_vm10 = vcmp.lt.s32.totalorder %v2729_v49, 0  ;;  %vm2968_vm11 = vcmp.le.f32.partialorder %v1201_v14, 0.7853982 }
 0x299   : > { %v1057_v43 = vsub.s32 %v1053_v39, %v1056_v36  ;;  %v1180_v29 = vmul.f32 %v1179_v28, %v1177_v37  ;;  %v973_v40 = vxor.u32 2147483648, %v972_v33  ;;  %vm2977_vm12 = vcmp.le.f32.partialorder %v1097_v30, 0.7853982 }
 0x29a   : > { %v1280_v34 = vor.u32 4788187, %v1279_v20  ;;  %v1283_v58 = vcvt.s32.f32 %v1276_v21  ;;  %v975_v23 = vsub.s32 4, %v2861_v25  ;;  %v1183_v26 = vsub.s32 4, %v2835_v47 }
 0x29b   : > { %v1059_v52 = vsub.s32 0, %v1057_v43  ;;  %v1181_v44 = vxor.u32 2147483648, %v1180_v29  ;;  %v974_v35 = vsel %vm891_vm7, %v973_v40, %v972_v33  ;;  %v1287_v13 = vsub.s32 4, %v2897_v46 }
 0x29c   : > { %v1281_v54 = vand.u32 2147483647, %v1280_v34  ;;  %v977_v11 = vsel %vm2953_vm8, %v2731_v55, %v974_v35  ;;  %v976_v10 = vsel %vm891_vm7, %v975_v23, %v2861_v25  ;;  %v1079_v34 = vsub.s32 4, %v2940_v57 }
 0x29d   : > { %v1979_v63 = vmin.u32 %v1059_v52, %v1057_v43  ;;  %v1182_v1 = vsel %vm1099_vm10, %v1181_v44, %v1180_v29  ;;  %2188 = vcosq.f32 %v977_v11  ;;  %v1184_v36 = vsel %vm1099_vm10, %v1183_v26, %v2835_v47 }
 0x29e   : > { %v1284_v31 = vmul.f32 %v1283_v58, %v1281_v54  ;;  %v1185_v14 = vsel %vm2977_vm12, %v2729_v49, %v1182_v1  ;;  %2190 = vsinq.f32 %v977_v11  ;;  %v1288_v60 = vsel %vm1203_vm9, %v1287_v13, %v2897_v46 }
 0x29f   : > { %v1061_v56 = vclz %v1979_v63  ;;  %vm2999_vm13 = vcmp.le.f32.partialorder %v993_v19, 0.7853982  ;;  %vm995_vm15 = vcmp.lt.s32.totalorder %v2745_v15, 0  ;;  %v978_v25 = vsel %vm2953_vm8, 0, %v976_v10 }
 0x2a0   : > { %v1285_v38 = vxor.u32 2147483648, %v1284_v31  ;;  %v1186_v47 = vsel %vm2977_vm12, 0, %v1184_v36  ;;  %v1290_v46 = vsel %vm2968_vm11, 0, %v1288_v60  ;;  %v982_v42 = vadd.s32 3, %v978_v25 }
 0x2a1   : > { %v1980_v27 = vadd.s32 4294967294, %v1061_v56  ;;  %v1190_v37 = vadd.s32 3, %v1186_v47  ;;  %vm981_vm10 = vweird.f32 %v2731_v55  ;;  %v2171_v55 = vld [vmem:[%s3344_s3 + $0x18] sm:$0xff]  }
 0x2a2   : > { %v1286_v6 = vsel %vm1203_vm9, %v1285_v38, %v1284_v31  ;;  %v983_v28 = vand.u32 3, %v982_v42 }
 0x2a3   : > { %vm1981_vm6 = vcmp.lt.s32.totalorder %v1980_v27, 0  ;;  %v1289_v53 = vsel %vm2968_vm11, %v2735_v61, %v1286_v6  ;;  %v1191_v29 = vand.u32 3, %v1190_v37 }
 0x2a4   : > { %v1064_v12 = vsel %vm1981_vm6, 0, %v1980_v27  ;;  %2192 = vcosq.f32 %v1289_v53  ;;  %vm985_vm0 = vcmp.eq.s32.totalorder %v983_v28, 0  ;;  %vm988_vm1 = vcmp.eq.s32.totalorder %v983_v28, 2 }
 0x2a5   : > { %v1065_v50 = vsub.s32 32, %v1064_v12  ;;  %v1069_v24 = vsub.s32 4294967266, %v1064_v12  ;;  %v1066_v39 = vshll.u32 %v1057_v43, %v1064_v12  ;;  %2194 = vsinq.f32 %v1289_v53 }
 0x2a6   : > { %2196 = vsinq.f32 %v1185_v14  ;;  %v1080_v43 = vsel %vm995_vm15, %v1079_v34, %v2940_v57  ;;  %v1294_v57 = vadd.s32 3, %v1290_v46  ;;  %vm1193_vm2 = vcmp.eq.s32.totalorder %v1191_v29, 0  ;;  %v1325_v34 = vpop.permute.xlu1 %1324 }
 0x2a7   : > { %v1067_v22 = vshrl.u32 %v1049_v62, %v1065_v50  ;;  %v1070_v4 = vadd.s32 127, %v1069_v24  ;;  %2198 = vcosq.f32 %v1185_v14  ;;  %v2189_v48 = vpop.eup %2188  ;;  %v1082_v52 = vsel %vm2999_vm13, 0, %v1080_v43 }
 0x2a8   : > { %v2191_v54 = vpop.eup %2190  ;;  %v1086_v31 = vadd.s32 3, %v1082_v52  ;;  %v1295_v40 = vand.u32 3, %v1294_v57  ;;  %v989_v38 = vxor.u32 2147483648, %v2189_v48  ;;  %vm984_vm5 = vcmp.lt.s32.totalorder %v983_v28, 2 }
 0x2a9   : > { %v1068_v18 = vor.u32 %v1067_v22, %v1066_v39  ;;  %v1071_v20 = vshll.u32 %v1070_v4, 23  ;;  %v986_v27 = vxor.u32 2147483648, %v2191_v54  ;;  %vm1196_vm6 = vcmp.eq.s32.totalorder %v1191_v29, 2 }
 0x2aa   : > { %v1087_v62 = vand.u32 3, %v1086_v31  ;;  %vm1297_vm3 = vcmp.eq.s32.totalorder %v1295_v40, 0  ;;  %vm1300_vm4 = vcmp.eq.s32.totalorder %v1295_v40, 2  ;;  %v990_v6 = vsel %vm988_vm1, %v989_v38, %v2191_v54  ;;  %v1335_v59 = vpop.permute.xlu1 %1334 }
 0x2ab   : > { %v1072_v3 = vor.u32 4788187, %v1071_v20  ;;  %v1075_v51 = vcvt.s32.f32 %v1068_v18  ;;  %v987_v32 = vsel %vm985_vm0, %v2189_v48, %v986_v27  ;;  %vm1296_vm8 = vcmp.lt.s32.totalorder %v1295_v40, 2 }
 0x2ac   : > { %vm1092_vm7 = vcmp.eq.s32.totalorder %v1087_v62, 2  ;;  %v991_v20 = vsel %vm984_vm5, %v987_v32, %v990_v6  ;;  %vm1089_vm9 = vcmp.eq.s32.totalorder %v1087_v62, 0  ;;  %vm1088_vm11 = vcmp.lt.s32.totalorder %v1087_v62, 2 }
 0x2ad   : > { %v1073_v8 = vand.u32 2147483647, %v1072_v3  ;;  %vm1192_vm12 = vcmp.lt.s32.totalorder %v1191_v29, 2  ;;  %v992_v26 = vsel %vm981_vm10, nan, %v991_v20  ;;  %vm1189_vm0 = vweird.f32 %v2729_v49 }
 0x2ae   : > { %v2193_v33 = vpop.eup %2192 }
 0x2af   : > { %v1076_v30 = vmul.f32 %v1075_v51, %v1073_v8  ;;  %v2195_v58 = vpop.eup %2194  ;;  %v1301_v12 = vxor.u32 2147483648, %v2193_v33 }
 0x2b0   : > { %v2197_v63 = vpop.eup %2196  ;;  %v1298_v44 = vxor.u32 2147483648, %v2195_v58 }
 0x2b1   : > { %v1077_v45 = vxor.u32 2147483648, %v1076_v30  ;;  %v2199_v56 = vpop.eup %2198  ;;  %v1194_v35 = vxor.u32 2147483648, %v2197_v63  ;;  %v1302_v22 = vsel %vm1300_vm4, %v1301_v12, %v2195_v58 }
 0x2b2   : > { %v1197_v50 = vxor.u32 2147483648, %v2199_v56  ;;  %v1299_v39 = vsel %vm1297_vm3, %v2193_v33, %v1298_v44 }
 0x2b3   : > { %v1078_v21 = vsel %vm995_vm15, %v1077_v45, %v1076_v30  ;;  %v1195_v1 = vsel %vm1193_vm2, %v2199_v56, %v1194_v35  ;;  %v1303_v17 = vsel %vm1296_vm8, %v1299_v39, %v1302_v22  ;;  %vm1293_vm15 = vweird.f32 %v2735_v61 }
 0x2b4   : > { %v1081_v19 = vsel %vm2999_vm13, %v2745_v15, %v1078_v21  ;;  %v1198_v18 = vsel %vm1196_vm6, %v1197_v50, %v2197_v63  ;;  %vm1085_vm13 = vweird.f32 %v2745_v15  ;;  %v1304_v8 = vsel %vm1293_vm15, nan, %v1303_v17  ;;  %v1320_v15 = vpop.permute.xlu0 %1319 }
 0x2b5   : > { %2200 = vcosq.f32 %v1081_v19  ;;  %v1199_v14 = vsel %vm1192_vm12, %v1195_v1, %v1198_v18  ;;  %v2292_v61 = vmov 0.0  }
 0x2b6   : > { %2202 = vsinq.f32 %v1081_v19  ;;  %v1200_v30 = vsel %vm1189_vm0, nan, %v1199_v14  ;;  %2059 = vmatprep.subr.bf16.mxu1 %v2292_v61 }
 0x2b7   : > { %v1311_v10 = vpack.c.bf16 %v1304_v8, %v1200_v30 }
 0x2b8   : > { %v1330_v36 = vpop.permute.xlu0 %1329 }
 0x2bf   : > { %v2201_v24 = vpop.eup %2200 }
 0x2c0   : > { %v2203_v4 = vpop.eup %2202  ;;  %v1093_v11 = vxor.u32 2147483648, %v2201_v24 }
 0x2c1   : > { %v1090_v41 = vxor.u32 2147483648, %v2203_v4 }
 0x2c2   : > { %v1094_v53 = vsel %vm1092_vm7, %v1093_v11, %v2203_v4 }
 0x2c3   : > { %v1091_v3 = vsel %vm1089_vm9, %v2201_v24, %v1090_v41 }
 0x2c4   : > { %v1095_v23 = vsel %vm1088_vm11, %v1091_v3, %v1094_v53 }
 0x2c5   : > { %v1096_v13 = vsel %vm1085_vm13, nan, %v1095_v23 }
 0x2c6   : > { %v1310_v51 = vpack.c.bf16 %v1096_v13, %v992_v26 }
 0x2c8   : > { %2051 = vmatprep.subr.bf16.mxu0 %v1310_v51 }
 0x2c9   : > { %2052 = vmatpush3.bf16.msra.mxu0 %v1310_v51 }
 0x2ca   : > { %2053 = vmatprep.subr.bf16.mxu0 %v1311_v10 }
 0x2cd   : > { %2054 = vmatpush3.bf16.msra.mxu0 %v1311_v10 }
 0x2d0   : > { %2056 = vmatmul.mubr.msk.bf16.vlgmr.msra.gmra.mrb[4].mxu0 %vm833_vm14, %v2171_v55 }
 0x3a3   : > { %v2057_v60 = vpop.f32.mrb[4].mxu0 }
 0x3a4   : > { %v3025_v49 = vadd.f32 %v2057_v60, %v1330_v36  ;;  %v1387_v45 = vpop.f32.mrb[5].mxu0 }
 0x3a5   : > { %v3027_v25 = vadd.f32 %v1387_v45, %v1320_v15  ;;  %v2058_v21 = vpop.f32.mrb[6].mxu0 }
 0x3a6   : > { %v1610_v43 = vand.u32 2147483647, %v3025_v49  ;;  %v1613_v47 = vand.u32 2139095040, %v3025_v49  ;;  %v3031_v46 = vadd.f32 %v2058_v21, %v1335_v59  ;;  %v1390_v19 = vpop.f32.mrb[7].mxu0 }
 0x3a7   : > { %v1402_v48 = vand.u32 2147483647, %v3027_v25  ;;  %v1405_v42 = vand.u32 2139095040, %v3027_v25  ;;  %v3046_v32 = vadd.f32 %v1390_v19, %v1325_v34 }
 0x3a8   : > { %v1614_v54 = vshrl.u32 %v1613_v47, 23  ;;  %v1617_v52 = vand.u32 8388607, %v1610_v43  ;;  %v1717_v33 = vand.u32 2139095040, %v3031_v46 }
 0x3a9   : > { %v1406_v37 = vshrl.u32 %v1405_v42, 23  ;;  %v1409_v57 = vand.u32 8388607, %v1402_v48 }
 0x3aa   : > { %v2010_v58 = vadd.s32 4294967169, %v1614_v54  ;;  %v1718_v28 = vshrl.u32 %v1717_v33, 23  ;;  %v1618_v56 = vor.u32 8388608, %v1617_v52 }
 0x3ab   : > { %v2002_v63 = vadd.s32 4294967169, %v1406_v37  ;;  %v1410_v29 = vor.u32 8388608, %v1409_v57 }
 0x3ac   : > { %v1620_v31 = vadd.s32 1, %v2010_v58  ;;  %v2014_v27 = vadd.s32 4294967169, %v1718_v28  ;;  %v3040_v62 = vshll.u32 %v1618_v56, 8 }
 0x3ad   : > { %v1412_v40 = vadd.s32 1, %v2002_v63  ;;  %v3042_v50 = vshll.u32 %v1410_v29, 8 }
 0x3ae   : > { %vm1621_vm1 = vcmp.gt.s32.totalorder %v1620_v31, 0  ;;  %v3044_v24 = vadd.s32 1, %v2014_v27 }
 0x3af   : > { %v1622_v38 = vsel %vm1621_vm1, %v1620_v31, 0  ;;  %vm1413_vm2 = vcmp.gt.s32.totalorder %v1412_v40, 0 }
 0x3b0   : > { %v1623_v44 = vshrl.u32 %v1622_v38, 5  ;;  %v1624_v12 = vand.u32 31, %v1622_v38  ;;  %v1414_v35 = vsel %vm1413_vm2, %v1412_v40, 0  ;;  %vm1725_vm7 = vcmp.gt.s32.totalorder %v3044_v24, 0 }
 0x3b1   : > { %v3049_v22 = vshrl.u32 %v1414_v35, 5  ;;  %v1416_v4 = vand.u32 31, %v1414_v35 }
 0x3b2   : > { %v1625_v6 = vsub.s32 32, %v1624_v12  ;;  %v1627_v39 = vshll.u32 %v2286_v0, %v1624_v12  ;;  %v1630_v11 = vshll.u32 %v2287_v2, %v1624_v12  ;;  %v1633_v1 = vshll.u32 %v2288_v5, %v1624_v12 }
 0x3b3   : > { %v1636_v41 = vshll.u32 %v2289_v7, %v1624_v12  ;;  %v1639_v18 = vshll.u32 %v2290_v9, %v1624_v12  ;;  %vm1642_vm3 = vcmp.lt.s32.totalorder %v1623_v44, 1  ;;  %vm1643_vm4 = vcmp.lt.s32.totalorder %v1623_v44, 2 }
 0x3b4   : > { %v1628_v20 = vshrl.u32 %v2287_v2, %v1625_v6  ;;  %v1631_v53 = vshrl.u32 %v2288_v5, %v1625_v6  ;;  %v1634_v17 = vshrl.u32 %v2289_v7, %v1625_v6  ;;  %v1626_v3 = vshrl.u32 %v2286_v0, %v1625_v6 }
 0x3b5   : > { %v1637_v23 = vshrl.u32 %v2290_v9, %v1625_v6  ;;  %v1640_v14 = vshrl.u32 %v2291_v16, %v1625_v6  ;;  %v1417_v51 = vsub.s32 32, %v1416_v4  ;;  %vm1644_vm5 = vcmp.lt.s32.totalorder %v1623_v44, 3 }
 0x3b6   : > { %v1629_v26 = vor.u32 %v1628_v20, %v1627_v39  ;;  %v1632_v13 = vor.u32 %v1631_v53, %v1630_v11  ;;  %v1635_v8 = vor.u32 %v1634_v17, %v1633_v1  ;;  %vm1645_vm6 = vcmp.lt.s32.totalorder %v1623_v44, 4 }
 0x3b7   : > { %v1638_v30 = vor.u32 %v1637_v23, %v1636_v41  ;;  %v1641_v10 = vor.u32 %v1640_v14, %v1639_v18  ;;  %v1419_v21 = vshll.u32 %v2286_v0, %v1416_v4  ;;  %v1420_v42 = vshrl.u32 %v2287_v2, %v1417_v51 }
 0x3b8   : > { %v1646_v55 = vsel %vm1642_vm3, %v1626_v3, %v1629_v26  ;;  %v1647_v15 = vsel %vm1645_vm6, %v1635_v8, 2102212464  ;;  %v1650_v34 = vsel %vm1642_vm3, %v1629_v26, %v1632_v13  ;;  %v1654_v36 = vsel %vm1642_vm3, %v1632_v13, %v1635_v8 }
 0x3b9   : > { %v1648_v60 = vsel %vm1644_vm5, %v1632_v13, %v1647_v15  ;;  %v1651_v45 = vsel %vm1645_vm6, %v1638_v30, 920167782  ;;  %v1655_v59 = vsel %vm1645_vm6, %v1641_v10, 1326507024  ;;  %v1422_v54 = vshll.u32 %v2287_v2, %v1416_v4 }
 0x3ba   : > { %v1652_v47 = vsel %vm1644_vm5, %v1635_v8, %v1651_v45  ;;  %v1656_v19 = vsel %vm1644_vm5, %v1638_v30, %v1655_v59  ;;  %v1649_v52 = vsel %vm1643_vm4, %v1646_v55, %v1648_v60  ;;  %v1423_v33 = vshrl.u32 %v2288_v5, %v1417_v51 }
 0x3bb   : > { %v1653_v37 = vsel %vm1643_vm4, %v1650_v34, %v1652_v47  ;;  %v1657_v57 = vsel %vm1643_vm4, %v1654_v36, %v1656_v19  ;;  %v1421_v56 = vor.u32 %v1420_v42, %v1419_v21  ;;  %v1425_v40 = vshll.u32 %v2288_v5, %v1416_v4 }
 0x3bc   : > { %v3073_v58 = vmul.u32.u64.low %v3040_v62, %v1657_v57  ;;  %v3074_v63 = vmul.u32.u64.high %v3040_v62, %v1657_v57, %v3073_v58  ;;  %v3077_v28 = vmul.u32.u64.low %v3040_v62, %v1653_v37  ;;  %v3078_v31 = vmul.u32.u64.high %v3040_v62, %v1653_v37, %v3077_v28 }
 0x3bd   : > { %v1424_v29 = vor.u32 %v1423_v33, %v1422_v54  ;;  %v1426_v27 = vshrl.u32 %v2289_v7, %v1417_v51  ;;  %v1418_v38 = vshrl.u32 %v2286_v0, %v1417_v51  ;;  %v1428_v44 = vshll.u32 %v2289_v7, %v1416_v4 }
 0x3be   : > { %v1429_v12 = vshrl.u32 %v2290_v9, %v1417_v51  ;;  %v1432_v35 = vshrl.u32 %v2291_v16, %v1417_v51  ;;  %v1665_v6 = vmul.u32 %v3040_v62, %v1649_v52  ;;  %v1431_v11 = vshll.u32 %v2290_v9, %v1416_v4 }
 0x3bf   : > { %v1427_v39 = vor.u32 %v1426_v27, %v1425_v40  ;;  %vm1434_vm8 = vcmp.lt.s32.totalorder %v3049_v22, 1  ;;  %vm1667_vm9 = vc.u32 %v3074_v63, %v3077_v28  ;;  %v1668_v1 = vadd.s32 1, %v3078_v31 }
 0x3c0   : > { %v1430_v41 = vor.u32 %v1429_v12, %v1428_v44  ;;  %vm1435_vm10 = vcmp.lt.s32.totalorder %v3049_v22, 2  ;;  %v1433_v18 = vor.u32 %v1432_v35, %v1431_v11  ;;  %vm1436_vm11 = vcmp.lt.s32.totalorder %v3049_v22, 3 }
 0x3c1   : > { %vm1437_vm12 = vcmp.lt.s32.totalorder %v3049_v22, 4  ;;  %v1442_v20 = vsel %vm1434_vm8, %v1421_v56, %v1424_v29  ;;  %v1669_v62 = vsel %vm1667_vm9, %v1668_v1, %v3078_v31  ;;  %v1446_v17 = vsel %vm1434_vm8, %v1424_v29, %v1427_v39 }
 0x3c2   : > { %v1439_v53 = vsel %vm1437_vm12, %v1427_v39, 2102212464  ;;  %v1443_v4 = vsel %vm1437_vm12, %v1430_v41, 920167782  ;;  %v1670_v3 = vadd.s32 %v1669_v62, %v1665_v6  ;;  %v1438_v23 = vsel %vm1434_vm8, %v1418_v38, %v1421_v56 }
 0x3c3   : > { %v1444_v14 = vsel %vm1436_vm11, %v1427_v39, %v1443_v4  ;;  %v1447_v26 = vsel %vm1437_vm12, %v1433_v18, 1326507024  ;;  %v1440_v13 = vsel %vm1436_vm11, %v1424_v29, %v1439_v53  ;;  %v1726_v30 = vsel %vm1725_vm7, %v3044_v24, 0 }
 0x3c4   : > { %v1445_v8 = vsel %vm1435_vm10, %v1442_v20, %v1444_v14  ;;  %v1448_v51 = vsel %vm1436_vm11, %v1430_v41, %v1447_v26  ;;  %v1671_v34 = vadd.s32 536870912, %v1670_v3  ;;  %v1441_v45 = vsel %vm1435_vm10, %v1438_v23, %v1440_v13 }
 0x3c5   : > { %v1449_v10 = vsel %vm1435_vm10, %v1446_v17, %v1448_v51  ;;  %v3105_v55 = vmul.u32.u64.low %v3042_v50, %v1445_v8  ;;  %v3106_v15 = vmul.u32.u64.high %v3042_v50, %v1445_v8, %v3105_v55  ;;  %v1714_v59 = vand.u32 2147483647, %v3031_v46 }
 0x3c6   : > { %v3110_v36 = vmul.u32.u64.low %v3042_v50, %v1449_v10  ;;  %v3111_v60 = vmul.u32.u64.high %v3042_v50, %v1449_v10, %v3110_v36  ;;  %v1728_v21 = vand.u32 31, %v1726_v30  ;;  %v1509_v24 = vand.u32 2139095040, %v3046_v32 }
 0x3c7   : > { %v1460_v47 = vadd.s32 1, %v3106_v15  ;;  %v3118_v42 = vshrl.u32 %v1671_v34, 30  ;;  %v1457_v54 = vmul.u32 %v3042_v50, %v1441_v45  ;;  %v1721_v22 = vand.u32 8388607, %v1714_v59 }
 0x3c8   : > { %v1729_v19 = vsub.s32 32, %v1728_v21  ;;  %vm1459_vm13 = vc.u32 %v3111_v60, %v3105_v55  ;;  %v1510_v37 = vshrl.u32 %v1509_v24, 23  ;;  %v1731_v33 = vshll.u32 %v2286_v0, %v1728_v21 }
 0x3c9   : > { %v1461_v52 = vsel %vm1459_vm13, %v1460_v47, %v3106_v15  ;;  %v1727_v56 = vshrl.u32 %v1726_v30, 5  ;;  %v1734_v29 = vshll.u32 %v2287_v2, %v1728_v21  ;;  %v1737_v50 = vshll.u32 %v2288_v5, %v1728_v21 }
 0x3ca   : > { %v1462_v57 = vadd.s32 %v1461_v52, %v1457_v54  ;;  %v1732_v58 = vshrl.u32 %v2287_v2, %v1729_v19  ;;  %v1735_v31 = vshrl.u32 %v2288_v5, %v1729_v19  ;;  %v1738_v40 = vshrl.u32 %v2289_v7, %v1729_v19 }
 0x3cb   : > { %v1673_v27 = vshll.u32 %v3118_v42, 30  ;;  %v1740_v6 = vshll.u32 %v2289_v7, %v1728_v21  ;;  %v1741_v39 = vshrl.u32 %v2290_v9, %v1729_v19  ;;  %v1743_v1 = vshll.u32 %v2290_v9, %v1728_v21 }
 0x3cc   : > { %v1463_v38 = vadd.s32 536870912, %v1462_v57  ;;  %v1733_v44 = vor.u32 %v1732_v58, %v1731_v33  ;;  %v1736_v12 = vor.u32 %v1735_v31, %v1734_v29  ;;  %v1739_v35 = vor.u32 %v1738_v40, %v1737_v50 }
 0x3cd   : > { %v1744_v41 = vshrl.u32 %v2291_v16, %v1729_v19  ;;  %v2006_v18 = vadd.s32 4294967169, %v1510_v37  ;;  %v1722_v20 = vor.u32 8388608, %v1721_v22  ;;  %v1742_v62 = vor.u32 %v1741_v39, %v1740_v6 }
 0x3ce   : > { %v3135_v11 = vshrl.u32 %v1463_v38, 30  ;;  %vm1746_vm15 = vcmp.lt.s32.totalorder %v1727_v56, 1  ;;  %vm1748_vm0 = vcmp.lt.s32.totalorder %v1727_v56, 3  ;;  %vm1749_vm1 = vcmp.lt.s32.totalorder %v1727_v56, 4 }
 0x3cf   : > { %v1745_v4 = vor.u32 %v1744_v41, %v1743_v1  ;;  %v3140_v17 = vsub.s32 %v1670_v3, %v1673_v27  ;;  %v1754_v23 = vsel %vm1746_vm15, %v1733_v44, %v1736_v12  ;;  %v1755_v14 = vsel %vm1749_vm1, %v1742_v62, 920167782 }
 0x3d0   : > { %v1465_v53 = vshll.u32 %v3135_v11, 30  ;;  %v1758_v26 = vsel %vm1746_vm15, %v1736_v12, %v1739_v35  ;;  %v1756_v13 = vsel %vm1748_vm0, %v1739_v35, %v1755_v14  ;;  %v1516_v51 = vadd.s32 1, %v2006_v18 }
 0x3d1   : > { %v1759_v8 = vsel %vm1749_vm1, %v1745_v4, 1326507024  ;;  %v1730_v30 = vshrl.u32 %v2286_v0, %v1729_v19  ;;  %vm1747_vm2 = vcmp.lt.s32.totalorder %v1727_v56, 2  ;;  %v1751_v10 = vsel %vm1749_vm1, %v1739_v35, 2102212464 }
 0x3d2   : > { %v1760_v15 = vsel %vm1748_vm0, %v1742_v62, %v1759_v8  ;;  %v3147_v34 = vsub.s32 %v1462_v57, %v1465_v53  ;;  %v1757_v3 = vsel %vm1747_vm2, %v1754_v23, %v1756_v13  ;;  %v1762_v45 = vshll.u32 %v1722_v20, 8 }
 0x3d3   : > { %v1761_v36 = vsel %vm1747_vm2, %v1758_v26, %v1760_v15  ;;  %v1676_v21 = vsub.s32 0, %v3140_v17  ;;  %v1750_v24 = vsel %vm1746_vm15, %v1730_v30, %v1733_v44  ;;  %v1752_v47 = vsel %vm1748_vm0, %v1736_v12, %v1751_v10 }
 0x3d4   : > { %v3154_v54 = vmul.u32.u64.low %v1762_v45, %v1761_v36  ;;  %v3155_v52 = vmul.u32.u64.high %v1762_v45, %v1761_v36, %v3154_v54  ;;  %vm1517_vm3 = vcmp.gt.s32.totalorder %v1516_v51, 0  ;;  %v1468_v37 = vsub.s32 0, %v3147_v34 }
 0x3d5   : > { %v3157_v19 = vmul.u32.u64.low %v1762_v45, %v1757_v3  ;;  %v3158_v22 = vmul.u32.u64.high %v1762_v45, %v1757_v3, %v3157_v19  ;;  %v1518_v57 = vsel %vm1517_vm3, %v1516_v51, 0  ;;  %v1753_v33 = vsel %vm1747_vm2, %v1750_v24, %v1752_v47 }
 0x3d6   : > { %v1520_v58 = vand.u32 31, %v1518_v57  ;;  %v2011_v31 = vmin.u32 %v1676_v21, %v3140_v17  ;;  %v2003_v50 = vmin.u32 %v1468_v37, %v3147_v34  ;;  %v1769_v40 = vmul.u32 %v1762_v45, %v1753_v33 }
 0x3d7   : > { %vm1771_vm4 = vc.u32 %v3155_v52, %v3157_v19  ;;  %v1772_v29 = vadd.s32 1, %v3158_v22  ;;  %v1506_v38 = vand.u32 2147483647, %v3046_v32  ;;  %v1519_v51 = vshrl.u32 %v1518_v57, 5 }
 0x3d8   : > { %v1521_v44 = vsub.s32 32, %v1520_v58  ;;  %v1678_v12 = vclz %v2011_v31  ;;  %v1470_v56 = vclz %v2003_v50  ;;  %v1523_v4 = vshll.u32 %v2286_v0, %v1520_v58 }
 0x3d9   : > { %v1773_v27 = vsel %vm1771_vm4, %v1772_v29, %v3158_v22  ;;  %v1513_v39 = vand.u32 8388607, %v1506_v38  ;;  %v1526_v23 = vshll.u32 %v2287_v2, %v1520_v58  ;;  %v1532_v14 = vshll.u32 %v2289_v7, %v1520_v58 }
 0x3da   : > { %v1774_v35 = vadd.s32 %v1773_v27, %v1769_v40  ;;  %v1524_v1 = vshrl.u32 %v2287_v2, %v1521_v44  ;;  %v1527_v41 = vshrl.u32 %v2288_v5, %v1521_v44  ;;  %v2012_v18 = vadd.s32 4294967294, %v1678_v12 }
 0x3db   : > { %v1530_v62 = vshrl.u32 %v2289_v7, %v1521_v44  ;;  %v1533_v53 = vshrl.u32 %v2290_v9, %v1521_v44  ;;  %v1536_v26 = vshrl.u32 %v2291_v16, %v1521_v44  ;;  %v2004_v13 = vadd.s32 4294967294, %v1470_v56 }
 0x3dc   : > { %v1775_v6 = vadd.s32 536870912, %v1774_v35  ;;  %v1529_v30 = vshll.u32 %v2288_v5, %v1520_v58  ;;  %v1525_v10 = vor.u32 %v1524_v1, %v1523_v4  ;;  %v1528_v15 = vor.u32 %v1527_v41, %v1526_v23 }
 0x3dd   : > { %v1534_v3 = vor.u32 %v1533_v53, %v1532_v14  ;;  %v1535_v36 = vshll.u32 %v2290_v9, %v1520_v58  ;;  %vm2013_vm5 = vcmp.lt.s32.totalorder %v2012_v18, 0  ;;  %v1514_v2 = vor.u32 8388608, %v1513_v39 }
 0x3de   : > { %v3174_v20 = vshrl.u32 %v1775_v6, 30  ;;  %v1531_v21 = vor.u32 %v1530_v62, %v1529_v30  ;;  %vm2005_vm6 = vcmp.lt.s32.totalorder %v2004_v13, 0  ;;  %vm1538_vm7 = vcmp.lt.s32.totalorder %v1519_v51, 1 }
 0x3df   : > { %v1537_v24 = vor.u32 %v1536_v26, %v1535_v36  ;;  %vm1541_vm8 = vcmp.lt.s32.totalorder %v1519_v51, 4  ;;  %v1522_v16 = vshrl.u32 %v2286_v0, %v1521_v44  ;;  %vm1540_vm9 = vcmp.lt.s32.totalorder %v1519_v51, 3 }
 0x3e0   : > { %v1777_v8 = vshll.u32 %v3174_v20, 30  ;;  %v1546_v5 = vsel %vm1538_vm7, %v1525_v10, %v1528_v15  ;;  %v1547_v47 = vsel %vm1541_vm8, %v1534_v3, 920167782  ;;  %vm1539_vm10 = vcmp.lt.s32.totalorder %v1519_v51, 2 }
 0x3e1   : > { %v1543_v9 = vsel %vm1541_vm8, %v1531_v21, 2102212464  ;;  %v1548_v22 = vsel %vm1540_vm9, %v1531_v21, %v1547_v47  ;;  %v1550_v57 = vsel %vm1538_vm7, %v1528_v15, %v1531_v21  ;;  %v1551_v33 = vsel %vm1541_vm8, %v1537_v24, 1326507024 }
 0x3e2   : > { %v3185_v45 = vsub.s32 %v1774_v35, %v1777_v8  ;;  %v1549_v37 = vsel %vm1539_vm10, %v1546_v5, %v1548_v22  ;;  %v1554_v58 = vshll.u32 %v1514_v2, 8  ;;  %v1473_v31 = vsel %vm2005_vm6, 0, %v2004_v13 }
 0x3e3   : > { %v1542_v0 = vsel %vm1538_vm7, %v1522_v16, %v1525_v10  ;;  %v1552_v50 = vsel %vm1540_vm9, %v1534_v3, %v1551_v33  ;;  %v1544_v40 = vsel %vm1540_vm9, %v1528_v15, %v1543_v9  ;;  %v1681_v39 = vsel %vm2013_vm5, 0, %v2012_v18 }
 0x3e4   : > { %v1780_v7 = vsub.s32 0, %v3185_v45  ;;  %v1553_v27 = vsel %vm1539_vm10, %v1550_v57, %v1552_v50  ;;  %v3196_v44 = vmul.u32.u64.low %v1554_v58, %v1549_v37  ;;  %v3197_v12 = vmul.u32.u64.high %v1554_v58, %v1549_v37, %v3196_v44 }
 0x3e5   : > { %v3200_v56 = vmul.u32.u64.low %v1554_v58, %v1553_v27  ;;  %v3201_v6 = vmul.u32.u64.high %v1554_v58, %v1553_v27, %v3200_v56  ;;  %v1478_v1 = vsub.s32 4294967266, %v1473_v31  ;;  %v1545_v41 = vsel %vm1539_vm10, %v1542_v0, %v1544_v40 }
 0x3e6   : > { %v2015_v54 = vmin.u32 %v1780_v7, %v3185_v45  ;;  %v1564_v53 = vadd.s32 1, %v3197_v12  ;;  %v1686_v4 = vsub.s32 4294967266, %v1681_v39  ;;  %v1561_v26 = vmul.u32 %v1554_v58, %v1545_v41 }
 0x3e7   : > { %v1479_v14 = vadd.s32 127, %v1478_v1  ;;  %vm1563_vm12 = vc.u32 %v3201_v6, %v3196_v44  ;;  %v1474_v8 = vsub.s32 32, %v1473_v31  ;;  %v1458_v51 = vadd.s32 %v3105_v55, %v3111_v60 }
 0x3e8   : > { %v1782_v29 = vclz %v2015_v54  ;;  %v1565_v13 = vsel %vm1563_vm12, %v1564_v53, %v3197_v12  ;;  %v1687_v18 = vadd.s32 127, %v1686_v4  ;;  %v1682_v21 = vsub.s32 32, %v1681_v39 }
 0x3e9   : > { %v1566_v10 = vadd.s32 %v1565_v13, %v1561_v26  ;;  %v1480_v15 = vshll.u32 %v1479_v14, 23  ;;  %vm2293_vm13 = vmmov 0   ;;  %v1476_v2 = vshrl.u32 %v1458_v51, %v1474_v8 }
 0x3ea   : > { %v2016_v35 = vadd.s32 4294967294, %v1782_v29  ;;  %2063 = vmatprep.mubr.msk.bf16.mxu1 %vm2293_vm13, %v2292_v61  ;;  %v1770_v24 = vadd.s32 %v3157_v19, %v3155_v52  ;;  %v1666_v5 = vadd.s32 %v3077_v28, %v3074_v63  ;;  %v1688_v47 = vshll.u32 %v1687_v18, 23 }
 0x3eb   : > { %v1567_v36 = vadd.s32 536870912, %v1566_v10  ;;  %v1475_v55 = vshll.u32 %v3147_v34, %v1473_v31  ;;  %v1481_v60 = vor.u32 4788187, %v1480_v15  ;;  %v1683_v52 = vshll.u32 %v3140_v17, %v1681_v39 }
 0x3ec   : > { %vm2017_vm11 = vcmp.lt.s32.totalorder %v2016_v35, 0  ;;  %v1684_v22 = vshrl.u32 %v1666_v5, %v1682_v21  ;;  %v1689_v19 = vor.u32 4788187, %v1688_v47  ;;  %v1562_v39 = vadd.s32 %v3196_v44, %v3201_v6 }
 0x3ed   : > { %v1785_v62 = vsel %vm2017_vm11, 0, %v2016_v35  ;;  %v3214_v16 = vshrl.u32 %v1567_v36, 30  ;;  %v1477_v37 = vor.u32 %v1476_v2, %v1475_v55  ;;  %v1482_v29 = vand.u32 2147483647, %v1481_v60 }
 0x3ee   : > { %v1790_v23 = vsub.s32 4294967266, %v1785_v62  ;;  %v1786_v3 = vsub.s32 32, %v1785_v62  ;;  %v1787_v57 = vshll.u32 %v3185_v45, %v1785_v62  ;;  %v1685_v63 = vor.u32 %v1684_v22, %v1683_v52 }
 0x3ef   : > { %v1569_v9 = vshll.u32 %v3214_v16, 30  ;;  %v1484_v28 = vcvt.s32.f32 %v1477_v37  ;;  %v1690_v31 = vand.u32 2147483647, %v1689_v19  ;;  %vm1404_vm0 = vcmp.lt.s32.totalorder %v3027_v25, 0 }
 0x3f0   : > { %v1791_v30 = vadd.s32 127, %v1790_v23  ;;  %v1788_v54 = vshrl.u32 %v1770_v24, %v1786_v3  ;;  %v1692_v56 = vcvt.s32.f32 %v1685_v63  ;;  %vm1716_vm1 = vcmp.lt.s32.totalorder %v3031_v46, 0 }
 0x3f1   : > { %v1570_v58 = vsub.s32 %v1566_v10, %v1569_v9  ;;  %v1485_v27 = vmul.f32 %v1484_v28, %v1482_v29  ;;  %vm3230_vm2 = vcmp.le.f32.partialorder %v1402_v48, 0.7853982  ;;  %vm1612_vm3 = vcmp.lt.s32.totalorder %v3025_v49, 0 }
 0x3f2   : > { %v1792_v7 = vshll.u32 %v1791_v30, 23  ;;  %v1789_v0 = vor.u32 %v1788_v54, %v1787_v57  ;;  %v1693_v45 = vmul.f32 %v1692_v56, %v1690_v31  ;;  %vm3244_vm4 = vcmp.le.f32.partialorder %v1714_v59, 0.7853982 }
 0x3f3   : > { %v1572_v50 = vsub.s32 0, %v1570_v58  ;;  %v1486_v62 = vxor.u32 2147483648, %v1485_v27  ;;  %vm3250_vm5 = vcmp.le.f32.partialorder %v1610_v43, 0.7853982  ;;  %v1488_v21 = vsub.s32 4, %v3135_v11 }
 0x3f4   : > { %v1793_v33 = vor.u32 4788187, %v1792_v7  ;;  %v1796_v12 = vcvt.s32.f32 %v1789_v0  ;;  %v1694_v14 = vxor.u32 2147483648, %v1693_v45  ;;  %v1696_v24 = vsub.s32 4, %v3118_v42 }
 0x3f5   : > { %v2007_v34 = vmin.u32 %v1572_v50, %v1570_v58  ;;  %v1487_v26 = vsel %vm1404_vm0, %v1486_v62, %v1485_v27  ;;  %v1800_v43 = vsub.s32 4, %v3174_v20  ;;  %v1592_v55 = vsub.s32 4, %v3214_v16 }
 0x3f6   : > { %v1794_v40 = vand.u32 2147483647, %v1793_v33  ;;  %v1490_v51 = vsel %vm3230_vm2, %v3027_v25, %v1487_v26  ;;  %v1695_v15 = vsel %vm1612_vm3, %v1694_v14, %v1693_v45  ;;  %v1489_v60 = vsel %vm1404_vm0, %v1488_v21, %v3135_v11 }
 0x3f7   : > { %v1574_v35 = vclz %v2007_v34  ;;  %2204 = vcosq.f32 %v1490_v51  ;;  %v1698_v5 = vsel %vm3250_vm5, %v3025_v49, %v1695_v15  ;;  %v1697_v54 = vsel %vm1612_vm3, %v1696_v24, %v3118_v42 }
 0x3f8   : > { %v1797_v1 = vmul.f32 %v1796_v12, %v1794_v40  ;;  %2206 = vsinq.f32 %v1490_v51  ;;  %v1801_v22 = vsel %vm1716_vm1, %v1800_v43, %v3174_v20  ;;  %vm1508_vm6 = vcmp.lt.s32.totalorder %v3046_v32, 0 }
 0x3f9   : > { %v2008_v41 = vadd.s32 4294967294, %v1574_v35  ;;  %v1491_v37 = vsel %vm3230_vm2, 0, %v1489_v60  ;;  %vm1507_vm7 = vcmp.le.f32.partialorder %v1506_v38, 0.7853982  ;;  %v1593_v57 = vsel %vm1508_vm6, %v1592_v55, %v3214_v16 }
 0x3fa   : > { %v1798_v17 = vxor.u32 2147483648, %v1797_v1  ;;  %v1699_v42 = vsel %vm3250_vm5, 0, %v1697_v54  ;;  %v1495_v20 = vadd.s32 3, %v1491_v37  ;;  %v1595_v52 = vsel %vm1507_vm7, 0, %v1593_v57 }
 0x3fb   : > { %vm2009_vm15 = vcmp.lt.s32.totalorder %v2008_v41, 0  ;;  %v1703_v29 = vadd.s32 3, %v1699_v42  ;;  %v1599_v63 = vadd.s32 3, %v1595_v52  ;;  %vm1598_vm5 = vweird.f32 %v3046_v32 }
 0x3fc   : > { %v1577_v53 = vsel %vm2009_vm15, 0, %v2008_v41  ;;  %v1799_v44 = vsel %vm1716_vm1, %v1798_v17, %v1797_v1  ;;  %v1496_v16 = vand.u32 3, %v1495_v20 }
 0x3fd   : > { %v1578_v4 = vsub.s32 32, %v1577_v53  ;;  %v1582_v23 = vsub.s32 4294967266, %v1577_v53  ;;  %v1579_v13 = vshll.u32 %v1570_v58, %v1577_v53  ;;  %v1802_v2 = vsel %vm3244_vm4, %v3031_v46, %v1799_v44 }
 0x3fe   : > { %2208 = vcosq.f32 %v1802_v2  ;;  %v1803_v58 = vsel %vm3244_vm4, 0, %v1801_v22  ;;  %v1704_v27 = vand.u32 3, %v1703_v29  ;;  %v1600_v56 = vand.u32 3, %v1599_v63 }
 0x3ff   : > { %v1580_v8 = vshrl.u32 %v1562_v39, %v1578_v4  ;;  %v1583_v30 = vadd.s32 127, %v1582_v23  ;;  %2210 = vsinq.f32 %v1802_v2  ;;  %v1807_v50 = vadd.s32 3, %v1803_v58 }
 0x400   : > { %2212 = vsinq.f32 %v1698_v5  ;;  %vm1497_vm8 = vcmp.lt.s32.totalorder %v1496_v16, 2  ;;  %vm1498_vm9 = vcmp.eq.s32.totalorder %v1496_v16, 0  ;;  %vm1501_vm10 = vcmp.eq.s32.totalorder %v1496_v16, 2 }
 0x401   : > { %v1581_v6 = vor.u32 %v1580_v8, %v1579_v13  ;;  %v1584_v18 = vshll.u32 %v1583_v30, 23  ;;  %2214 = vcosq.f32 %v1698_v5  ;;  %v2205_v19 = vpop.eup %2204  ;;  %v1808_v35 = vand.u32 3, %v1807_v50 }
 0x402   : > { %v2207_v0 = vpop.eup %2206  ;;  %v1502_v31 = vxor.u32 2147483648, %v2205_v19  ;;  %vm1706_vm11 = vcmp.eq.s32.totalorder %v1704_v27, 0  ;;  %vm1709_vm12 = vcmp.eq.s32.totalorder %v1704_v27, 2  ;;  %vm1605_vm0 = vcmp.eq.s32.totalorder %v1600_v56, 2 }
 0x403   : > { %v1585_v3 = vor.u32 4788187, %v1584_v18  ;;  %v1588_v7 = vcvt.s32.f32 %v1581_v6  ;;  %v1499_v34 = vxor.u32 2147483648, %v2207_v0  ;;  %vm1810_vm13 = vcmp.eq.s32.totalorder %v1808_v35, 0 }
 0x404   : > { %v1503_v17 = vsel %vm1501_vm10, %v1502_v31, %v2207_v0  ;;  %vm1813_vm15 = vcmp.eq.s32.totalorder %v1808_v35, 2  ;;  %vm1602_vm1 = vcmp.eq.s32.totalorder %v1600_v56, 0  ;;  %vm1601_vm2 = vcmp.lt.s32.totalorder %v1600_v56, 2 }
 0x405   : > { %v1586_v59 = vand.u32 2147483647, %v1585_v3  ;;  %v1500_v53 = vsel %vm1498_vm9, %v2205_v19, %v1499_v34  ;;  %vm1809_vm3 = vcmp.lt.s32.totalorder %v1808_v35, 2  ;;  %vm1494_vm4 = vweird.f32 %v3027_v25 }
 0x406   : > { %v1504_v8 = vsel %vm1497_vm8, %v1500_v53, %v1503_v17  ;;  %vm1702_vm8 = vweird.f32 %v3025_v49 }
 0x407   : > { %v1589_v47 = vmul.f32 %v1588_v7, %v1586_v59  ;;  %v1505_v15 = vsel %vm1494_vm4, nan, %v1504_v8 }
 0x408   : > { %v2209_v38 = vpop.eup %2208 }
 0x409   : > { %v1590_v9 = vxor.u32 2147483648, %v1589_v47  ;;  %v2211_v28 = vpop.eup %2210  ;;  %v1814_v41 = vxor.u32 2147483648, %v2209_v38 }
 0x40a   : > { %v2213_v40 = vpop.eup %2212  ;;  %v1811_v1 = vxor.u32 2147483648, %v2211_v28 }
 0x40b   : > { %v1591_v11 = vsel %vm1508_vm6, %v1590_v9, %v1589_v47  ;;  %v2215_v12 = vpop.eup %2214  ;;  %v1707_v45 = vxor.u32 2147483648, %v2213_v40  ;;  %v1815_v13 = vsel %vm1813_vm15, %v1814_v41, %v2211_v28  ;;  %vm1705_vm6 = vcmp.lt.s32.totalorder %v1704_v27, 2 }
 0x40c   : > { %v1594_v33 = vsel %vm1507_vm7, %v3046_v32, %v1591_v11  ;;  %v1710_v39 = vxor.u32 2147483648, %v2215_v12  ;;  %v1812_v26 = vsel %vm1810_vm13, %v2209_v38, %v1811_v1  ;;  %vm1806_vm7 = vweird.f32 %v3031_v46  ;;  %v1818_v32 = vld [vmem:[%s3346_s5] sm:$0xf]  ;;  %v1825_v46 = vpop.permute.xlu0 %1824 }
 0x40d   : > { %2216 = vcosq.f32 %v1594_v33  ;;  %v1708_v10 = vsel %vm1706_vm11, %v2215_v12, %v1707_v45  ;;  %v1816_v51 = vsel %vm1809_vm3, %v1812_v26, %v1815_v13 }
 0x40e   : > { %2218 = vsinq.f32 %v1594_v33  ;;  %v1711_v6 = vsel %vm1709_vm12, %v1710_v39, %v2213_v40  ;;  %v1817_v21 = vsel %vm1806_vm7, nan, %v1816_v51 }
 0x40f   : > { %v1712_v36 = vsel %vm1705_vm6, %v1708_v10, %v1711_v6 }
 0x410   : > { %v1713_v25 = vsel %vm1702_vm8, nan, %v1712_v36 }
 0x411   : > { %v1820_v2 = vpack.c.bf16 %v1817_v21, %v1713_v25 }
 0x417   : > { %v2217_v62 = vpop.eup %2216 }
 0x418   : > { %v2219_v4 = vpop.eup %2218  ;;  %v1606_v23 = vxor.u32 2147483648, %v2217_v62 }
 0x419   : > { %v1603_v14 = vxor.u32 2147483648, %v2219_v4 }
 0x41a   : > { %v1607_v30 = vsel %vm1605_vm0, %v1606_v23, %v2219_v4 }
 0x41b   : > { %v1604_v44 = vsel %vm1602_vm1, %v2217_v62, %v1603_v14 }
 0x41c   : > { %v1608_v18 = vsel %vm1601_vm2, %v1604_v44, %v1607_v30 }
 0x41d   : > { %v1609_v48 = vsel %vm1598_vm5, nan, %v1608_v18 }
 0x41e   : > { %v1819_v3 = vpack.c.bf16 %v1609_v48, %v1505_v15 }
 0x420   : > { %2060 = vmatpush3.bf16.msra.mxu1 %v1819_v3 }
 0x421   : > { %2061 = vmatprep.subr.bf16.mxu1 %v2292_v61 }
 0x424   : > { %2062 = vmatpush3.bf16.msra.mxu1 %v1820_v2 }
 0x427   : > { %2064 = vmatmul.mubr.msk.bf16.vlgmr.msra.gmra.mrb[4].mxu1 %vm833_vm14, %v1818_v32 }
 0x4fa   : > { %v1864_v24 = vpop.f32.mrb[4].mxu1 }
 0x4fb   : > { %v1865_v49 = vadd.f32 %v1864_v24, %v1825_v46  ;;  %v2065_v59 = vpop.f32.mrb[5].mxu1 }
 0x4fc   : > { %v1867_v61 = vpop.f32.mrb[6].mxu1 }
 0x4fd   : > { %1870 = vst [vmem:[%s269_s19] sm:$0xff] %v1865_v49  ;;  %v2066_v7 = vpop.f32.mrb[7].mxu1 }
 0x4fe   : > { %2233 = shalt.err (!%p2230_p3)
}
 0x4ff   : > { %s2234_s14 = scalar_lea.hbm %s3299_s23, 128  ;;  %s2238_s17 = scalar_lea.hbm %s3348_s7, 384 }
 0x500   : > { %p2235_p4 = scmp.ne.s32.totalorder %s3299_s23, %s2234_s14  ;;  %p2239_p9 = scmp.lt.u32.totalorder %s3299_s23, %s3348_s7 }
 0x501   : > { %p2240_p10 = scmp.lt.u32.totalorder %s2238_s17, %s2234_s14  ;;  %p2242_p12 = scmp.lt.u32.totalorder %s2234_s14, %s3299_s23 }
 0x502   : > { %p2236_p7 = pnand %p2235_p4, %p2373_p5 }
 0x503   : > { %p2241_p11 = por %p2240_p10, %p2239_p9 }
 0x504   : > { %p2237_p8 = pneg %p2236_p7 }
 0x505   : > { %p2243_p13 = por %p2242_p12, %p2241_p11 }
 0x507   : > { %p2244_p0 = pnand %p2243_p13, %p2237_p8 }
 0x509   : > { %2247 = shalt.err (!%p2244_p0)
}
 0x50a   : > { %2115 = dma.vmem_to_hbm [thread:$0]  (%p2373_p5), %s3301_s20, 128, %s3299_s23, %s1872_s28  }
 0x50b PF: > { %p2121_p1 = scmp.ge.s32.totalorder %s2282_s27, 2  ;;  %s1897_s21 = sand.u32 1, %s2270_s24  }
 0x50c   : > { %s1898_s22 = scalar_lea.sflag [#allocation3], %s1897_s21 }
 0x50d   : > { %p2118_p2 = pnand %p2121_p1, %p2377_p6 }
 0x50f   : > { %2265 = dma.done.wait (!%p2118_p2), %s1898_s22, 128  }
 0x510   : > { %2267 = vsyncadd (!%p2118_p2), %s1898_s22, 4294967168  ;;  %p17_p3 = scmp.ge.s32.totalorder %s2360_s30, 5   ;;  %s3373_s24 = smov %s2274_s25 }
 0x511   : > { %s3374_s25 = smov %s2278_s26  ;;  %s3375_s26 = smov %s2371_s10 }
 0x512   : > { %s3376_s27 = smov %s2360_s30  ;;  %19 = sbr.rel (!%p17_p3) target bundleno = 3 (0x3), region = 85 }
 0x519   :  { %1903 = vsyncpa [#allocation3], 1 }
 0x51a   :  { %1905 = vsyncpa [#allocation3 + $0x1], 1 }

// kernel: tpu_custom_call.1
= control target key start
LH: loop header
LB: loop body
LE: loop exit
PB: predicated region body
PF: predicated region fallthrough
CT: control target
= control target key end

     0   :  { %12 = vsyncpa [#allocation3], 0  ;;  %s3341_s0 = inlined_call_operand.vmem [shape: bf16[3,384], index: 0, kind: input, shape index: {}]   ;;  %s3342_s1 = inlined_call_operand.vmem [shape: bf16[32,3], index: 1, kind: input, shape index: {}]   ;;  %s3343_s2 = inlined_call_operand.vmem [shape: f32[32,1], index: 2, kind: input, shape index: {}]   ;;  %s3344_s3 = inlined_call_operand.vmem [shape: bf16[2,32,32], index: 3, kind: input, shape index: {}]   ;;  %s3345_s4 = inlined_call_operand.vmem [shape: f32[2,32,1], index: 4, kind: input, shape index: {}]   ;;  %s3346_s5 = inlined_call_operand.vmem [shape: bf16[8,32], index: 5, kind: input, shape index: {}]   ;;  %s3347_s6 = inlined_call_operand.vmem [shape: f32[8,1], index: 6, kind: input, shape index: {}]   ;;  %s3348_s7 = inlined_call_operand.hbm [shape: f32[8,384], index: 7, kind: output, shape index: {}]  }
   0x1   :  { %14 = vsyncpa [#allocation3 + $0x1], 0  ;;  %s2335_s24 = smov 0   ;;  %s2337_s25 = smov 0  }
   0x2   :  { %s2339_s26 = smov 0   ;;  %s2341_s27 = smov 0  }
   0x3 LB: > { %s2356_s28 = sadd.s32 4294967295, %s2282_s27   ;;  %s1944_s29 = sadd.s32 4294967294, %s2282_s27   ;;  %s2282_s27 = sphi %s2341_s27, %s3376_s27   ;;  %s2278_s26 = sphi %s2339_s26, %s3375_s26   ;;  %s2274_s25 = sphi %s2337_s25, %s3374_s25   ;;  %s2270_s24 = sphi %s2335_s24, %s3373_s24  }
   0x4   : > { %s2360_s30 = sadd.s32 1, %s2282_s27   ;;  %s179_s8 = sadd.s32 1, %s2278_s26 }
   0x5   : > { %s176_s9 = ssub.s32 %s2282_s27, %s2360_s30  ;;  %p189_p0 = scmp.ne.s32.totalorder %s2278_s26, %s2274_s25 }
   0x6   : > { %p177_p1 = scmp.eq.s32.totalorder %s176_s9, 0  ;;  %p190_p2 = scmp.eq.s32.totalorder %s2356_s28, 2 }
   0x7   : > { %p195_p3 = scmp.ne.s32.totalorder %s2274_s25, %s2270_s24  ;;  %p196_p4 = scmp.eq.s32.totalorder %s1944_s29, 2 }
   0x8   : > { %s2371_s10 = scalar_select %p177_p1, %s2278_s26, %s179_s8  }
   0x9   : > { %p2373_p5 = por %p190_p2, %p189_p0  ;;  %p2377_p6 = por %p196_p4, %p195_p3 }
   0xa   : > { %p1947_p7 = scmp.ge.s32.totalorder %s2282_s27, 1  ;;  %p239_p8 = scmp.lt.s32.totalorder %s2282_s27, 4 }
   0xc   : > { %p240_p9 = pnand %p1947_p7, %p239_p8 }
   0xd   : > { %p270_p10 = scmp.lt.s32.totalorder (!%p240_p9), %s2356_s28, 2  ;;  %vm321_vm0 = vcmask (!%p240_p9), 1040384   ;;  %vm322_vm1 = vcmask (!%p240_p9), 1041408   ;;  %v2284_v0 = vmov (!%p240_p9), 65535   ;;  %v2166_v2 = vld [vmem:[%s3342_s1] sm:$0xff] (!%p240_p9)   ;;  %vm314_vm2 = vcmask (!%p240_p9), 23552  }
   0xe   : > { %243 = sbr.rel (%p240_p9) target bundleno = 1291 (0x50b), region = 48  ;;  %v323_v1 = vsel (!%p240_p9), %vm321_vm0, 4294967295, %v2284_v0  ;;  %2039 = vmatprep.mubr.msk.bf16.mxu0 (!%p240_p9), %vm314_vm2, %v2166_v2  ;;  %v280_v3 = vld [vmem:[%s3343_s2] sm:$0xff] (!%p240_p9)  ;;  %v282_v4 = vld [vmem:[%s3343_s2 + $0x10] sm:$0xff] (!%p240_p9)  ;;  %v2285_v6 = vmov (!%p240_p9), 0   ;;  %v281_v8 = vld [vmem:[%s3343_s2 + $0x8] sm:$0xff] (!%p240_p9) }
   0xf   : > { %v324_v5 = vsel (!%p240_p9), %vm322_vm1, %v323_v1, 0  ;;  %2164 = vset.pattern.permute.xlu0 (!%p240_p9), %v2285_v6  ;;  %2165 = vset.pattern.permute.xlu1 (!%p240_p9), %v2285_v6  ;;  %v2167_v10 = vld [vmem:[%s3342_s1 + $0x8] sm:$0xff] (!%p240_p9)   ;;  %v283_v11 = vld [vmem:[%s3343_s2 + $0x18] sm:$0xff] (!%p240_p9)  ;;  %v799_v12 = vld [vmem:[%s3345_s4] sm:$0xff] (!%p240_p9)  ;;  %v2286_v0 = vmov (!%p240_p9), 683565275  }
  0x10   : > { %286 = vperm.xlu0 (!%p240_p9), %2164, %v280_v3   ;;  %296 = vperm.xlu1 (!%p240_p9), %2165, %v282_v4   ;;  %v800_v13 = vld [vmem:[%s3345_s4 + $0x8] sm:$0xff] (!%p240_p9)  ;;  %v801_v14 = vld [vmem:[%s3345_s4 + $0x10] sm:$0xff] (!%p240_p9)  ;;  %v802_v15 = vld [vmem:[%s3345_s4 + $0x18] sm:$0xff] (!%p240_p9)  ;;  %v2287_v2 = vmov (!%p240_p9), 2475754826   ;;  %s267_s16 = sand.u32 (!%p240_p9), 1, %s2274_s25  }
  0x11   : > { %v1994_v16 = vld [vmem:[%s3345_s4 + $0x20] sm:$0xff] (!%p240_p9)  ;;  %v1995_v17 = vld [vmem:[%s3345_s4 + $0x28] sm:$0xff] (!%p240_p9)  ;;  %v1996_v18 = vld [vmem:[%s3345_s4 + $0x30] sm:$0xff] (!%p240_p9)  ;;  %s1948_s17 = sshll.u32 (!%p240_p9), %s267_s16, 3  ;;  %s2020_s18 = sshll.u32 (!%p240_p9), %s2356_s28, 7 }
  0x12   : > { %v1997_v19 = vld [vmem:[%s3345_s4 + $0x38] sm:$0xff] (!%p240_p9)  ;;  %v1821_v20 = vld [vmem:[%s3347_s6] sm:$0xff] (!%p240_p9)  ;;  %s269_s19 = scalar_lea.vmem (!%p240_p9), [#allocation2], %s1948_s17  ;;  %s2294_s8 = smov (!%p240_p9), [#allocation2]  }
  0x13   : > { %s2224_s9 = sshll.u32 (!%p240_p9), %s2294_s8, 4  ;;  %s2225_s9 = int_to_ptr.vmem [resolvable:$false] %s2224_s9 }
  0x14   : > { %291 = vperm.xlu0 (!%p240_p9), %2164, %v281_v8   ;;  %301 = vperm.xlu1 (!%p240_p9), %2165, %v283_v11   ;;  %s2226_s13 = scalar_lea.vmem (!%p240_p9), %s2225_s9, 256 }
  0x15   : > { %s271_s15 = scalar_select %p270_p10, %s2356_s28, 2 }
  0x16   : > { %s1872_s28 = scalar_lea.sflag [#allocation3], %s267_s16 }
  0x17   : > { %s1949_s20 = sshll.u32 %s271_s15, 1 }
  0x18   : > { %s273_s23 = scalar_lea.vmem %s3341_s0, %s1949_s20  ;;  %805 = vperm.xlu0 %2164, %v799_v12   ;;  %810 = vperm.xlu1 %2165, %v800_v13   ;;  %s1885_s20 = sshll.u32 %s269_s19, 4  ;;  %s3301_s20 = int_to_ptr.vmem [resolvable:$true] %s1885_s20 }
  0x19   : > { %v275_v7 = vld [vmem:[%s273_s23] sm:$0x3]  ;;  %s3299_s23 = scalar_lea.hbm %s3348_s7, %s2020_s18  ;;  %s2220_s29 = scalar_lea.vmem %s3301_s20, 128 }
  0x1a   : > { %v326_v9 = vand.u32 %v324_v5, %v275_v7  ;;  %v2288_v5 = vmov 2131351028   ;;  %v2289_v7 = vmov 2102212464   ;;  %p2221_p11 = scmp.ne.s32.totalorder %s3301_s20, %s2220_s29  ;;  %p2227_p0 = scmp.lt.s32.totalorder %s3301_s20, %s2225_s9 }
  0x1b   : > { %p2228_p1 = scmp.lt.s32.totalorder %s2226_s13, %s2220_s29 }
  0x1c   : > { %2037 = vmatprep.subr.bf16.mxu0 %v326_v9  ;;  %815 = vperm.xlu0 %2164, %v801_v14   ;;  %p2222_p12 = pnand %p2221_p11, %p2373_p5 }
  0x1d   : > { %2038 = vmatpush3.bf16.msra.mxu0 %v326_v9  ;;  %820 = vperm.xlu1 %2165, %v802_v15   ;;  %v2290_v9 = vmov 920167782   ;;  %p2229_p2 = por %p2228_p1, %p2227_p0 }
  0x1e   : > { %p2223_p13 = pneg %p2222_p12 }
  0x20   : > { %2040 = vmatmul.mubr.msk.bf16.vlgmr.msra.gmra.mrb[0].mxu0 %vm314_vm2, %v2167_v10  ;;  %1319 = vperm.xlu0 %2164, %v1994_v16   ;;  %v2291_v16 = vmov 1326507024   ;;  %p2230_p3 = pnand %p2229_p2, %p2223_p13 }
  0x21   : > { %1324 = vperm.xlu1 %2165, %v1995_v17  }
  0x24   : > { %1329 = vperm.xlu0 %2164, %v1996_v18  }
  0x25   : > { %1334 = vperm.xlu1 %2165, %v1997_v19  }
  0x28   : > { %1824 = vperm.xlu0 %2164, %v1821_v20  }
  0x8f   : > { %v297_v21 = vpop.permute.xlu1 %296  ;;  %v287_v22 = vpop.permute.xlu0 %286 }
  0x93   : > { %v302_v26 = vpop.permute.xlu1 %301  ;;  %v292_v33 = vpop.permute.xlu0 %291 }
  0xf3   : > { %v2041_v23 = vpop.f32.mrb[0].mxu0 }
  0xf4   : > { %v2435_v24 = vadd.f32 %v2041_v23, %v297_v21  ;;  %v362_v25 = vpop.f32.mrb[1].mxu0 }
  0xf5   : > { %v2437_v27 = vadd.f32 %v362_v25, %v287_v22  ;;  %v2042_v28 = vpop.f32.mrb[2].mxu0 }
  0xf6   : > { %v585_v29 = vand.u32 2147483647, %v2435_v24  ;;  %v588_v30 = vand.u32 2139095040, %v2435_v24  ;;  %v2441_v31 = vadd.f32 %v2042_v28, %v302_v26  ;;  %v365_v32 = vpop.f32.mrb[3].mxu0 }
  0xf7   : > { %v377_v34 = vand.u32 2147483647, %v2437_v27  ;;  %v380_v35 = vand.u32 2139095040, %v2437_v27  ;;  %v2447_v38 = vadd.f32 %v365_v32, %v292_v33 }
  0xf8   : > { %v589_v36 = vshrl.u32 %v588_v30, 23  ;;  %v592_v37 = vand.u32 8388607, %v585_v29  ;;  %v689_v41 = vand.u32 2147483647, %v2441_v31  ;;  %v692_v42 = vand.u32 2139095040, %v2441_v31 }
  0xf9   : > { %v381_v39 = vshrl.u32 %v380_v35, 23  ;;  %v384_v40 = vand.u32 8388607, %v377_v34  ;;  %v484_v52 = vand.u32 2139095040, %v2447_v38 }
  0xfa   : > { %v1962_v43 = vadd.s32 4294967169, %v589_v36  ;;  %v593_v44 = vor.u32 8388608, %v592_v37  ;;  %v693_v46 = vshrl.u32 %v692_v42, 23  ;;  %v2455_v51 = vand.u32 8388607, %v689_v41 }
  0xfb   : > { %v1954_v45 = vadd.s32 4294967169, %v381_v39  ;;  %v385_v48 = vor.u32 8388608, %v384_v40  ;;  %v2467_v62 = vshrl.u32 %v484_v52, 23 }
  0xfc   : > { %v595_v47 = vadd.s32 1, %v1962_v43  ;;  %v1966_v50 = vadd.s32 4294967169, %v693_v46  ;;  %v2458_v54 = vshll.u32 %v593_v44, 8  ;;  %v697_v60 = vor.u32 8388608, %v2455_v51 }
  0xfd   : > { %v387_v49 = vadd.s32 1, %v1954_v45  ;;  %v2460_v58 = vshll.u32 %v385_v48, 8 }
  0xfe   : > { %vm596_vm3 = vcmp.gt.s32.totalorder %v595_v47, 0  ;;  %v2465_v61 = vadd.s32 1, %v1966_v50 }
  0xff   : > { %v597_v53 = vsel %vm596_vm3, %v595_v47, 0  ;;  %vm388_vm4 = vcmp.gt.s32.totalorder %v387_v49, 0 }
 0x100   : > { %v598_v55 = vshrl.u32 %v597_v53, 5  ;;  %v599_v56 = vand.u32 31, %v597_v53  ;;  %v389_v57 = vsel %vm388_vm4, %v387_v49, 0  ;;  %vm700_vm9 = vcmp.gt.s32.totalorder %v2465_v61, 0 }
 0x101   : > { %v2462_v59 = vshrl.u32 %v389_v57, 5  ;;  %v391_v4 = vand.u32 31, %v389_v57 }
 0x102   : > { %v600_v63 = vsub.s32 32, %v599_v56  ;;  %v602_v1 = vshll.u32 %v2286_v0, %v599_v56  ;;  %v605_v3 = vshll.u32 %v2287_v2, %v599_v56  ;;  %v608_v6 = vshll.u32 %v2288_v5, %v599_v56 }
 0x103   : > { %v611_v8 = vshll.u32 %v2289_v7, %v599_v56  ;;  %v614_v10 = vshll.u32 %v2290_v9, %v599_v56  ;;  %vm617_vm5 = vcmp.lt.s32.totalorder %v598_v55, 1  ;;  %vm618_vm6 = vcmp.lt.s32.totalorder %v598_v55, 2 }
 0x104   : > { %v603_v11 = vshrl.u32 %v2287_v2, %v600_v63  ;;  %v606_v12 = vshrl.u32 %v2288_v5, %v600_v63  ;;  %v609_v13 = vshrl.u32 %v2289_v7, %v600_v63  ;;  %v601_v14 = vshrl.u32 %v2286_v0, %v600_v63 }
 0x105   : > { %v612_v15 = vshrl.u32 %v2290_v9, %v600_v63  ;;  %v615_v17 = vshrl.u32 %v2291_v16, %v600_v63  ;;  %vm619_vm7 = vcmp.lt.s32.totalorder %v598_v55, 3  ;;  %v392_v21 = vsub.s32 32, %v391_v4 }
 0x106   : > { %v604_v18 = vor.u32 %v603_v11, %v602_v1  ;;  %v607_v19 = vor.u32 %v606_v12, %v605_v3  ;;  %v610_v20 = vor.u32 %v609_v13, %v608_v6  ;;  %vm620_vm8 = vcmp.lt.s32.totalorder %v598_v55, 4 }
 0x107   : > { %v613_v22 = vor.u32 %v612_v15, %v611_v8  ;;  %v616_v23 = vor.u32 %v615_v17, %v614_v10  ;;  %v394_v25 = vshll.u32 %v2286_v0, %v391_v4  ;;  %v397_v37 = vshll.u32 %v2287_v2, %v391_v4 }
 0x108   : > { %v621_v26 = vsel %vm617_vm5, %v601_v14, %v604_v18  ;;  %v622_v28 = vsel %vm620_vm8, %v610_v20, 2102212464  ;;  %v625_v30 = vsel %vm617_vm5, %v604_v18, %v607_v19  ;;  %v629_v32 = vsel %vm617_vm5, %v607_v19, %v610_v20 }
 0x109   : > { %v623_v33 = vsel %vm619_vm7, %v607_v19, %v622_v28  ;;  %v626_v35 = vsel %vm620_vm8, %v613_v22, 920167782  ;;  %v630_v36 = vsel %vm620_vm8, %v616_v23, 1326507024  ;;  %v393_v42 = vshrl.u32 %v2286_v0, %v392_v21 }
 0x10a   : > { %v627_v39 = vsel %vm619_vm7, %v610_v20, %v626_v35  ;;  %v631_v40 = vsel %vm619_vm7, %v613_v22, %v630_v36  ;;  %v395_v43 = vshrl.u32 %v2287_v2, %v392_v21  ;;  %v624_v44 = vsel %vm618_vm6, %v621_v26, %v623_v33 }
 0x10b   : > { %v628_v45 = vsel %vm618_vm6, %v625_v30, %v627_v39  ;;  %v632_v46 = vsel %vm618_vm6, %v629_v32, %v631_v40  ;;  %v398_v47 = vshrl.u32 %v2288_v5, %v392_v21  ;;  %v400_v57 = vshll.u32 %v2288_v5, %v391_v4 }
 0x10c   : > { %v2496_v48 = vmul.u32.u64.low %v2458_v54, %v632_v46  ;;  %v2497_v49 = vmul.u32.u64.high %v2458_v54, %v632_v46, %v2496_v48  ;;  %v2500_v50 = vmul.u32.u64.low %v2458_v54, %v628_v45  ;;  %v2501_v52 = vmul.u32.u64.high %v2458_v54, %v628_v45, %v2500_v50 }
 0x10d   : > { %v396_v53 = vor.u32 %v395_v43, %v394_v25  ;;  %v399_v56 = vor.u32 %v398_v47, %v397_v37  ;;  %v401_v63 = vshrl.u32 %v2289_v7, %v392_v21  ;;  %v640_v55 = vmul.u32 %v2458_v54, %v624_v44 }
 0x10e   : > { %v403_v1 = vshll.u32 %v2289_v7, %v391_v4  ;;  %v404_v3 = vshrl.u32 %v2290_v9, %v392_v21  ;;  %v407_v6 = vshrl.u32 %v2291_v16, %v392_v21  ;;  %v406_v10 = vshll.u32 %v2290_v9, %v391_v4 }
 0x10f   : > { %v402_v8 = vor.u32 %v401_v63, %v400_v57  ;;  %vm409_vm10 = vcmp.lt.s32.totalorder %v2462_v59, 1  ;;  %vm410_vm11 = vcmp.lt.s32.totalorder %v2462_v59, 2  ;;  %vm642_vm12 = vc.u32 %v2497_v49, %v2500_v50 }
 0x110   : > { %v643_v11 = vadd.s32 1, %v2501_v52  ;;  %v405_v12 = vor.u32 %v404_v3, %v403_v1  ;;  %vm411_vm13 = vcmp.lt.s32.totalorder %v2462_v59, 3  ;;  %v408_v54 = vor.u32 %v407_v6, %v406_v10 }
 0x111   : > { %vm412_vm14 = vcmp.lt.s32.totalorder %v2462_v59, 4  ;;  %v413_v13 = vsel %vm409_vm10, %v393_v42, %v396_v53  ;;  %v417_v14 = vsel %vm409_vm10, %v396_v53, %v399_v56  ;;  %v421_v18 = vsel %vm409_vm10, %v399_v56, %v402_v8 }
 0x112   : > { %v644_v15 = vsel %vm642_vm12, %v643_v11, %v2501_v52  ;;  %v414_v4 = vsel %vm412_vm14, %v402_v8, 2102212464  ;;  %v418_v17 = vsel %vm412_vm14, %v405_v12, 920167782  ;;  %v422_v22 = vsel %vm412_vm14, %v408_v54, 1326507024 }
 0x113   : > { %v645_v19 = vadd.s32 %v644_v15, %v640_v55  ;;  %v415_v20 = vsel %vm411_vm13, %v399_v56, %v414_v4  ;;  %v419_v21 = vsel %vm411_vm13, %v402_v8, %v418_v17  ;;  %v423_v25 = vsel %vm411_vm13, %v405_v12, %v422_v22 }
 0x114   : > { %v420_v23 = vsel %vm410_vm11, %v417_v14, %v419_v21  ;;  %v701_v26 = vsel %vm700_vm9, %v2465_v61, 0  ;;  %v1958_v28 = vadd.s32 4294967169, %v2467_v62  ;;  %v424_v32 = vsel %vm410_vm11, %v421_v18, %v423_v25 }
 0x115   : > { %v646_v30 = vadd.s32 536870912, %v645_v19  ;;  %v2528_v33 = vmul.u32.u64.low %v2460_v58, %v420_v23  ;;  %v2529_v35 = vmul.u32.u64.high %v2460_v58, %v420_v23, %v2528_v33  ;;  %v416_v36 = vsel %vm410_vm11, %v413_v13, %v415_v20 }
 0x116   : > { %v2535_v37 = vmul.u32.u64.low %v2460_v58, %v424_v32  ;;  %v2536_v39 = vmul.u32.u64.high %v2460_v58, %v424_v32, %v2535_v37  ;;  %v702_v40 = vshrl.u32 %v701_v26, 5  ;;  %v703_v62 = vand.u32 31, %v701_v26 }
 0x117   : > { %v2538_v61 = vshrl.u32 %v646_v30, 30  ;;  %v2542_v42 = vshll.u32 %v697_v60, 8  ;;  %v432_v44 = vmul.u32 %v2460_v58, %v416_v36  ;;  %v435_v45 = vadd.s32 1, %v2529_v35 }
 0x118   : > { %v704_v59 = vsub.s32 32, %v703_v62  ;;  %vm434_vm15 = vc.u32 %v2536_v39, %v2528_v33  ;;  %v706_v46 = vshll.u32 %v2286_v0, %v703_v62  ;;  %vm721_vm0 = vcmp.lt.s32.totalorder %v702_v40, 1 }
 0x119   : > { %v648_v43 = vshll.u32 %v2538_v61, 30  ;;  %v491_v47 = vadd.s32 1, %v1958_v28  ;;  %v436_v48 = vsel %vm434_vm15, %v435_v45, %v2529_v35  ;;  %v709_v60 = vshll.u32 %v2287_v2, %v703_v62 }
 0x11a   : > { %v707_v51 = vshrl.u32 %v2287_v2, %v704_v59  ;;  %v712_v52 = vshll.u32 %v2288_v5, %v703_v62  ;;  %v437_v58 = vadd.s32 %v436_v48, %v432_v44  ;;  %v710_v56 = vshrl.u32 %v2288_v5, %v704_v59 }
 0x11b   : > { %v2554_v53 = vsub.s32 %v645_v19, %v648_v43  ;;  %v713_v57 = vshrl.u32 %v2289_v7, %v704_v59  ;;  %v715_v55 = vshll.u32 %v2289_v7, %v703_v62  ;;  %v716_v1 = vshrl.u32 %v2290_v9, %v704_v59 }
 0x11c   : > { %v708_v63 = vor.u32 %v707_v51, %v706_v46  ;;  %v718_v3 = vshll.u32 %v2290_v9, %v703_v62  ;;  %v438_v6 = vadd.s32 536870912, %v437_v58  ;;  %v711_v8 = vor.u32 %v710_v56, %v709_v60 }
 0x11d   : > { %v714_v10 = vor.u32 %v713_v57, %v712_v52  ;;  %v719_v11 = vshrl.u32 %v2291_v16, %v704_v59  ;;  %v717_v12 = vor.u32 %v716_v1, %v715_v55  ;;  %vm722_vm1 = vcmp.lt.s32.totalorder %v702_v40, 2 }
 0x11e   : > { %vm723_vm2 = vcmp.lt.s32.totalorder %v702_v40, 3  ;;  %vm724_vm3 = vcmp.lt.s32.totalorder %v702_v40, 4  ;;  %v2562_v54 = vshrl.u32 %v438_v6, 30  ;;  %v729_v15 = vsel %vm721_vm0, %v708_v63, %v711_v8 }
 0x11f   : > { %v720_v13 = vor.u32 %v719_v11, %v718_v3  ;;  %v726_v14 = vsel %vm724_vm3, %v714_v10, 2102212464  ;;  %v651_v4 = vsub.s32 0, %v2554_v53  ;;  %v705_v17 = vshrl.u32 %v2286_v0, %v704_v59 }
 0x120   : > { %v730_v18 = vsel %vm724_vm3, %v717_v12, 920167782  ;;  %v733_v19 = vsel %vm721_vm0, %v711_v8, %v714_v10  ;;  %v440_v20 = vshll.u32 %v2562_v54, 30  ;;  %vm492_vm4 = vcmp.gt.s32.totalorder %v491_v47, 0 }
 0x121   : > { %v731_v21 = vsel %vm723_vm2, %v714_v10, %v730_v18  ;;  %v734_v22 = vsel %vm724_vm3, %v720_v13, 1326507024  ;;  %v725_v23 = vsel %vm721_vm0, %v705_v17, %v708_v63  ;;  %v727_v25 = vsel %vm723_vm2, %v711_v8, %v726_v14 }
 0x122   : > { %v732_v26 = vsel %vm722_vm1, %v729_v15, %v731_v21  ;;  %v735_v28 = vsel %vm723_vm2, %v717_v12, %v734_v22  ;;  %v2574_v30 = vsub.s32 %v437_v58, %v440_v20  ;;  %v493_v43 = vsel %vm492_vm4, %v491_v47, 0 }
 0x123   : > { %v736_v32 = vsel %vm722_vm1, %v733_v19, %v735_v28  ;;  %v2578_v35 = vmul.u32.u64.low %v2542_v42, %v732_v26  ;;  %v2579_v36 = vmul.u32.u64.high %v2542_v42, %v732_v26, %v2578_v35  ;;  %v1963_v44 = vmin.u32 %v651_v4, %v2554_v53 }
 0x124   : > { %v2583_v37 = vmul.u32.u64.low %v2542_v42, %v736_v32  ;;  %v2584_v62 = vmul.u32.u64.high %v2542_v42, %v736_v32, %v2583_v37  ;;  %v443_v45 = vsub.s32 0, %v2574_v30  ;;  %v728_v59 = vsel %vm722_vm1, %v725_v23, %v727_v25 }
 0x125   : > { %v495_v46 = vand.u32 31, %v493_v43  ;;  %v747_v51 = vadd.s32 1, %v2579_v36  ;;  %v481_v60 = vand.u32 2147483647, %v2447_v38  ;;  %v744_v52 = vmul.u32 %v2542_v42, %v728_v59 }
 0x126   : > { %v1955_v48 = vmin.u32 %v443_v45, %v2574_v30  ;;  %vm746_vm5 = vc.u32 %v2584_v62, %v2578_v35  ;;  %v653_v58 = vclz %v1963_v44  ;;  %v494_v13 = vshrl.u32 %v493_v43, 5 }
 0x127   : > { %v748_v56 = vsel %vm746_vm5, %v747_v51, %v2579_v36  ;;  %v496_v57 = vsub.s32 32, %v495_v46  ;;  %v488_v40 = vand.u32 8388607, %v481_v60  ;;  %v498_v14 = vshll.u32 %v2286_v0, %v495_v46 }
 0x128   : > { %v445_v47 = vclz %v1955_v48  ;;  %v749_v63 = vadd.s32 %v748_v56, %v744_v52  ;;  %v1964_v1 = vadd.s32 4294967294, %v653_v58  ;;  %v501_v15 = vshll.u32 %v2287_v2, %v495_v46 }
 0x129   : > { %v499_v6 = vshrl.u32 %v2287_v2, %v496_v57  ;;  %v502_v8 = vshrl.u32 %v2288_v5, %v496_v57  ;;  %v505_v10 = vshrl.u32 %v2289_v7, %v496_v57  ;;  %v508_v11 = vshrl.u32 %v2290_v9, %v496_v57 }
 0x12a   : > { %v750_v55 = vadd.s32 536870912, %v749_v63  ;;  %v1956_v3 = vadd.s32 4294967294, %v445_v47  ;;  %v489_v12 = vor.u32 8388608, %v488_v40  ;;  %v504_v17 = vshll.u32 %v2288_v5, %v495_v46 }
 0x12b   : > { %v507_v18 = vshll.u32 %v2289_v7, %v495_v46  ;;  %v511_v19 = vshrl.u32 %v2291_v16, %v496_v57  ;;  %vm1965_vm6 = vcmp.lt.s32.totalorder %v1964_v1, 0  ;;  %v500_v20 = vor.u32 %v499_v6, %v498_v14 }
 0x12c   : > { %v2600_v42 = vshrl.u32 %v750_v55, 30  ;;  %vm1957_vm7 = vcmp.lt.s32.totalorder %v1956_v3, 0  ;;  %v503_v21 = vor.u32 %v502_v8, %v501_v15  ;;  %v506_v23 = vor.u32 %v505_v10, %v504_v17 }
 0x12d   : > { %v509_v25 = vor.u32 %v508_v11, %v507_v18  ;;  %v510_v26 = vshll.u32 %v2290_v9, %v495_v46  ;;  %v529_v28 = vshll.u32 %v489_v12, 8  ;;  %v448_v32 = vsel %vm1957_vm7, 0, %v1956_v3 }
 0x12e   : > { %v752_v4 = vshll.u32 %v2600_v42, 30  ;;  %vm513_vm8 = vcmp.lt.s32.totalorder %v494_v13, 1  ;;  %v2614_v43 = vsel %vm1965_vm6, 0, %v1964_v1  ;;  %v497_v44 = vshrl.u32 %v2286_v0, %v496_v57 }
 0x12f   : > { %v512_v37 = vor.u32 %v511_v19, %v510_v26  ;;  %vm516_vm9 = vcmp.lt.s32.totalorder %v494_v13, 4  ;;  %v521_v45 = vsel %vm513_vm8, %v500_v20, %v503_v21  ;;  %vm515_vm10 = vcmp.lt.s32.totalorder %v494_v13, 3 }
 0x130   : > { %v2610_v22 = vsub.s32 %v749_v63, %v752_v4  ;;  %v518_v48 = vsel %vm516_vm9, %v506_v23, 2102212464  ;;  %v522_v51 = vsel %vm516_vm9, %v509_v25, 920167782  ;;  %v453_v52 = vsub.s32 4294967266, %v448_v32 }
 0x131   : > { %vm514_vm11 = vcmp.lt.s32.totalorder %v494_v13, 2  ;;  %v523_v46 = vsel %vm515_vm10, %v506_v23, %v522_v51  ;;  %v525_v58 = vsel %vm513_vm8, %v503_v21, %v506_v23  ;;  %v517_v56 = vsel %vm513_vm8, %v497_v44, %v500_v20 }
 0x132   : > { %v755_v36 = vsub.s32 0, %v2610_v22  ;;  %v524_v63 = vsel %vm514_vm11, %v521_v45, %v523_v46  ;;  %v526_v40 = vsel %vm516_vm9, %v512_v37, 1326507024  ;;  %v519_v55 = vsel %vm515_vm10, %v503_v21, %v518_v48  ;;  %v2168_v45 = vld [vmem:[%s3344_s3] sm:$0xff]  }
 0x133   : > { %v527_v1 = vsel %vm515_vm10, %v509_v25, %v526_v40  ;;  %v2619_v3 = vmul.u32.u64.low %v529_v28, %v524_v63  ;;  %v2620_v57 = vmul.u32.u64.high %v529_v28, %v524_v63, %v2619_v3  ;;  %v661_v12 = vsub.s32 4294967266, %v2614_v43 }
 0x134   : > { %v1967_v59 = vmin.u32 %v755_v36, %v2610_v22  ;;  %v528_v8 = vsel %vm514_vm11, %v525_v58, %v527_v1  ;;  %v520_v14 = vsel %vm514_vm11, %v517_v56, %v519_v55  ;;  %v454_v15 = vadd.s32 127, %v453_v52 }
 0x135   : > { %v2624_v10 = vmul.u32.u64.low %v529_v28, %v528_v8  ;;  %v2625_v11 = vmul.u32.u64.high %v529_v28, %v528_v8, %v2624_v10  ;;  %v539_v17 = vadd.s32 1, %v2620_v57  ;;  %v449_v19 = vsub.s32 32, %v448_v32 }
 0x136   : > { %v757_v47 = vclz %v1967_v59  ;;  %v536_v20 = vmul.u32 %v529_v28, %v520_v14  ;;  %v662_v21 = vadd.s32 127, %v661_v12  ;;  %v433_v26 = vadd.s32 %v2528_v33, %v2536_v39 }
 0x137   : > { %vm538_vm13 = vc.u32 %v2625_v11, %v2619_v3  ;;  %v455_v36 = vshll.u32 %v454_v15, 23  ;;  %v657_v44 = vsub.s32 32, %v2614_v43  ;;  %v745_v59 = vadd.s32 %v2578_v35, %v2584_v62 }
 0x138   : > { %v1968_v6 = vadd.s32 4294967294, %v757_v47  ;;  %v540_v25 = vsel %vm538_vm13, %v539_v17, %v2620_v57  ;;  %v451_v28 = vshrl.u32 %v433_v26, %v449_v19  ;;  %v641_v52 = vadd.s32 %v2500_v50, %v2497_v49 }
 0x139   : > { %v541_v37 = vadd.s32 %v540_v25, %v536_v20  ;;  %v663_v46 = vshll.u32 %v662_v21, 23  ;;  %v450_v33 = vshll.u32 %v2574_v30, %v448_v32  ;;  %v456_v39 = vor.u32 4788187, %v455_v36 }
 0x13a   : > { %vm1969_vm12 = vcmp.lt.s32.totalorder %v1968_v6, 0  ;;  %vm833_vm14 = vcmask 261120   ;;  %v659_v56 = vshrl.u32 %v641_v52, %v657_v44  ;;  %v658_v49 = vshll.u32 %v2554_v53, %v2614_v43 }
 0x13b   : > { %v760_v4 = vsel %vm1969_vm12, 0, %v1968_v6  ;;  %v542_v51 = vadd.s32 536870912, %v541_v37  ;;  %2047 = vmatprep.mubr.msk.bf16.mxu1 %vm833_vm14, %v2168_v45  ;;  %v452_v63 = vor.u32 %v451_v28, %v450_v33  ;;  %v664_v50 = vor.u32 4788187, %v663_v46 }
 0x13c   : > { %v765_v18 = vsub.s32 4294967266, %v760_v4  ;;  %v761_v13 = vsub.s32 32, %v760_v4  ;;  %v762_v40 = vshll.u32 %v2610_v22, %v760_v4  ;;  %v457_v55 = vand.u32 2147483647, %v456_v39 }
 0x13d   : > { %v2644_v47 = vshrl.u32 %v542_v51, 30  ;;  %v660_v1 = vor.u32 %v659_v56, %v658_v49  ;;  %v459_v57 = vcvt.s32.f32 %v452_v63  ;;  %v665_v10 = vand.u32 2147483647, %v664_v50 }
 0x13e   : > { %v766_v23 = vadd.s32 127, %v765_v18  ;;  %v763_v58 = vshrl.u32 %v745_v59, %v761_v13  ;;  %vm379_vm0 = vcmp.lt.s32.totalorder %v2437_v27, 0  ;;  %v537_v25 = vadd.s32 %v2619_v3, %v2625_v11 }
 0x13f   : > { %v544_v62 = vshll.u32 %v2644_v47, 30  ;;  %v460_v12 = vmul.f32 %v459_v57, %v457_v55  ;;  %v667_v17 = vcvt.s32.f32 %v660_v1  ;;  %vm691_vm1 = vcmp.lt.s32.totalorder %v2441_v31, 0 }
 0x140   : > { %v767_v48 = vshll.u32 %v766_v23, 23  ;;  %v764_v30 = vor.u32 %v763_v58, %v762_v40  ;;  %vm2659_vm2 = vcmp.le.f32.partialorder %v377_v34, 0.7853982  ;;  %vm587_vm3 = vcmp.lt.s32.totalorder %v2435_v24, 0 }
 0x141   : > { %v545_v32 = vsub.s32 %v541_v37, %v544_v62  ;;  %v668_v18 = vmul.f32 %v667_v17, %v665_v10  ;;  %v461_v19 = vxor.u32 2147483648, %v460_v12  ;;  %vm2673_vm4 = vcmp.le.f32.partialorder %v689_v41, 0.7853982 }
 0x142   : > { %v768_v35 = vor.u32 4788187, %v767_v48  ;;  %v771_v14 = vcvt.s32.f32 %v764_v30  ;;  %vm2682_vm5 = vcmp.le.f32.partialorder %v585_v29, 0.7853982  ;;  %v463_v33 = vsub.s32 4, %v2562_v54 }
 0x143   : > { %v547_v8 = vsub.s32 0, %v545_v32  ;;  %v669_v53 = vxor.u32 2147483648, %v668_v18  ;;  %v462_v23 = vsel %vm379_vm0, %v461_v19, %v460_v12  ;;  %v671_v39 = vsub.s32 4, %v2538_v61 }
 0x144   : > { %v769_v6 = vand.u32 2147483647, %v768_v35  ;;  %v465_v3 = vsel %vm2659_vm2, %v2437_v27, %v462_v23  ;;  %v775_v58 = vsub.s32 4, %v2600_v42  ;;  %v464_v40 = vsel %vm379_vm0, %v463_v33, %v2562_v54 }
 0x145   : > { %v1959_v15 = vmin.u32 %v547_v8, %v545_v32  ;;  %v670_v11 = vsel %vm587_vm3, %v669_v53, %v668_v18  ;;  %2172 = vcosq.f32 %v465_v3  ;;  %v567_v35 = vsub.s32 4, %v2644_v47 }
 0x146   : > { %v772_v22 = vmul.f32 %v771_v14, %v769_v6  ;;  %v673_v41 = vsel %vm2682_vm5, %v2435_v24, %v670_v11  ;;  %2174 = vsinq.f32 %v465_v3  ;;  %v672_v62 = vsel %vm587_vm3, %v671_v39, %v2538_v61 }
 0x147   : > { %v549_v4 = vclz %v1959_v15  ;;  %v776_v49 = vsel %vm691_vm1, %v775_v58, %v2600_v42  ;;  %vm483_vm6 = vcmp.lt.s32.totalorder %v2447_v38, 0  ;;  %v466_v55 = vsel %vm2659_vm2, 0, %v464_v40 }
 0x148   : > { %v773_v21 = vxor.u32 2147483648, %v772_v22  ;;  %vm2707_vm7 = vcmp.le.f32.partialorder %v481_v60, 0.7853982  ;;  %v674_v61 = vsel %vm2682_vm5, 0, %v672_v62  ;;  %v778_v42 = vsel %vm2673_vm4, 0, %v776_v49 }
 0x149   : > { %v1960_v20 = vadd.s32 4294967294, %v549_v4  ;;  %v470_v6 = vadd.s32 3, %v466_v55  ;;  %v678_v10 = vadd.s32 3, %v674_v61  ;;  %vm469_vm3 = vweird.f32 %v2437_v27  ;;  %v2169_v27 = vld [vmem:[%s3344_s3 + $0x8] sm:$0xff]  }
 0x14a   : > { %v774_v37 = vsel %vm691_vm1, %v773_v21, %v772_v22 }
 0x14b   : > { %vm1961_vm15 = vcmp.lt.s32.totalorder %v1960_v20, 0  ;;  %v777_v51 = vsel %vm2673_vm4, %v2441_v31, %v774_v37  ;;  %v471_v17 = vand.u32 3, %v470_v6  ;;  %v679_v18 = vand.u32 3, %v678_v10 }
 0x14c   : > { %v552_v43 = vsel %vm1961_vm15, 0, %v1960_v20  ;;  %2176 = vcosq.f32 %v777_v51 }
 0x14d   : > { %v553_v26 = vsub.s32 32, %v552_v43  ;;  %v557_v36 = vsub.s32 4294967266, %v552_v43  ;;  %v554_v44 = vshll.u32 %v545_v32, %v552_v43  ;;  %2178 = vsinq.f32 %v777_v51 }
 0x14e   : > { %2180 = vsinq.f32 %v673_v41  ;;  %v568_v32 = vsel %vm483_vm6, %v567_v35, %v2644_v47  ;;  %v782_v47 = vadd.s32 3, %v778_v42  ;;  %vm473_vm8 = vcmp.eq.s32.totalorder %v471_v17, 0 }
 0x14f   : > { %v555_v45 = vshrl.u32 %v537_v25, %v553_v26  ;;  %v558_v28 = vadd.s32 127, %v557_v36  ;;  %2182 = vcosq.f32 %v673_v41  ;;  %v2173_v57 = vpop.eup %2172  ;;  %v570_v8 = vsel %vm2707_vm7, 0, %v568_v32 }
 0x150   : > { %v2175_v60 = vpop.eup %2174  ;;  %v574_v22 = vadd.s32 3, %v570_v8  ;;  %v783_v19 = vand.u32 3, %v782_v47  ;;  %v477_v21 = vxor.u32 2147483648, %v2173_v57  ;;  %vm476_vm9 = vcmp.eq.s32.totalorder %v471_v17, 2 }
 0x151   : > { %v556_v59 = vor.u32 %v555_v45, %v554_v44  ;;  %v559_v48 = vshll.u32 %v558_v28, 23  ;;  %v474_v20 = vxor.u32 2147483648, %v2175_v60  ;;  %vm681_vm10 = vcmp.eq.s32.totalorder %v679_v18, 0 }
 0x152   : > { %v575_v25 = vand.u32 3, %v574_v22  ;;  %vm785_vm11 = vcmp.eq.s32.totalorder %v783_v19, 0  ;;  %vm788_vm12 = vcmp.eq.s32.totalorder %v783_v19, 2  ;;  %v478_v37 = vsel %vm476_vm9, %v477_v21, %v2175_v60 }
 0x153   : > { %v560_v46 = vor.u32 4788187, %v559_v48  ;;  %v563_v63 = vcvt.s32.f32 %v556_v59  ;;  %v475_v13 = vsel %vm473_vm8, %v2173_v57, %v474_v20  ;;  %vm472_vm13 = vcmp.lt.s32.totalorder %v471_v17, 2 }
 0x154   : > { %vm684_vm15 = vcmp.eq.s32.totalorder %v679_v18, 2  ;;  %vm580_vm0 = vcmp.eq.s32.totalorder %v575_v25, 2  ;;  %vm784_vm1 = vcmp.lt.s32.totalorder %v783_v19, 2  ;;  %v479_v48 = vsel %vm472_vm13, %v475_v13, %v478_v37 }
 0x155   : > { %v561_v56 = vand.u32 2147483647, %v560_v46  ;;  %vm577_vm2 = vcmp.eq.s32.totalorder %v575_v25, 0  ;;  %vm576_vm4 = vcmp.lt.s32.totalorder %v575_v25, 2  ;;  %vm680_vm5 = vcmp.lt.s32.totalorder %v679_v18, 2 }
 0x156   : > { %v2177_v12 = vpop.eup %2176  ;;  %v480_v39 = vsel %vm469_vm3, nan, %v479_v48  ;;  %vm677_vm8 = vweird.f32 %v2435_v24 }
 0x157   : > { %v564_v29 = vmul.f32 %v563_v63, %v561_v56  ;;  %v2179_v14 = vpop.eup %2178  ;;  %v789_v43 = vxor.u32 2147483648, %v2177_v12 }
 0x158   : > { %v2181_v15 = vpop.eup %2180  ;;  %v786_v53 = vxor.u32 2147483648, %v2179_v14 }
 0x159   : > { %v565_v50 = vxor.u32 2147483648, %v564_v29  ;;  %v2183_v4 = vpop.eup %2182  ;;  %v682_v23 = vxor.u32 2147483648, %v2181_v15  ;;  %v790_v45 = vsel %vm788_vm12, %v789_v43, %v2179_v14 }
 0x15a   : > { %v685_v26 = vxor.u32 2147483648, %v2183_v4  ;;  %v787_v44 = vsel %vm785_vm11, %v2177_v12, %v786_v53 }
 0x15b   : > { %v566_v30 = vsel %vm483_vm6, %v565_v50, %v564_v29  ;;  %v683_v11 = vsel %vm681_vm10, %v2183_v4, %v682_v23  ;;  %v791_v52 = vsel %vm784_vm1, %v787_v44, %v790_v45  ;;  %vm573_vm6 = vweird.f32 %v2447_v38 }
 0x15c   : > { %v569_v1 = vsel %vm2707_vm7, %v2447_v38, %v566_v30  ;;  %v686_v59 = vsel %vm684_vm15, %v685_v26, %v2181_v15  ;;  %vm781_vm7 = vweird.f32 %v2441_v31  ;;  %v806_v38 = vpop.permute.xlu0 %805  ;;  %v811_v31 = vpop.permute.xlu1 %810  ;;  %v2170_v26 = vld [vmem:[%s3344_s3 + $0x10] sm:$0xff]  }
 0x15d   : > { %2184 = vcosq.f32 %v569_v1  ;;  %v687_v41 = vsel %vm680_vm5, %v683_v11, %v686_v59  ;;  %v792_v56 = vsel %vm781_vm7, nan, %v791_v52  ;;  %2055 = vmatprep.mubr.msk.bf16.mxu0 %vm833_vm14, %v2170_v26 }
 0x15e   : > { %2186 = vsinq.f32 %v569_v1  ;;  %v688_v29 = vsel %vm677_vm8, nan, %v687_v41 }
 0x15f   : > { %v798_v40 = vpack.c.bf16 %v792_v56, %v688_v29 }
 0x160   : > { %v816_v35 = vpop.permute.xlu0 %815  ;;  %v821_v24 = vpop.permute.xlu1 %820 }
 0x167   : > { %v2185_v36 = vpop.eup %2184 }
 0x168   : > { %v2187_v28 = vpop.eup %2186  ;;  %v581_v3 = vxor.u32 2147483648, %v2185_v36 }
 0x169   : > { %v578_v34 = vxor.u32 2147483648, %v2187_v28 }
 0x16a   : > { %v582_v51 = vsel %vm580_vm0, %v581_v3, %v2187_v28 }
 0x16b   : > { %v579_v46 = vsel %vm577_vm2, %v2185_v36, %v578_v34 }
 0x16c   : > { %v583_v33 = vsel %vm576_vm4, %v579_v46, %v582_v51 }
 0x16d   : > { %v584_v58 = vsel %vm573_vm6, nan, %v583_v33 }
 0x16e   : > { %v797_v63 = vpack.c.bf16 %v584_v58, %v480_v39 }
 0x170   : > { %2043 = vmatprep.subr.bf16.mxu1 %v797_v63 }
 0x171   : > { %2044 = vmatpush3.bf16.msra.mxu1 %v797_v63 }
 0x172   : > { %2045 = vmatprep.subr.bf16.mxu1 %v798_v40 }
 0x175   : > { %2046 = vmatpush3.bf16.msra.mxu1 %v798_v40 }
 0x178   : > { %2048 = vmatmul.mubr.msk.bf16.vlgmr.msra.gmra.mrb[0].mxu1 %vm833_vm14, %v2169_v27 }
 0x24b   : > { %v2049_v62 = vpop.f32.mrb[0].mxu1 }
 0x24c   : > { %v2729_v49 = vadd.f32 %v2049_v62, %v816_v35  ;;  %v874_v50 = vpop.f32.mrb[1].mxu1 }
 0x24d   : > { %v2731_v55 = vadd.f32 %v874_v50, %v806_v38  ;;  %v2050_v54 = vpop.f32.mrb[2].mxu1 }
 0x24e   : > { %v1097_v30 = vand.u32 2147483647, %v2729_v49  ;;  %v1100_v32 = vand.u32 2139095040, %v2729_v49  ;;  %v2735_v61 = vadd.f32 %v2050_v54, %v821_v24  ;;  %v877_v42 = vpop.f32.mrb[3].mxu1 }
 0x24f   : > { %v889_v1 = vand.u32 2147483647, %v2731_v55  ;;  %v892_v57 = vand.u32 2139095040, %v2731_v55  ;;  %v2745_v15 = vadd.f32 %v877_v42, %v811_v31 }
 0x250   : > { %v1101_v6 = vshrl.u32 %v1100_v32, 23  ;;  %v1104_v60 = vand.u32 8388607, %v1097_v30  ;;  %v1204_v47 = vand.u32 2139095040, %v2735_v61  ;;  %v1201_v14 = vand.u32 2147483647, %v2735_v61 }
 0x251   : > { %v893_v8 = vshrl.u32 %v892_v57, 23  ;;  %v896_v10 = vand.u32 8388607, %v889_v1  ;;  %v996_v43 = vand.u32 2139095040, %v2745_v15 }
 0x252   : > { %v1982_v12 = vadd.s32 4294967169, %v1101_v6  ;;  %v1105_v17 = vor.u32 8388608, %v1104_v60  ;;  %v1205_v4 = vshrl.u32 %v1204_v47, 23  ;;  %v2749_v53 = vand.u32 8388607, %v1201_v14 }
 0x253   : > { %v1974_v22 = vadd.s32 4294967169, %v893_v8  ;;  %v897_v19 = vor.u32 8388608, %v896_v10  ;;  %v2767_v51 = vshrl.u32 %v996_v43, 23 }
 0x254   : > { %v1107_v18 = vadd.s32 1, %v1982_v12  ;;  %v1986_v21 = vadd.s32 4294967169, %v1205_v4  ;;  %v2752_v25 = vshll.u32 %v1105_v17, 8  ;;  %v1209_v3 = vor.u32 8388608, %v2749_v53 }
 0x255   : > { %v899_v20 = vadd.s32 1, %v1974_v22  ;;  %v2757_v44 = vshll.u32 %v897_v19, 8 }
 0x256   : > { %vm1108_vm9 = vcmp.gt.s32.totalorder %v1107_v18, 0  ;;  %v2762_v11 = vadd.s32 1, %v1986_v21 }
 0x257   : > { %v1109_v23 = vsel %vm1108_vm9, %v1107_v18, 0  ;;  %vm900_vm10 = vcmp.gt.s32.totalorder %v899_v20, 0 }
 0x258   : > { %v1110_v36 = vshrl.u32 %v1109_v23, 5  ;;  %v1111_v13 = vand.u32 31, %v1109_v23  ;;  %v901_v37 = vsel %vm900_vm10, %v899_v20, 0  ;;  %vm1212_vm0 = vcmp.gt.s32.totalorder %v2762_v11, 0 }
 0x259   : > { %v2759_v45 = vshrl.u32 %v901_v37, 5  ;;  %v903_v28 = vand.u32 31, %v901_v37 }
 0x25a   : > { %v1112_v34 = vsub.s32 32, %v1111_v13  ;;  %v1114_v59 = vshll.u32 %v2286_v0, %v1111_v13  ;;  %v1117_v48 = vshll.u32 %v2287_v2, %v1111_v13  ;;  %v1120_v52 = vshll.u32 %v2288_v5, %v1111_v13 }
 0x25b   : > { %v1123_v46 = vshll.u32 %v2289_v7, %v1111_v13  ;;  %v1126_v33 = vshll.u32 %v2290_v9, %v1111_v13  ;;  %vm1129_vm11 = vcmp.lt.s32.totalorder %v1110_v36, 1  ;;  %vm1130_vm12 = vcmp.lt.s32.totalorder %v1110_v36, 2 }
 0x25c   : > { %v1115_v41 = vshrl.u32 %v2287_v2, %v1112_v34  ;;  %v1118_v39 = vshrl.u32 %v2288_v5, %v1112_v34  ;;  %v1121_v58 = vshrl.u32 %v2289_v7, %v1112_v34  ;;  %v1113_v56 = vshrl.u32 %v2286_v0, %v1112_v34 }
 0x25d   : > { %v1124_v63 = vshrl.u32 %v2290_v9, %v1112_v34  ;;  %v1127_v29 = vshrl.u32 %v2291_v16, %v1112_v34  ;;  %vm1131_vm13 = vcmp.lt.s32.totalorder %v1110_v36, 3  ;;  %v904_v31 = vsub.s32 32, %v903_v28 }
 0x25e   : > { %v1116_v40 = vor.u32 %v1115_v41, %v1114_v59  ;;  %v1119_v27 = vor.u32 %v1118_v39, %v1117_v48  ;;  %v1122_v38 = vor.u32 %v1121_v58, %v1120_v52  ;;  %vm1132_vm15 = vcmp.lt.s32.totalorder %v1110_v36, 4 }
 0x25f   : > { %v1125_v35 = vor.u32 %v1124_v63, %v1123_v46  ;;  %v1128_v62 = vor.u32 %v1127_v29, %v1126_v33  ;;  %v906_v50 = vshll.u32 %v2286_v0, %v903_v28  ;;  %v909_v8 = vshll.u32 %v2287_v2, %v903_v28 }
 0x260   : > { %v1133_v24 = vsel %vm1129_vm11, %v1113_v56, %v1116_v40  ;;  %v1134_v54 = vsel %vm1132_vm15, %v1122_v38, 2102212464  ;;  %v1137_v32 = vsel %vm1129_vm11, %v1116_v40, %v1119_v27  ;;  %v1141_v42 = vsel %vm1129_vm11, %v1119_v27, %v1122_v38 }
 0x261   : > { %v1135_v57 = vsel %vm1131_vm13, %v1119_v27, %v1134_v54  ;;  %v1138_v6 = vsel %vm1132_vm15, %v1125_v35, 920167782  ;;  %v1142_v60 = vsel %vm1132_vm15, %v1128_v62, 1326507024  ;;  %v905_v12 = vshrl.u32 %v2286_v0, %v904_v31 }
 0x262   : > { %v1139_v10 = vsel %vm1131_vm13, %v1122_v38, %v1138_v6  ;;  %v1143_v47 = vsel %vm1131_vm13, %v1125_v35, %v1142_v60  ;;  %v907_v17 = vshrl.u32 %v2287_v2, %v904_v31  ;;  %v1136_v22 = vsel %vm1130_vm12, %v1133_v24, %v1135_v57 }
 0x263   : > { %v1140_v4 = vsel %vm1130_vm12, %v1137_v32, %v1139_v10  ;;  %v1144_v18 = vsel %vm1130_vm12, %v1141_v42, %v1143_v47  ;;  %v910_v19 = vshrl.u32 %v2288_v5, %v904_v31  ;;  %v912_v37 = vshll.u32 %v2288_v5, %v903_v28 }
 0x264   : > { %v2794_v20 = vmul.u32.u64.low %v2752_v25, %v1144_v18  ;;  %v2795_v21 = vmul.u32.u64.high %v2752_v25, %v1144_v18, %v2794_v20  ;;  %v2798_v43 = vmul.u32.u64.low %v2752_v25, %v1140_v4  ;;  %v2799_v23 = vmul.u32.u64.high %v2752_v25, %v1140_v4, %v2798_v43 }
 0x265   : > { %v908_v26 = vor.u32 %v907_v17, %v906_v50  ;;  %v911_v13 = vor.u32 %v910_v19, %v909_v8  ;;  %v913_v34 = vshrl.u32 %v2289_v7, %v904_v31  ;;  %v1152_v36 = vmul.u32 %v2752_v25, %v1136_v22 }
 0x266   : > { %v915_v59 = vshll.u32 %v2289_v7, %v903_v28  ;;  %v916_v48 = vshrl.u32 %v2290_v9, %v904_v31  ;;  %v919_v52 = vshrl.u32 %v2291_v16, %v904_v31  ;;  %v918_v33 = vshll.u32 %v2290_v9, %v903_v28 }
 0x267   : > { %v914_v46 = vor.u32 %v913_v34, %v912_v37  ;;  %vm921_vm1 = vcmp.lt.s32.totalorder %v2759_v45, 1  ;;  %vm922_vm2 = vcmp.lt.s32.totalorder %v2759_v45, 2  ;;  %vm1154_vm3 = vc.u32 %v2795_v21, %v2798_v43 }
 0x268   : > { %v1155_v41 = vadd.s32 1, %v2799_v23  ;;  %v917_v39 = vor.u32 %v916_v48, %v915_v59  ;;  %vm923_vm4 = vcmp.lt.s32.totalorder %v2759_v45, 3  ;;  %v920_v25 = vor.u32 %v919_v52, %v918_v33 }
 0x269   : > { %vm924_vm5 = vcmp.lt.s32.totalorder %v2759_v45, 4  ;;  %v925_v58 = vsel %vm921_vm1, %v905_v12, %v908_v26  ;;  %v929_v56 = vsel %vm921_vm1, %v908_v26, %v911_v13  ;;  %v933_v40 = vsel %vm921_vm1, %v911_v13, %v914_v46 }
 0x26a   : > { %v1156_v63 = vsel %vm1154_vm3, %v1155_v41, %v2799_v23  ;;  %v926_v28 = vsel %vm924_vm5, %v914_v46, 2102212464  ;;  %v930_v29 = vsel %vm924_vm5, %v917_v39, 920167782  ;;  %v934_v35 = vsel %vm924_vm5, %v920_v25, 1326507024 }
 0x26b   : > { %v1157_v27 = vadd.s32 %v1156_v63, %v1152_v36  ;;  %v927_v38 = vsel %vm923_vm4, %v911_v13, %v926_v28  ;;  %v931_v31 = vsel %vm923_vm4, %v914_v46, %v930_v29  ;;  %v935_v24 = vsel %vm923_vm4, %v917_v39, %v934_v35 }
 0x26c   : > { %v928_v62 = vsel %vm922_vm2, %v925_v58, %v927_v38  ;;  %v932_v50 = vsel %vm922_vm2, %v929_v56, %v931_v31  ;;  %v1213_v54 = vsel %vm1212_vm0, %v2762_v11, 0  ;;  %v936_v42 = vsel %vm922_vm2, %v933_v40, %v935_v24 }
 0x26d   : > { %v1158_v32 = vadd.s32 536870912, %v1157_v27  ;;  %v2827_v57 = vmul.u32.u64.low %v2757_v44, %v932_v50  ;;  %v2828_v6 = vmul.u32.u64.high %v2757_v44, %v932_v50, %v2827_v57  ;;  %v1214_v10 = vshrl.u32 %v1213_v54, 5 }
 0x26e   : > { %v2832_v60 = vmul.u32.u64.low %v2757_v44, %v936_v42  ;;  %v2833_v8 = vmul.u32.u64.high %v2757_v44, %v936_v42, %v2832_v60  ;;  %v1215_v12 = vand.u32 31, %v1213_v54  ;;  %v944_v17 = vmul.u32 %v2757_v44, %v928_v62 }
 0x26f   : > { %v2835_v47 = vshrl.u32 %v1158_v32, 30  ;;  %v2840_v11 = vshll.u32 %v1209_v3, 8  ;;  %v947_v22 = vadd.s32 1, %v2828_v6  ;;  %v1978_v18 = vadd.s32 4294967169, %v2767_v51 }
 0x270   : > { %v1216_v4 = vsub.s32 32, %v1215_v12  ;;  %vm946_vm6 = vc.u32 %v2833_v8, %v2827_v57  ;;  %v1218_v19 = vshll.u32 %v2286_v0, %v1215_v12  ;;  %v1221_v20 = vshll.u32 %v2287_v2, %v1215_v12 }
 0x271   : > { %v1160_v45 = vshll.u32 %v2835_v47, 30  ;;  %vm1233_vm7 = vcmp.lt.s32.totalorder %v1214_v10, 1  ;;  %v948_v53 = vsel %vm946_vm6, %v947_v22, %v2828_v6  ;;  %v1224_v23 = vshll.u32 %v2288_v5, %v1215_v12 }
 0x272   : > { %v1219_v3 = vshrl.u32 %v2287_v2, %v1216_v4  ;;  %v949_v26 = vadd.s32 %v948_v53, %v944_v17  ;;  %v1222_v13 = vshrl.u32 %v2288_v5, %v1216_v4  ;;  %v1225_v51 = vshrl.u32 %v2289_v7, %v1216_v4 }
 0x273   : > { %v2849_v44 = vsub.s32 %v1157_v27, %v1160_v45  ;;  %v1227_v37 = vshll.u32 %v2289_v7, %v1215_v12  ;;  %v1228_v59 = vshrl.u32 %v2290_v9, %v1216_v4  ;;  %v1230_v48 = vshll.u32 %v2290_v9, %v1215_v12 }
 0x274   : > { %v1220_v36 = vor.u32 %v1219_v3, %v1218_v19  ;;  %v950_v52 = vadd.s32 536870912, %v949_v26  ;;  %v1223_v46 = vor.u32 %v1222_v13, %v1221_v20  ;;  %v1226_v33 = vor.u32 %v1225_v51, %v1224_v23 }
 0x275   : > { %v1163_v34 = vsub.s32 0, %v2849_v44  ;;  %v1231_v41 = vshrl.u32 %v2291_v16, %v1216_v4  ;;  %v1229_v39 = vor.u32 %v1228_v59, %v1227_v37  ;;  %vm1234_vm8 = vcmp.lt.s32.totalorder %v1214_v10, 2 }
 0x276   : > { %vm1235_vm9 = vcmp.lt.s32.totalorder %v1214_v10, 3  ;;  %vm1236_vm10 = vcmp.lt.s32.totalorder %v1214_v10, 4  ;;  %v2861_v25 = vshrl.u32 %v950_v52, 30  ;;  %v1241_v63 = vsel %vm1233_vm7, %v1220_v36, %v1223_v46 }
 0x277   : > { %v1232_v58 = vor.u32 %v1231_v41, %v1230_v48  ;;  %v1238_v56 = vsel %vm1236_vm10, %v1226_v33, 2102212464  ;;  %v1217_v28 = vshrl.u32 %v2286_v0, %v1216_v4  ;;  %v1242_v29 = vsel %vm1236_vm10, %v1229_v39, 920167782 }
 0x278   : > { %v1245_v40 = vsel %vm1233_vm7, %v1223_v46, %v1226_v33  ;;  %v1003_v27 = vadd.s32 1, %v1978_v18  ;;  %v1983_v38 = vmin.u32 %v1163_v34, %v2849_v44  ;;  %v952_v31 = vshll.u32 %v2861_v25, 30 }
 0x279   : > { %v1243_v35 = vsel %vm1235_vm9, %v1226_v33, %v1242_v29  ;;  %v1246_v62 = vsel %vm1236_vm10, %v1232_v58, 1326507024  ;;  %v1237_v50 = vsel %vm1233_vm7, %v1217_v28, %v1220_v36  ;;  %v1239_v24 = vsel %vm1235_vm9, %v1223_v46, %v1238_v56 }
 0x27a   : > { %v1244_v54 = vsel %vm1234_vm8, %v1241_v63, %v1243_v35  ;;  %v1247_v32 = vsel %vm1235_vm9, %v1229_v39, %v1246_v62  ;;  %v2873_v42 = vsub.s32 %v949_v26, %v952_v31  ;;  %vm1004_vm11 = vcmp.gt.s32.totalorder %v1003_v27, 0 }
 0x27b   : > { %v1248_v6 = vsel %vm1234_vm8, %v1245_v40, %v1247_v32  ;;  %v2877_v60 = vmul.u32.u64.low %v2840_v11, %v1244_v54  ;;  %v2878_v12 = vmul.u32.u64.high %v2840_v11, %v1244_v54, %v2877_v60  ;;  %v1240_v4 = vsel %vm1234_vm8, %v1237_v50, %v1239_v24 }
 0x27c   : > { %v2882_v17 = vmul.u32.u64.low %v2840_v11, %v1248_v6  ;;  %v2883_v45 = vmul.u32.u64.high %v2840_v11, %v1248_v6, %v2882_v17  ;;  %v955_v22 = vsub.s32 0, %v2873_v42  ;;  %v1005_v18 = vsel %vm1004_vm11, %v1003_v27, 0 }
 0x27d   : > { %v993_v19 = vand.u32 2147483647, %v2745_v15  ;;  %v1165_v20 = vclz %v1983_v38  ;;  %v1259_v3 = vadd.s32 1, %v2878_v12  ;;  %v1007_v23 = vand.u32 31, %v1005_v18 }
 0x27e   : > { %v1975_v53 = vmin.u32 %v955_v22, %v2873_v42  ;;  %v1256_v26 = vmul.u32 %v2840_v11, %v1240_v4  ;;  %vm1258_vm12 = vc.u32 %v2883_v45, %v2877_v60  ;;  %v1006_v39 = vshrl.u32 %v1005_v18, 5 }
 0x27f   : > { %v1260_v51 = vsel %vm1258_vm12, %v1259_v3, %v2878_v12  ;;  %v1008_v37 = vsub.s32 32, %v1007_v23  ;;  %v1984_v34 = vadd.s32 4294967294, %v1165_v20  ;;  %v1000_v36 = vand.u32 8388607, %v993_v19 }
 0x280   : > { %v957_v13 = vclz %v1975_v53  ;;  %v1261_v10 = vadd.s32 %v1260_v51, %v1256_v26  ;;  %v1010_v58 = vshll.u32 %v2286_v0, %v1007_v23  ;;  %v1013_v63 = vshll.u32 %v2287_v2, %v1007_v23 }
 0x281   : > { %v1011_v52 = vshrl.u32 %v2287_v2, %v1008_v37  ;;  %v1014_v11 = vshrl.u32 %v2288_v5, %v1008_v37  ;;  %v1017_v33 = vshrl.u32 %v2289_v7, %v1008_v37  ;;  %vm1985_vm13 = vcmp.lt.s32.totalorder %v1984_v34, 0 }
 0x282   : > { %v1262_v59 = vadd.s32 536870912, %v1261_v10  ;;  %v1976_v48 = vadd.s32 4294967294, %v957_v13  ;;  %v1001_v41 = vor.u32 8388608, %v1000_v36  ;;  %v1016_v28 = vshll.u32 %v2288_v5, %v1007_v23 }
 0x283   : > { %v1020_v29 = vshrl.u32 %v2290_v9, %v1008_v37  ;;  %v1012_v40 = vor.u32 %v1011_v52, %v1010_v58  ;;  %v1019_v27 = vshll.u32 %v2289_v7, %v1007_v23  ;;  %v1023_v38 = vshrl.u32 %v2291_v16, %v1008_v37 }
 0x284   : > { %v2897_v46 = vshrl.u32 %v1262_v59, 30  ;;  %vm1977_vm15 = vcmp.lt.s32.totalorder %v1976_v48, 0  ;;  %v1015_v35 = vor.u32 %v1014_v11, %v1013_v63  ;;  %v1018_v62 = vor.u32 %v1017_v33, %v1016_v28 }
 0x285   : > { %v1022_v50 = vshll.u32 %v2290_v9, %v1007_v23  ;;  %v1021_v24 = vor.u32 %v1020_v29, %v1019_v27  ;;  %v960_v54 = vsel %vm1977_vm15, 0, %v1976_v48  ;;  %v2913_v12 = vsel %vm1985_vm13, 0, %v1984_v34 }
 0x286   : > { %v1264_v56 = vshll.u32 %v2897_v46, 30  ;;  %vm1025_vm0 = vcmp.lt.s32.totalorder %v1006_v39, 1  ;;  %vm1028_vm1 = vcmp.lt.s32.totalorder %v1006_v39, 4  ;;  %v1041_v17 = vshll.u32 %v1001_v41, 8 }
 0x287   : > { %v1024_v6 = vor.u32 %v1023_v38, %v1022_v50  ;;  %v1009_v4 = vshrl.u32 %v2286_v0, %v1008_v37  ;;  %v1030_v18 = vsel %vm1028_vm1, %v1018_v62, 2102212464  ;;  %v1033_v20 = vsel %vm1025_vm0, %v1012_v40, %v1015_v35 }
 0x288   : > { %v2908_v31 = vsub.s32 %v1261_v10, %v1264_v56  ;;  %v965_v53 = vsub.s32 4294967266, %v960_v54  ;;  %vm1026_vm2 = vcmp.lt.s32.totalorder %v1006_v39, 2  ;;  %vm1027_vm3 = vcmp.lt.s32.totalorder %v1006_v39, 3 }
 0x289   : > { %v1034_v3 = vsel %vm1028_vm1, %v1021_v24, 920167782  ;;  %v1037_v13 = vsel %vm1025_vm0, %v1015_v35, %v1018_v62  ;;  %v1038_v51 = vsel %vm1028_vm1, %v1024_v6, 1326507024  ;;  %v1029_v10 = vsel %vm1025_vm0, %v1009_v4, %v1012_v40 }
 0x28a   : > { %v1267_v32 = vsub.s32 0, %v2908_v31  ;;  %v1035_v26 = vsel %vm1027_vm3, %v1018_v62, %v1034_v3  ;;  %v1031_v34 = vsel %vm1027_vm3, %v1015_v35, %v1030_v18  ;;  %v1039_v59 = vsel %vm1027_vm3, %v1021_v24, %v1038_v51 }
 0x28b   : > { %v1036_v36 = vsel %vm1026_vm2, %v1033_v20, %v1035_v26  ;;  %v1040_v52 = vsel %vm1026_vm2, %v1037_v13, %v1039_v59  ;;  %v1173_v58 = vsub.s32 4294967266, %v2913_v12  ;;  %v1032_v63 = vsel %vm1026_vm2, %v1029_v10, %v1031_v34 }
 0x28c   : > { %v1987_v22 = vmin.u32 %v1267_v32, %v2908_v31  ;;  %v2919_v11 = vmul.u32.u64.low %v1041_v17, %v1036_v36  ;;  %v2920_v37 = vmul.u32.u64.high %v1041_v17, %v1036_v36, %v2919_v11  ;;  %v966_v28 = vadd.s32 127, %v965_v53 }
 0x28d   : > { %v2923_v33 = vmul.u32.u64.low %v1041_v17, %v1040_v52  ;;  %v2924_v41 = vmul.u32.u64.high %v1041_v17, %v1040_v52, %v2923_v33  ;;  %v961_v27 = vsub.s32 32, %v960_v54  ;;  %v1048_v35 = vmul.u32 %v1041_v17, %v1032_v63 }
 0x28e   : > { %v1269_v23 = vclz %v1987_v22  ;;  %v1051_v40 = vadd.s32 1, %v2920_v37  ;;  %v1174_v62 = vadd.s32 127, %v1173_v58  ;;  %v945_v24 = vadd.s32 %v2827_v57, %v2833_v8 }
 0x28f   : > { %vm1050_vm5 = vc.u32 %v2924_v41, %v2919_v11  ;;  %v967_v32 = vshll.u32 %v966_v28, 23  ;;  %v1169_v22 = vsub.s32 32, %v2913_v12  ;;  %v1257_v18 = vadd.s32 %v2877_v60, %v2883_v45 }
 0x290   : > { %v1988_v48 = vadd.s32 4294967294, %v1269_v23  ;;  %v1052_v50 = vsel %vm1050_vm5, %v1051_v40, %v2920_v37  ;;  %v963_v4 = vshrl.u32 %v945_v24, %v961_v27  ;;  %v1153_v17 = vadd.s32 %v2798_v43, %v2795_v21 }
 0x291   : > { %v1053_v39 = vadd.s32 %v1052_v50, %v1048_v35  ;;  %v1175_v3 = vshll.u32 %v1174_v62, 23  ;;  %v962_v23 = vshll.u32 %v2873_v42, %v960_v54  ;;  %v968_v26 = vor.u32 4788187, %v967_v32 }
 0x292   : > { %vm1989_vm4 = vcmp.lt.s32.totalorder %v1988_v48, 0  ;;  %v1171_v8 = vshrl.u32 %v1153_v17, %v1169_v22  ;;  %v1170_v60 = vshll.u32 %v2849_v44, %v2913_v12  ;;  %vm891_vm7 = vcmp.lt.s32.totalorder %v2731_v55, 0 }
 0x293   : > { %v1272_v56 = vsel %vm1989_vm4, 0, %v1988_v48  ;;  %v1054_v53 = vadd.s32 536870912, %v1053_v39  ;;  %v964_v51 = vor.u32 %v963_v4, %v962_v23  ;;  %v1176_v45 = vor.u32 4788187, %v1175_v3 }
 0x294   : > { %v1277_v29 = vsub.s32 4294967266, %v1272_v56  ;;  %v1273_v6 = vsub.s32 32, %v1272_v56  ;;  %v1274_v10 = vshll.u32 %v2908_v31, %v1272_v56  ;;  %v969_v59 = vand.u32 2147483647, %v968_v26 }
 0x295   : > { %v2940_v57 = vshrl.u32 %v1054_v53, 30  ;;  %v1172_v48 = vor.u32 %v1171_v8, %v1170_v60  ;;  %v971_v42 = vcvt.s32.f32 %v964_v51  ;;  %v1177_v37 = vand.u32 2147483647, %v1176_v45 }
 0x296   : > { %v1278_v38 = vadd.s32 127, %v1277_v29  ;;  %v1275_v13 = vshrl.u32 %v1257_v18, %v1273_v6  ;;  %v1049_v62 = vadd.s32 %v2919_v11, %v2924_v41  ;;  %vm2953_vm8 = vcmp.le.f32.partialorder %v889_v1, 0.7853982 }
 0x297   : > { %v1056_v36 = vshll.u32 %v2940_v57, 30  ;;  %v972_v33 = vmul.f32 %v971_v42, %v969_v59  ;;  %v1179_v28 = vcvt.s32.f32 %v1172_v48  ;;  %vm1203_vm9 = vcmp.lt.s32.totalorder %v2735_v61, 0 }
 0x298   : > { %v1279_v20 = vshll.u32 %v1278_v38, 23  ;;  %v1276_v21 = vor.u32 %v1275_v13, %v1274_v10  ;;  %vm1099_vm10 = vcmp.lt.s32.totalorder %v2729_v49, 0  ;;  %vm2968_vm11 = vcmp.le.f32.partialorder %v1201_v14, 0.7853982 }
 0x299   : > { %v1057_v43 = vsub.s32 %v1053_v39, %v1056_v36  ;;  %v1180_v29 = vmul.f32 %v1179_v28, %v1177_v37  ;;  %v973_v40 = vxor.u32 2147483648, %v972_v33  ;;  %vm2977_vm12 = vcmp.le.f32.partialorder %v1097_v30, 0.7853982 }
 0x29a   : > { %v1280_v34 = vor.u32 4788187, %v1279_v20  ;;  %v1283_v58 = vcvt.s32.f32 %v1276_v21  ;;  %v975_v23 = vsub.s32 4, %v2861_v25  ;;  %v1183_v26 = vsub.s32 4, %v2835_v47 }
 0x29b   : > { %v1059_v52 = vsub.s32 0, %v1057_v43  ;;  %v1181_v44 = vxor.u32 2147483648, %v1180_v29  ;;  %v974_v35 = vsel %vm891_vm7, %v973_v40, %v972_v33  ;;  %v1287_v13 = vsub.s32 4, %v2897_v46 }
 0x29c   : > { %v1281_v54 = vand.u32 2147483647, %v1280_v34  ;;  %v977_v11 = vsel %vm2953_vm8, %v2731_v55, %v974_v35  ;;  %v976_v10 = vsel %vm891_vm7, %v975_v23, %v2861_v25  ;;  %v1079_v34 = vsub.s32 4, %v2940_v57 }
 0x29d   : > { %v1979_v63 = vmin.u32 %v1059_v52, %v1057_v43  ;;  %v1182_v1 = vsel %vm1099_vm10, %v1181_v44, %v1180_v29  ;;  %2188 = vcosq.f32 %v977_v11  ;;  %v1184_v36 = vsel %vm1099_vm10, %v1183_v26, %v2835_v47 }
 0x29e   : > { %v1284_v31 = vmul.f32 %v1283_v58, %v1281_v54  ;;  %v1185_v14 = vsel %vm2977_vm12, %v2729_v49, %v1182_v1  ;;  %2190 = vsinq.f32 %v977_v11  ;;  %v1288_v60 = vsel %vm1203_vm9, %v1287_v13, %v2897_v46 }
 0x29f   : > { %v1061_v56 = vclz %v1979_v63  ;;  %vm2999_vm13 = vcmp.le.f32.partialorder %v993_v19, 0.7853982  ;;  %vm995_vm15 = vcmp.lt.s32.totalorder %v2745_v15, 0  ;;  %v978_v25 = vsel %vm2953_vm8, 0, %v976_v10 }
 0x2a0   : > { %v1285_v38 = vxor.u32 2147483648, %v1284_v31  ;;  %v1186_v47 = vsel %vm2977_vm12, 0, %v1184_v36  ;;  %v1290_v46 = vsel %vm2968_vm11, 0, %v1288_v60  ;;  %v982_v42 = vadd.s32 3, %v978_v25 }
 0x2a1   : > { %v1980_v27 = vadd.s32 4294967294, %v1061_v56  ;;  %v1190_v37 = vadd.s32 3, %v1186_v47  ;;  %vm981_vm10 = vweird.f32 %v2731_v55  ;;  %v2171_v55 = vld [vmem:[%s3344_s3 + $0x18] sm:$0xff]  }
 0x2a2   : > { %v1286_v6 = vsel %vm1203_vm9, %v1285_v38, %v1284_v31  ;;  %v983_v28 = vand.u32 3, %v982_v42 }
 0x2a3   : > { %vm1981_vm6 = vcmp.lt.s32.totalorder %v1980_v27, 0  ;;  %v1289_v53 = vsel %vm2968_vm11, %v2735_v61, %v1286_v6  ;;  %v1191_v29 = vand.u32 3, %v1190_v37 }
 0x2a4   : > { %v1064_v12 = vsel %vm1981_vm6, 0, %v1980_v27  ;;  %2192 = vcosq.f32 %v1289_v53  ;;  %vm985_vm0 = vcmp.eq.s32.totalorder %v983_v28, 0  ;;  %vm988_vm1 = vcmp.eq.s32.totalorder %v983_v28, 2 }
 0x2a5   : > { %v1065_v50 = vsub.s32 32, %v1064_v12  ;;  %v1069_v24 = vsub.s32 4294967266, %v1064_v12  ;;  %v1066_v39 = vshll.u32 %v1057_v43, %v1064_v12  ;;  %2194 = vsinq.f32 %v1289_v53 }
 0x2a6   : > { %2196 = vsinq.f32 %v1185_v14  ;;  %v1080_v43 = vsel %vm995_vm15, %v1079_v34, %v2940_v57  ;;  %v1294_v57 = vadd.s32 3, %v1290_v46  ;;  %vm1193_vm2 = vcmp.eq.s32.totalorder %v1191_v29, 0  ;;  %v1325_v34 = vpop.permute.xlu1 %1324 }
 0x2a7   : > { %v1067_v22 = vshrl.u32 %v1049_v62, %v1065_v50  ;;  %v1070_v4 = vadd.s32 127, %v1069_v24  ;;  %2198 = vcosq.f32 %v1185_v14  ;;  %v2189_v48 = vpop.eup %2188  ;;  %v1082_v52 = vsel %vm2999_vm13, 0, %v1080_v43 }
 0x2a8   : > { %v2191_v54 = vpop.eup %2190  ;;  %v1086_v31 = vadd.s32 3, %v1082_v52  ;;  %v1295_v40 = vand.u32 3, %v1294_v57  ;;  %v989_v38 = vxor.u32 2147483648, %v2189_v48  ;;  %vm984_vm5 = vcmp.lt.s32.totalorder %v983_v28, 2 }
 0x2a9   : > { %v1068_v18 = vor.u32 %v1067_v22, %v1066_v39  ;;  %v1071_v20 = vshll.u32 %v1070_v4, 23  ;;  %v986_v27 = vxor.u32 2147483648, %v2191_v54  ;;  %vm1196_vm6 = vcmp.eq.s32.totalorder %v1191_v29, 2 }
 0x2aa   : > { %v1087_v62 = vand.u32 3, %v1086_v31  ;;  %vm1297_vm3 = vcmp.eq.s32.totalorder %v1295_v40, 0  ;;  %vm1300_vm4 = vcmp.eq.s32.totalorder %v1295_v40, 2  ;;  %v990_v6 = vsel %vm988_vm1, %v989_v38, %v2191_v54  ;;  %v1335_v59 = vpop.permute.xlu1 %1334 }
 0x2ab   : > { %v1072_v3 = vor.u32 4788187, %v1071_v20  ;;  %v1075_v51 = vcvt.s32.f32 %v1068_v18  ;;  %v987_v32 = vsel %vm985_vm0, %v2189_v48, %v986_v27  ;;  %vm1296_vm8 = vcmp.lt.s32.totalorder %v1295_v40, 2 }
 0x2ac   : > { %vm1092_vm7 = vcmp.eq.s32.totalorder %v1087_v62, 2  ;;  %v991_v20 = vsel %vm984_vm5, %v987_v32, %v990_v6  ;;  %vm1089_vm9 = vcmp.eq.s32.totalorder %v1087_v62, 0  ;;  %vm1088_vm11 = vcmp.lt.s32.totalorder %v1087_v62, 2 }
 0x2ad   : > { %v1073_v8 = vand.u32 2147483647, %v1072_v3  ;;  %vm1192_vm12 = vcmp.lt.s32.totalorder %v1191_v29, 2  ;;  %v992_v26 = vsel %vm981_vm10, nan, %v991_v20  ;;  %vm1189_vm0 = vweird.f32 %v2729_v49 }
 0x2ae   : > { %v2193_v33 = vpop.eup %2192 }
 0x2af   : > { %v1076_v30 = vmul.f32 %v1075_v51, %v1073_v8  ;;  %v2195_v58 = vpop.eup %2194  ;;  %v1301_v12 = vxor.u32 2147483648, %v2193_v33 }
 0x2b0   : > { %v2197_v63 = vpop.eup %2196  ;;  %v1298_v44 = vxor.u32 2147483648, %v2195_v58 }
 0x2b1   : > { %v1077_v45 = vxor.u32 2147483648, %v1076_v30  ;;  %v2199_v56 = vpop.eup %2198  ;;  %v1194_v35 = vxor.u32 2147483648, %v2197_v63  ;;  %v1302_v22 = vsel %vm1300_vm4, %v1301_v12, %v2195_v58 }
 0x2b2   : > { %v1197_v50 = vxor.u32 2147483648, %v2199_v56  ;;  %v1299_v39 = vsel %vm1297_vm3, %v2193_v33, %v1298_v44 }
 0x2b3   : > { %v1078_v21 = vsel %vm995_vm15, %v1077_v45, %v1076_v30  ;;  %v1195_v1 = vsel %vm1193_vm2, %v2199_v56, %v1194_v35  ;;  %v1303_v17 = vsel %vm1296_vm8, %v1299_v39, %v1302_v22  ;;  %vm1293_vm15 = vweird.f32 %v2735_v61 }
 0x2b4   : > { %v1081_v19 = vsel %vm2999_vm13, %v2745_v15, %v1078_v21  ;;  %v1198_v18 = vsel %vm1196_vm6, %v1197_v50, %v2197_v63  ;;  %vm1085_vm13 = vweird.f32 %v2745_v15  ;;  %v1304_v8 = vsel %vm1293_vm15, nan, %v1303_v17  ;;  %v1320_v15 = vpop.permute.xlu0 %1319 }
 0x2b5   : > { %2200 = vcosq.f32 %v1081_v19  ;;  %v1199_v14 = vsel %vm1192_vm12, %v1195_v1, %v1198_v18  ;;  %v2292_v61 = vmov 0.0  }
 0x2b6   : > { %2202 = vsinq.f32 %v1081_v19  ;;  %v1200_v30 = vsel %vm1189_vm0, nan, %v1199_v14  ;;  %2059 = vmatprep.subr.bf16.mxu1 %v2292_v61 }
 0x2b7   : > { %v1311_v10 = vpack.c.bf16 %v1304_v8, %v1200_v30 }
 0x2b8   : > { %v1330_v36 = vpop.permute.xlu0 %1329 }
 0x2bf   : > { %v2201_v24 = vpop.eup %2200 }
 0x2c0   : > { %v2203_v4 = vpop.eup %2202  ;;  %v1093_v11 = vxor.u32 2147483648, %v2201_v24 }
 0x2c1   : > { %v1090_v41 = vxor.u32 2147483648, %v2203_v4 }
 0x2c2   : > { %v1094_v53 = vsel %vm1092_vm7, %v1093_v11, %v2203_v4 }
 0x2c3   : > { %v1091_v3 = vsel %vm1089_vm9, %v2201_v24, %v1090_v41 }
 0x2c4   : > { %v1095_v23 = vsel %vm1088_vm11, %v1091_v3, %v1094_v53 }
 0x2c5   : > { %v1096_v13 = vsel %vm1085_vm13, nan, %v1095_v23 }
 0x2c6   : > { %v1310_v51 = vpack.c.bf16 %v1096_v13, %v992_v26 }
 0x2c8   : > { %2051 = vmatprep.subr.bf16.mxu0 %v1310_v51 }
 0x2c9   : > { %2052 = vmatpush3.bf16.msra.mxu0 %v1310_v51 }
 0x2ca   : > { %2053 = vmatprep.subr.bf16.mxu0 %v1311_v10 }
 0x2cd   : > { %2054 = vmatpush3.bf16.msra.mxu0 %v1311_v10 }
 0x2d0   : > { %2056 = vmatmul.mubr.msk.bf16.vlgmr.msra.gmra.mrb[4].mxu0 %vm833_vm14, %v2171_v55 }
 0x3a3   : > { %v2057_v60 = vpop.f32.mrb[4].mxu0 }
 0x3a4   : > { %v3025_v49 = vadd.f32 %v2057_v60, %v1330_v36  ;;  %v1387_v45 = vpop.f32.mrb[5].mxu0 }
 0x3a5   : > { %v3027_v25 = vadd.f32 %v1387_v45, %v1320_v15  ;;  %v2058_v21 = vpop.f32.mrb[6].mxu0 }
 0x3a6   : > { %v1610_v43 = vand.u32 2147483647, %v3025_v49  ;;  %v1613_v47 = vand.u32 2139095040, %v3025_v49  ;;  %v3031_v46 = vadd.f32 %v2058_v21, %v1335_v59  ;;  %v1390_v19 = vpop.f32.mrb[7].mxu0 }
 0x3a7   : > { %v1402_v48 = vand.u32 2147483647, %v3027_v25  ;;  %v1405_v42 = vand.u32 2139095040, %v3027_v25  ;;  %v3046_v32 = vadd.f32 %v1390_v19, %v1325_v34 }
 0x3a8   : > { %v1614_v54 = vshrl.u32 %v1613_v47, 23  ;;  %v1617_v52 = vand.u32 8388607, %v1610_v43  ;;  %v1717_v33 = vand.u32 2139095040, %v3031_v46 }
 0x3a9   : > { %v1406_v37 = vshrl.u32 %v1405_v42, 23  ;;  %v1409_v57 = vand.u32 8388607, %v1402_v48 }
 0x3aa   : > { %v2010_v58 = vadd.s32 4294967169, %v1614_v54  ;;  %v1718_v28 = vshrl.u32 %v1717_v33, 23  ;;  %v1618_v56 = vor.u32 8388608, %v1617_v52 }
 0x3ab   : > { %v2002_v63 = vadd.s32 4294967169, %v1406_v37  ;;  %v1410_v29 = vor.u32 8388608, %v1409_v57 }
 0x3ac   : > { %v1620_v31 = vadd.s32 1, %v2010_v58  ;;  %v2014_v27 = vadd.s32 4294967169, %v1718_v28  ;;  %v3040_v62 = vshll.u32 %v1618_v56, 8 }
 0x3ad   : > { %v1412_v40 = vadd.s32 1, %v2002_v63  ;;  %v3042_v50 = vshll.u32 %v1410_v29, 8 }
 0x3ae   : > { %vm1621_vm1 = vcmp.gt.s32.totalorder %v1620_v31, 0  ;;  %v3044_v24 = vadd.s32 1, %v2014_v27 }
 0x3af   : > { %v1622_v38 = vsel %vm1621_vm1, %v1620_v31, 0  ;;  %vm1413_vm2 = vcmp.gt.s32.totalorder %v1412_v40, 0 }
 0x3b0   : > { %v1623_v44 = vshrl.u32 %v1622_v38, 5  ;;  %v1624_v12 = vand.u32 31, %v1622_v38  ;;  %v1414_v35 = vsel %vm1413_vm2, %v1412_v40, 0  ;;  %vm1725_vm7 = vcmp.gt.s32.totalorder %v3044_v24, 0 }
 0x3b1   : > { %v3049_v22 = vshrl.u32 %v1414_v35, 5  ;;  %v1416_v4 = vand.u32 31, %v1414_v35 }
 0x3b2   : > { %v1625_v6 = vsub.s32 32, %v1624_v12  ;;  %v1627_v39 = vshll.u32 %v2286_v0, %v1624_v12  ;;  %v1630_v11 = vshll.u32 %v2287_v2, %v1624_v12  ;;  %v1633_v1 = vshll.u32 %v2288_v5, %v1624_v12 }
 0x3b3   : > { %v1636_v41 = vshll.u32 %v2289_v7, %v1624_v12  ;;  %v1639_v18 = vshll.u32 %v2290_v9, %v1624_v12  ;;  %vm1642_vm3 = vcmp.lt.s32.totalorder %v1623_v44, 1  ;;  %vm1643_vm4 = vcmp.lt.s32.totalorder %v1623_v44, 2 }
 0x3b4   : > { %v1628_v20 = vshrl.u32 %v2287_v2, %v1625_v6  ;;  %v1631_v53 = vshrl.u32 %v2288_v5, %v1625_v6  ;;  %v1634_v17 = vshrl.u32 %v2289_v7, %v1625_v6  ;;  %v1626_v3 = vshrl.u32 %v2286_v0, %v1625_v6 }
 0x3b5   : > { %v1637_v23 = vshrl.u32 %v2290_v9, %v1625_v6  ;;  %v1640_v14 = vshrl.u32 %v2291_v16, %v1625_v6  ;;  %v1417_v51 = vsub.s32 32, %v1416_v4  ;;  %vm1644_vm5 = vcmp.lt.s32.totalorder %v1623_v44, 3 }
 0x3b6   : > { %v1629_v26 = vor.u32 %v1628_v20, %v1627_v39  ;;  %v1632_v13 = vor.u32 %v1631_v53, %v1630_v11  ;;  %v1635_v8 = vor.u32 %v1634_v17, %v1633_v1  ;;  %vm1645_vm6 = vcmp.lt.s32.totalorder %v1623_v44, 4 }
 0x3b7   : > { %v1638_v30 = vor.u32 %v1637_v23, %v1636_v41  ;;  %v1641_v10 = vor.u32 %v1640_v14, %v1639_v18  ;;  %v1419_v21 = vshll.u32 %v2286_v0, %v1416_v4  ;;  %v1420_v42 = vshrl.u32 %v2287_v2, %v1417_v51 }
 0x3b8   : > { %v1646_v55 = vsel %vm1642_vm3, %v1626_v3, %v1629_v26  ;;  %v1647_v15 = vsel %vm1645_vm6, %v1635_v8, 2102212464  ;;  %v1650_v34 = vsel %vm1642_vm3, %v1629_v26, %v1632_v13  ;;  %v1654_v36 = vsel %vm1642_vm3, %v1632_v13, %v1635_v8 }
 0x3b9   : > { %v1648_v60 = vsel %vm1644_vm5, %v1632_v13, %v1647_v15  ;;  %v1651_v45 = vsel %vm1645_vm6, %v1638_v30, 920167782  ;;  %v1655_v59 = vsel %vm1645_vm6, %v1641_v10, 1326507024  ;;  %v1422_v54 = vshll.u32 %v2287_v2, %v1416_v4 }
 0x3ba   : > { %v1652_v47 = vsel %vm1644_vm5, %v1635_v8, %v1651_v45  ;;  %v1656_v19 = vsel %vm1644_vm5, %v1638_v30, %v1655_v59  ;;  %v1649_v52 = vsel %vm1643_vm4, %v1646_v55, %v1648_v60  ;;  %v1423_v33 = vshrl.u32 %v2288_v5, %v1417_v51 }
 0x3bb   : > { %v1653_v37 = vsel %vm1643_vm4, %v1650_v34, %v1652_v47  ;;  %v1657_v57 = vsel %vm1643_vm4, %v1654_v36, %v1656_v19  ;;  %v1421_v56 = vor.u32 %v1420_v42, %v1419_v21  ;;  %v1425_v40 = vshll.u32 %v2288_v5, %v1416_v4 }
 0x3bc   : > { %v3073_v58 = vmul.u32.u64.low %v3040_v62, %v1657_v57  ;;  %v3074_v63 = vmul.u32.u64.high %v3040_v62, %v1657_v57, %v3073_v58  ;;  %v3077_v28 = vmul.u32.u64.low %v3040_v62, %v1653_v37  ;;  %v3078_v31 = vmul.u32.u64.high %v3040_v62, %v1653_v37, %v3077_v28 }
 0x3bd   : > { %v1424_v29 = vor.u32 %v1423_v33, %v1422_v54  ;;  %v1426_v27 = vshrl.u32 %v2289_v7, %v1417_v51  ;;  %v1418_v38 = vshrl.u32 %v2286_v0, %v1417_v51  ;;  %v1428_v44 = vshll.u32 %v2289_v7, %v1416_v4 }
 0x3be   : > { %v1429_v12 = vshrl.u32 %v2290_v9, %v1417_v51  ;;  %v1432_v35 = vshrl.u32 %v2291_v16, %v1417_v51  ;;  %v1665_v6 = vmul.u32 %v3040_v62, %v1649_v52  ;;  %v1431_v11 = vshll.u32 %v2290_v9, %v1416_v4 }
 0x3bf   : > { %v1427_v39 = vor.u32 %v1426_v27, %v1425_v40  ;;  %vm1434_vm8 = vcmp.lt.s32.totalorder %v3049_v22, 1  ;;  %vm1667_vm9 = vc.u32 %v3074_v63, %v3077_v28  ;;  %v1668_v1 = vadd.s32 1, %v3078_v31 }
 0x3c0   : > { %v1430_v41 = vor.u32 %v1429_v12, %v1428_v44  ;;  %vm1435_vm10 = vcmp.lt.s32.totalorder %v3049_v22, 2  ;;  %v1433_v18 = vor.u32 %v1432_v35, %v1431_v11  ;;  %vm1436_vm11 = vcmp.lt.s32.totalorder %v3049_v22, 3 }
 0x3c1   : > { %vm1437_vm12 = vcmp.lt.s32.totalorder %v3049_v22, 4  ;;  %v1442_v20 = vsel %vm1434_vm8, %v1421_v56, %v1424_v29  ;;  %v1669_v62 = vsel %vm1667_vm9, %v1668_v1, %v3078_v31  ;;  %v1446_v17 = vsel %vm1434_vm8, %v1424_v29, %v1427_v39 }
 0x3c2   : > { %v1439_v53 = vsel %vm1437_vm12, %v1427_v39, 2102212464  ;;  %v1443_v4 = vsel %vm1437_vm12, %v1430_v41, 920167782  ;;  %v1670_v3 = vadd.s32 %v1669_v62, %v1665_v6  ;;  %v1438_v23 = vsel %vm1434_vm8, %v1418_v38, %v1421_v56 }
 0x3c3   : > { %v1444_v14 = vsel %vm1436_vm11, %v1427_v39, %v1443_v4  ;;  %v1447_v26 = vsel %vm1437_vm12, %v1433_v18, 1326507024  ;;  %v1440_v13 = vsel %vm1436_vm11, %v1424_v29, %v1439_v53  ;;  %v1726_v30 = vsel %vm1725_vm7, %v3044_v24, 0 }
 0x3c4   : > { %v1445_v8 = vsel %vm1435_vm10, %v1442_v20, %v1444_v14  ;;  %v1448_v51 = vsel %vm1436_vm11, %v1430_v41, %v1447_v26  ;;  %v1671_v34 = vadd.s32 536870912, %v1670_v3  ;;  %v1441_v45 = vsel %vm1435_vm10, %v1438_v23, %v1440_v13 }
 0x3c5   : > { %v1449_v10 = vsel %vm1435_vm10, %v1446_v17, %v1448_v51  ;;  %v3105_v55 = vmul.u32.u64.low %v3042_v50, %v1445_v8  ;;  %v3106_v15 = vmul.u32.u64.high %v3042_v50, %v1445_v8, %v3105_v55  ;;  %v1714_v59 = vand.u32 2147483647, %v3031_v46 }
 0x3c6   : > { %v3110_v36 = vmul.u32.u64.low %v3042_v50, %v1449_v10  ;;  %v3111_v60 = vmul.u32.u64.high %v3042_v50, %v1449_v10, %v3110_v36  ;;  %v1728_v21 = vand.u32 31, %v1726_v30  ;;  %v1509_v24 = vand.u32 2139095040, %v3046_v32 }
 0x3c7   : > { %v1460_v47 = vadd.s32 1, %v3106_v15  ;;  %v3118_v42 = vshrl.u32 %v1671_v34, 30  ;;  %v1457_v54 = vmul.u32 %v3042_v50, %v1441_v45  ;;  %v1721_v22 = vand.u32 8388607, %v1714_v59 }
 0x3c8   : > { %v1729_v19 = vsub.s32 32, %v1728_v21  ;;  %vm1459_vm13 = vc.u32 %v3111_v60, %v3105_v55  ;;  %v1510_v37 = vshrl.u32 %v1509_v24, 23  ;;  %v1731_v33 = vshll.u32 %v2286_v0, %v1728_v21 }
 0x3c9   : > { %v1461_v52 = vsel %vm1459_vm13, %v1460_v47, %v3106_v15  ;;  %v1727_v56 = vshrl.u32 %v1726_v30, 5  ;;  %v1734_v29 = vshll.u32 %v2287_v2, %v1728_v21  ;;  %v1737_v50 = vshll.u32 %v2288_v5, %v1728_v21 }
 0x3ca   : > { %v1462_v57 = vadd.s32 %v1461_v52, %v1457_v54  ;;  %v1732_v58 = vshrl.u32 %v2287_v2, %v1729_v19  ;;  %v1735_v31 = vshrl.u32 %v2288_v5, %v1729_v19  ;;  %v1738_v40 = vshrl.u32 %v2289_v7, %v1729_v19 }
 0x3cb   : > { %v1673_v27 = vshll.u32 %v3118_v42, 30  ;;  %v1740_v6 = vshll.u32 %v2289_v7, %v1728_v21  ;;  %v1741_v39 = vshrl.u32 %v2290_v9, %v1729_v19  ;;  %v1743_v1 = vshll.u32 %v2290_v9, %v1728_v21 }
 0x3cc   : > { %v1463_v38 = vadd.s32 536870912, %v1462_v57  ;;  %v1733_v44 = vor.u32 %v1732_v58, %v1731_v33  ;;  %v1736_v12 = vor.u32 %v1735_v31, %v1734_v29  ;;  %v1739_v35 = vor.u32 %v1738_v40, %v1737_v50 }
 0x3cd   : > { %v1744_v41 = vshrl.u32 %v2291_v16, %v1729_v19  ;;  %v2006_v18 = vadd.s32 4294967169, %v1510_v37  ;;  %v1722_v20 = vor.u32 8388608, %v1721_v22  ;;  %v1742_v62 = vor.u32 %v1741_v39, %v1740_v6 }
 0x3ce   : > { %v3135_v11 = vshrl.u32 %v1463_v38, 30  ;;  %vm1746_vm15 = vcmp.lt.s32.totalorder %v1727_v56, 1  ;;  %vm1748_vm0 = vcmp.lt.s32.totalorder %v1727_v56, 3  ;;  %vm1749_vm1 = vcmp.lt.s32.totalorder %v1727_v56, 4 }
 0x3cf   : > { %v1745_v4 = vor.u32 %v1744_v41, %v1743_v1  ;;  %v3140_v17 = vsub.s32 %v1670_v3, %v1673_v27  ;;  %v1754_v23 = vsel %vm1746_vm15, %v1733_v44, %v1736_v12  ;;  %v1755_v14 = vsel %vm1749_vm1, %v1742_v62, 920167782 }
 0x3d0   : > { %v1465_v53 = vshll.u32 %v3135_v11, 30  ;;  %v1758_v26 = vsel %vm1746_vm15, %v1736_v12, %v1739_v35  ;;  %v1756_v13 = vsel %vm1748_vm0, %v1739_v35, %v1755_v14  ;;  %v1516_v51 = vadd.s32 1, %v2006_v18 }
 0x3d1   : > { %v1759_v8 = vsel %vm1749_vm1, %v1745_v4, 1326507024  ;;  %v1730_v30 = vshrl.u32 %v2286_v0, %v1729_v19  ;;  %vm1747_vm2 = vcmp.lt.s32.totalorder %v1727_v56, 2  ;;  %v1751_v10 = vsel %vm1749_vm1, %v1739_v35, 2102212464 }
 0x3d2   : > { %v1760_v15 = vsel %vm1748_vm0, %v1742_v62, %v1759_v8  ;;  %v3147_v34 = vsub.s32 %v1462_v57, %v1465_v53  ;;  %v1757_v3 = vsel %vm1747_vm2, %v1754_v23, %v1756_v13  ;;  %v1762_v45 = vshll.u32 %v1722_v20, 8 }
 0x3d3   : > { %v1761_v36 = vsel %vm1747_vm2, %v1758_v26, %v1760_v15  ;;  %v1676_v21 = vsub.s32 0, %v3140_v17  ;;  %v1750_v24 = vsel %vm1746_vm15, %v1730_v30, %v1733_v44  ;;  %v1752_v47 = vsel %vm1748_vm0, %v1736_v12, %v1751_v10 }
 0x3d4   : > { %v3154_v54 = vmul.u32.u64.low %v1762_v45, %v1761_v36  ;;  %v3155_v52 = vmul.u32.u64.high %v1762_v45, %v1761_v36, %v3154_v54  ;;  %vm1517_vm3 = vcmp.gt.s32.totalorder %v1516_v51, 0  ;;  %v1468_v37 = vsub.s32 0, %v3147_v34 }
 0x3d5   : > { %v3157_v19 = vmul.u32.u64.low %v1762_v45, %v1757_v3  ;;  %v3158_v22 = vmul.u32.u64.high %v1762_v45, %v1757_v3, %v3157_v19  ;;  %v1518_v57 = vsel %vm1517_vm3, %v1516_v51, 0  ;;  %v1753_v33 = vsel %vm1747_vm2, %v1750_v24, %v1752_v47 }
 0x3d6   : > { %v1520_v58 = vand.u32 31, %v1518_v57  ;;  %v2011_v31 = vmin.u32 %v1676_v21, %v3140_v17  ;;  %v2003_v50 = vmin.u32 %v1468_v37, %v3147_v34  ;;  %v1769_v40 = vmul.u32 %v1762_v45, %v1753_v33 }
 0x3d7   : > { %vm1771_vm4 = vc.u32 %v3155_v52, %v3157_v19  ;;  %v1772_v29 = vadd.s32 1, %v3158_v22  ;;  %v1506_v38 = vand.u32 2147483647, %v3046_v32  ;;  %v1519_v51 = vshrl.u32 %v1518_v57, 5 }
 0x3d8   : > { %v1521_v44 = vsub.s32 32, %v1520_v58  ;;  %v1678_v12 = vclz %v2011_v31  ;;  %v1470_v56 = vclz %v2003_v50  ;;  %v1523_v4 = vshll.u32 %v2286_v0, %v1520_v58 }
 0x3d9   : > { %v1773_v27 = vsel %vm1771_vm4, %v1772_v29, %v3158_v22  ;;  %v1513_v39 = vand.u32 8388607, %v1506_v38  ;;  %v1526_v23 = vshll.u32 %v2287_v2, %v1520_v58  ;;  %v1532_v14 = vshll.u32 %v2289_v7, %v1520_v58 }
 0x3da   : > { %v1774_v35 = vadd.s32 %v1773_v27, %v1769_v40  ;;  %v1524_v1 = vshrl.u32 %v2287_v2, %v1521_v44  ;;  %v1527_v41 = vshrl.u32 %v2288_v5, %v1521_v44  ;;  %v2012_v18 = vadd.s32 4294967294, %v1678_v12 }
 0x3db   : > { %v1530_v62 = vshrl.u32 %v2289_v7, %v1521_v44  ;;  %v1533_v53 = vshrl.u32 %v2290_v9, %v1521_v44  ;;  %v1536_v26 = vshrl.u32 %v2291_v16, %v1521_v44  ;;  %v2004_v13 = vadd.s32 4294967294, %v1470_v56 }
 0x3dc   : > { %v1775_v6 = vadd.s32 536870912, %v1774_v35  ;;  %v1529_v30 = vshll.u32 %v2288_v5, %v1520_v58  ;;  %v1525_v10 = vor.u32 %v1524_v1, %v1523_v4  ;;  %v1528_v15 = vor.u32 %v1527_v41, %v1526_v23 }
 0x3dd   : > { %v1534_v3 = vor.u32 %v1533_v53, %v1532_v14  ;;  %v1535_v36 = vshll.u32 %v2290_v9, %v1520_v58  ;;  %vm2013_vm5 = vcmp.lt.s32.totalorder %v2012_v18, 0  ;;  %v1514_v2 = vor.u32 8388608, %v1513_v39 }
 0x3de   : > { %v3174_v20 = vshrl.u32 %v1775_v6, 30  ;;  %v1531_v21 = vor.u32 %v1530_v62, %v1529_v30  ;;  %vm2005_vm6 = vcmp.lt.s32.totalorder %v2004_v13, 0  ;;  %vm1538_vm7 = vcmp.lt.s32.totalorder %v1519_v51, 1 }
 0x3df   : > { %v1537_v24 = vor.u32 %v1536_v26, %v1535_v36  ;;  %vm1541_vm8 = vcmp.lt.s32.totalorder %v1519_v51, 4  ;;  %v1522_v16 = vshrl.u32 %v2286_v0, %v1521_v44  ;;  %vm1540_vm9 = vcmp.lt.s32.totalorder %v1519_v51, 3 }
 0x3e0   : > { %v1777_v8 = vshll.u32 %v3174_v20, 30  ;;  %v1546_v5 = vsel %vm1538_vm7, %v1525_v10, %v1528_v15  ;;  %v1547_v47 = vsel %vm1541_vm8, %v1534_v3, 920167782  ;;  %vm1539_vm10 = vcmp.lt.s32.totalorder %v1519_v51, 2 }
 0x3e1   : > { %v1543_v9 = vsel %vm1541_vm8, %v1531_v21, 2102212464  ;;  %v1548_v22 = vsel %vm1540_vm9, %v1531_v21, %v1547_v47  ;;  %v1550_v57 = vsel %vm1538_vm7, %v1528_v15, %v1531_v21  ;;  %v1551_v33 = vsel %vm1541_vm8, %v1537_v24, 1326507024 }
 0x3e2   : > { %v3185_v45 = vsub.s32 %v1774_v35, %v1777_v8  ;;  %v1549_v37 = vsel %vm1539_vm10, %v1546_v5, %v1548_v22  ;;  %v1554_v58 = vshll.u32 %v1514_v2, 8  ;;  %v1473_v31 = vsel %vm2005_vm6, 0, %v2004_v13 }
 0x3e3   : > { %v1542_v0 = vsel %vm1538_vm7, %v1522_v16, %v1525_v10  ;;  %v1552_v50 = vsel %vm1540_vm9, %v1534_v3, %v1551_v33  ;;  %v1544_v40 = vsel %vm1540_vm9, %v1528_v15, %v1543_v9  ;;  %v1681_v39 = vsel %vm2013_vm5, 0, %v2012_v18 }
 0x3e4   : > { %v1780_v7 = vsub.s32 0, %v3185_v45  ;;  %v1553_v27 = vsel %vm1539_vm10, %v1550_v57, %v1552_v50  ;;  %v3196_v44 = vmul.u32.u64.low %v1554_v58, %v1549_v37  ;;  %v3197_v12 = vmul.u32.u64.high %v1554_v58, %v1549_v37, %v3196_v44 }
 0x3e5   : > { %v3200_v56 = vmul.u32.u64.low %v1554_v58, %v1553_v27  ;;  %v3201_v6 = vmul.u32.u64.high %v1554_v58, %v1553_v27, %v3200_v56  ;;  %v1478_v1 = vsub.s32 4294967266, %v1473_v31  ;;  %v1545_v41 = vsel %vm1539_vm10, %v1542_v0, %v1544_v40 }
 0x3e6   : > { %v2015_v54 = vmin.u32 %v1780_v7, %v3185_v45  ;;  %v1564_v53 = vadd.s32 1, %v3197_v12  ;;  %v1686_v4 = vsub.s32 4294967266, %v1681_v39  ;;  %v1561_v26 = vmul.u32 %v1554_v58, %v1545_v41 }
 0x3e7   : > { %v1479_v14 = vadd.s32 127, %v1478_v1  ;;  %vm1563_vm12 = vc.u32 %v3201_v6, %v3196_v44  ;;  %v1474_v8 = vsub.s32 32, %v1473_v31  ;;  %v1458_v51 = vadd.s32 %v3105_v55, %v3111_v60 }
 0x3e8   : > { %v1782_v29 = vclz %v2015_v54  ;;  %v1565_v13 = vsel %vm1563_vm12, %v1564_v53, %v3197_v12  ;;  %v1687_v18 = vadd.s32 127, %v1686_v4  ;;  %v1682_v21 = vsub.s32 32, %v1681_v39 }
 0x3e9   : > { %v1566_v10 = vadd.s32 %v1565_v13, %v1561_v26  ;;  %v1480_v15 = vshll.u32 %v1479_v14, 23  ;;  %vm2293_vm13 = vmmov 0   ;;  %v1476_v2 = vshrl.u32 %v1458_v51, %v1474_v8 }
 0x3ea   : > { %v2016_v35 = vadd.s32 4294967294, %v1782_v29  ;;  %2063 = vmatprep.mubr.msk.bf16.mxu1 %vm2293_vm13, %v2292_v61  ;;  %v1770_v24 = vadd.s32 %v3157_v19, %v3155_v52  ;;  %v1666_v5 = vadd.s32 %v3077_v28, %v3074_v63  ;;  %v1688_v47 = vshll.u32 %v1687_v18, 23 }
 0x3eb   : > { %v1567_v36 = vadd.s32 536870912, %v1566_v10  ;;  %v1475_v55 = vshll.u32 %v3147_v34, %v1473_v31  ;;  %v1481_v60 = vor.u32 4788187, %v1480_v15  ;;  %v1683_v52 = vshll.u32 %v3140_v17, %v1681_v39 }
 0x3ec   : > { %vm2017_vm11 = vcmp.lt.s32.totalorder %v2016_v35, 0  ;;  %v1684_v22 = vshrl.u32 %v1666_v5, %v1682_v21  ;;  %v1689_v19 = vor.u32 4788187, %v1688_v47  ;;  %v1562_v39 = vadd.s32 %v3196_v44, %v3201_v6 }
 0x3ed   : > { %v1785_v62 = vsel %vm2017_vm11, 0, %v2016_v35  ;;  %v3214_v16 = vshrl.u32 %v1567_v36, 30  ;;  %v1477_v37 = vor.u32 %v1476_v2, %v1475_v55  ;;  %v1482_v29 = vand.u32 2147483647, %v1481_v60 }
 0x3ee   : > { %v1790_v23 = vsub.s32 4294967266, %v1785_v62  ;;  %v1786_v3 = vsub.s32 32, %v1785_v62  ;;  %v1787_v57 = vshll.u32 %v3185_v45, %v1785_v62  ;;  %v1685_v63 = vor.u32 %v1684_v22, %v1683_v52 }
 0x3ef   : > { %v1569_v9 = vshll.u32 %v3214_v16, 30  ;;  %v1484_v28 = vcvt.s32.f32 %v1477_v37  ;;  %v1690_v31 = vand.u32 2147483647, %v1689_v19  ;;  %vm1404_vm0 = vcmp.lt.s32.totalorder %v3027_v25, 0 }
 0x3f0   : > { %v1791_v30 = vadd.s32 127, %v1790_v23  ;;  %v1788_v54 = vshrl.u32 %v1770_v24, %v1786_v3  ;;  %v1692_v56 = vcvt.s32.f32 %v1685_v63  ;;  %vm1716_vm1 = vcmp.lt.s32.totalorder %v3031_v46, 0 }
 0x3f1   : > { %v1570_v58 = vsub.s32 %v1566_v10, %v1569_v9  ;;  %v1485_v27 = vmul.f32 %v1484_v28, %v1482_v29  ;;  %vm3230_vm2 = vcmp.le.f32.partialorder %v1402_v48, 0.7853982  ;;  %vm1612_vm3 = vcmp.lt.s32.totalorder %v3025_v49, 0 }
 0x3f2   : > { %v1792_v7 = vshll.u32 %v1791_v30, 23  ;;  %v1789_v0 = vor.u32 %v1788_v54, %v1787_v57  ;;  %v1693_v45 = vmul.f32 %v1692_v56, %v1690_v31  ;;  %vm3244_vm4 = vcmp.le.f32.partialorder %v1714_v59, 0.7853982 }
 0x3f3   : > { %v1572_v50 = vsub.s32 0, %v1570_v58  ;;  %v1486_v62 = vxor.u32 2147483648, %v1485_v27  ;;  %vm3250_vm5 = vcmp.le.f32.partialorder %v1610_v43, 0.7853982  ;;  %v1488_v21 = vsub.s32 4, %v3135_v11 }
 0x3f4   : > { %v1793_v33 = vor.u32 4788187, %v1792_v7  ;;  %v1796_v12 = vcvt.s32.f32 %v1789_v0  ;;  %v1694_v14 = vxor.u32 2147483648, %v1693_v45  ;;  %v1696_v24 = vsub.s32 4, %v3118_v42 }
 0x3f5   : > { %v2007_v34 = vmin.u32 %v1572_v50, %v1570_v58  ;;  %v1487_v26 = vsel %vm1404_vm0, %v1486_v62, %v1485_v27  ;;  %v1800_v43 = vsub.s32 4, %v3174_v20  ;;  %v1592_v55 = vsub.s32 4, %v3214_v16 }
 0x3f6   : > { %v1794_v40 = vand.u32 2147483647, %v1793_v33  ;;  %v1490_v51 = vsel %vm3230_vm2, %v3027_v25, %v1487_v26  ;;  %v1695_v15 = vsel %vm1612_vm3, %v1694_v14, %v1693_v45  ;;  %v1489_v60 = vsel %vm1404_vm0, %v1488_v21, %v3135_v11 }
 0x3f7   : > { %v1574_v35 = vclz %v2007_v34  ;;  %2204 = vcosq.f32 %v1490_v51  ;;  %v1698_v5 = vsel %vm3250_vm5, %v3025_v49, %v1695_v15  ;;  %v1697_v54 = vsel %vm1612_vm3, %v1696_v24, %v3118_v42 }
 0x3f8   : > { %v1797_v1 = vmul.f32 %v1796_v12, %v1794_v40  ;;  %2206 = vsinq.f32 %v1490_v51  ;;  %v1801_v22 = vsel %vm1716_vm1, %v1800_v43, %v3174_v20  ;;  %vm1508_vm6 = vcmp.lt.s32.totalorder %v3046_v32, 0 }
 0x3f9   : > { %v2008_v41 = vadd.s32 4294967294, %v1574_v35  ;;  %v1491_v37 = vsel %vm3230_vm2, 0, %v1489_v60  ;;  %vm1507_vm7 = vcmp.le.f32.partialorder %v1506_v38, 0.7853982  ;;  %v1593_v57 = vsel %vm1508_vm6, %v1592_v55, %v3214_v16 }
 0x3fa   : > { %v1798_v17 = vxor.u32 2147483648, %v1797_v1  ;;  %v1699_v42 = vsel %vm3250_vm5, 0, %v1697_v54  ;;  %v1495_v20 = vadd.s32 3, %v1491_v37  ;;  %v1595_v52 = vsel %vm1507_vm7, 0, %v1593_v57 }
 0x3fb   : > { %vm2009_vm15 = vcmp.lt.s32.totalorder %v2008_v41, 0  ;;  %v1703_v29 = vadd.s32 3, %v1699_v42  ;;  %v1599_v63 = vadd.s32 3, %v1595_v52  ;;  %vm1598_vm5 = vweird.f32 %v3046_v32 }
 0x3fc   : > { %v1577_v53 = vsel %vm2009_vm15, 0, %v2008_v41  ;;  %v1799_v44 = vsel %vm1716_vm1, %v1798_v17, %v1797_v1  ;;  %v1496_v16 = vand.u32 3, %v1495_v20 }
 0x3fd   : > { %v1578_v4 = vsub.s32 32, %v1577_v53  ;;  %v1582_v23 = vsub.s32 4294967266, %v1577_v53  ;;  %v1579_v13 = vshll.u32 %v1570_v58, %v1577_v53  ;;  %v1802_v2 = vsel %vm3244_vm4, %v3031_v46, %v1799_v44 }
 0x3fe   : > { %2208 = vcosq.f32 %v1802_v2  ;;  %v1803_v58 = vsel %vm3244_vm4, 0, %v1801_v22  ;;  %v1704_v27 = vand.u32 3, %v1703_v29  ;;  %v1600_v56 = vand.u32 3, %v1599_v63 }
 0x3ff   : > { %v1580_v8 = vshrl.u32 %v1562_v39, %v1578_v4  ;;  %v1583_v30 = vadd.s32 127, %v1582_v23  ;;  %2210 = vsinq.f32 %v1802_v2  ;;  %v1807_v50 = vadd.s32 3, %v1803_v58 }
 0x400   : > { %2212 = vsinq.f32 %v1698_v5  ;;  %vm1497_vm8 = vcmp.lt.s32.totalorder %v1496_v16, 2  ;;  %vm1498_vm9 = vcmp.eq.s32.totalorder %v1496_v16, 0  ;;  %vm1501_vm10 = vcmp.eq.s32.totalorder %v1496_v16, 2 }
 0x401   : > { %v1581_v6 = vor.u32 %v1580_v8, %v1579_v13  ;;  %v1584_v18 = vshll.u32 %v1583_v30, 23  ;;  %2214 = vcosq.f32 %v1698_v5  ;;  %v2205_v19 = vpop.eup %2204  ;;  %v1808_v35 = vand.u32 3, %v1807_v50 }
 0x402   : > { %v2207_v0 = vpop.eup %2206  ;;  %v1502_v31 = vxor.u32 2147483648, %v2205_v19  ;;  %vm1706_vm11 = vcmp.eq.s32.totalorder %v1704_v27, 0  ;;  %vm1709_vm12 = vcmp.eq.s32.totalorder %v1704_v27, 2  ;;  %vm1605_vm0 = vcmp.eq.s32.totalorder %v1600_v56, 2 }
 0x403   : > { %v1585_v3 = vor.u32 4788187, %v1584_v18  ;;  %v1588_v7 = vcvt.s32.f32 %v1581_v6  ;;  %v1499_v34 = vxor.u32 2147483648, %v2207_v0  ;;  %vm1810_vm13 = vcmp.eq.s32.totalorder %v1808_v35, 0 }
 0x404   : > { %v1503_v17 = vsel %vm1501_vm10, %v1502_v31, %v2207_v0  ;;  %vm1813_vm15 = vcmp.eq.s32.totalorder %v1808_v35, 2  ;;  %vm1602_vm1 = vcmp.eq.s32.totalorder %v1600_v56, 0  ;;  %vm1601_vm2 = vcmp.lt.s32.totalorder %v1600_v56, 2 }
 0x405   : > { %v1586_v59 = vand.u32 2147483647, %v1585_v3  ;;  %v1500_v53 = vsel %vm1498_vm9, %v2205_v19, %v1499_v34  ;;  %vm1809_vm3 = vcmp.lt.s32.totalorder %v1808_v35, 2  ;;  %vm1494_vm4 = vweird.f32 %v3027_v25 }
 0x406   : > { %v1504_v8 = vsel %vm1497_vm8, %v1500_v53, %v1503_v17  ;;  %vm1702_vm8 = vweird.f32 %v3025_v49 }
 0x407   : > { %v1589_v47 = vmul.f32 %v1588_v7, %v1586_v59  ;;  %v1505_v15 = vsel %vm1494_vm4, nan, %v1504_v8 }
 0x408   : > { %v2209_v38 = vpop.eup %2208 }
 0x409   : > { %v1590_v9 = vxor.u32 2147483648, %v1589_v47  ;;  %v2211_v28 = vpop.eup %2210  ;;  %v1814_v41 = vxor.u32 2147483648, %v2209_v38 }
 0x40a   : > { %v2213_v40 = vpop.eup %2212  ;;  %v1811_v1 = vxor.u32 2147483648, %v2211_v28 }
 0x40b   : > { %v1591_v11 = vsel %vm1508_vm6, %v1590_v9, %v1589_v47  ;;  %v2215_v12 = vpop.eup %2214  ;;  %v1707_v45 = vxor.u32 2147483648, %v2213_v40  ;;  %v1815_v13 = vsel %vm1813_vm15, %v1814_v41, %v2211_v28  ;;  %vm1705_vm6 = vcmp.lt.s32.totalorder %v1704_v27, 2 }
 0x40c   : > { %v1594_v33 = vsel %vm1507_vm7, %v3046_v32, %v1591_v11  ;;  %v1710_v39 = vxor.u32 2147483648, %v2215_v12  ;;  %v1812_v26 = vsel %vm1810_vm13, %v2209_v38, %v1811_v1  ;;  %vm1806_vm7 = vweird.f32 %v3031_v46  ;;  %v1818_v32 = vld [vmem:[%s3346_s5] sm:$0xf]  ;;  %v1825_v46 = vpop.permute.xlu0 %1824 }
 0x40d   : > { %2216 = vcosq.f32 %v1594_v33  ;;  %v1708_v10 = vsel %vm1706_vm11, %v2215_v12, %v1707_v45  ;;  %v1816_v51 = vsel %vm1809_vm3, %v1812_v26, %v1815_v13 }
 0x40e   : > { %2218 = vsinq.f32 %v1594_v33  ;;  %v1711_v6 = vsel %vm1709_vm12, %v1710_v39, %v2213_v40  ;;  %v1817_v21 = vsel %vm1806_vm7, nan, %v1816_v51 }
 0x40f   : > { %v1712_v36 = vsel %vm1705_vm6, %v1708_v10, %v1711_v6 }
 0x410   : > { %v1713_v25 = vsel %vm1702_vm8, nan, %v1712_v36 }
 0x411   : > { %v1820_v2 = vpack.c.bf16 %v1817_v21, %v1713_v25 }
 0x417   : > { %v2217_v62 = vpop.eup %2216 }
 0x418   : > { %v2219_v4 = vpop.eup %2218  ;;  %v1606_v23 = vxor.u32 2147483648, %v2217_v62 }
 0x419   : > { %v1603_v14 = vxor.u32 2147483648, %v2219_v4 }
 0x41a   : > { %v1607_v30 = vsel %vm1605_vm0, %v1606_v23, %v2219_v4 }
 0x41b   : > { %v1604_v44 = vsel %vm1602_vm1, %v2217_v62, %v1603_v14 }
 0x41c   : > { %v1608_v18 = vsel %vm1601_vm2, %v1604_v44, %v1607_v30 }
 0x41d   : > { %v1609_v48 = vsel %vm1598_vm5, nan, %v1608_v18 }
 0x41e   : > { %v1819_v3 = vpack.c.bf16 %v1609_v48, %v1505_v15 }
 0x420   : > { %2060 = vmatpush3.bf16.msra.mxu1 %v1819_v3 }
 0x421   : > { %2061 = vmatprep.subr.bf16.mxu1 %v2292_v61 }
 0x424   : > { %2062 = vmatpush3.bf16.msra.mxu1 %v1820_v2 }
 0x427   : > { %2064 = vmatmul.mubr.msk.bf16.vlgmr.msra.gmra.mrb[4].mxu1 %vm833_vm14, %v1818_v32 }
 0x4fa   : > { %v1864_v24 = vpop.f32.mrb[4].mxu1 }
 0x4fb   : > { %v1865_v49 = vadd.f32 %v1864_v24, %v1825_v46  ;;  %v2065_v59 = vpop.f32.mrb[5].mxu1 }
 0x4fc   : > { %v1867_v61 = vpop.f32.mrb[6].mxu1 }
 0x4fd   : > { %1870 = vst [vmem:[%s269_s19] sm:$0xff] %v1865_v49  ;;  %v2066_v7 = vpop.f32.mrb[7].mxu1 }
 0x4fe   : > { %2233 = shalt.err (!%p2230_p3)
}
 0x4ff   : > { %s2234_s14 = scalar_lea.hbm %s3299_s23, 128  ;;  %s2238_s17 = scalar_lea.hbm %s3348_s7, 384 }
 0x500   : > { %p2235_p4 = scmp.ne.s32.totalorder %s3299_s23, %s2234_s14  ;;  %p2239_p9 = scmp.lt.u32.totalorder %s3299_s23, %s3348_s7 }
 0x501   : > { %p2240_p10 = scmp.lt.u32.totalorder %s2238_s17, %s2234_s14  ;;  %p2242_p12 = scmp.lt.u32.totalorder %s2234_s14, %s3299_s23 }
 0x502   : > { %p2236_p7 = pnand %p2235_p4, %p2373_p5 }
 0x503   : > { %p2241_p11 = por %p2240_p10, %p2239_p9 }
 0x504   : > { %p2237_p8 = pneg %p2236_p7 }
 0x505   : > { %p2243_p13 = por %p2242_p12, %p2241_p11 }
 0x507   : > { %p2244_p0 = pnand %p2243_p13, %p2237_p8 }
 0x509   : > { %2247 = shalt.err (!%p2244_p0)
}
 0x50a   : > { %2115 = dma.vmem_to_hbm [thread:$0]  (%p2373_p5), %s3301_s20, 128, %s3299_s23, %s1872_s28  }
 0x50b PF: > { %p2121_p1 = scmp.ge.s32.totalorder %s2282_s27, 2  ;;  %s1897_s21 = sand.u32 1, %s2270_s24  }
 0x50c   : > { %s1898_s22 = scalar_lea.sflag [#allocation3], %s1897_s21 }
 0x50d   : > { %p2118_p2 = pnand %p2121_p1, %p2377_p6 }
 0x50f   : > { %2265 = dma.done.wait (!%p2118_p2), %s1898_s22, 128  }
 0x510   : > { %2267 = vsyncadd (!%p2118_p2), %s1898_s22, 4294967168  ;;  %p17_p3 = scmp.ge.s32.totalorder %s2360_s30, 5   ;;  %s3373_s24 = smov %s2274_s25 }
 0x511   : > { %s3374_s25 = smov %s2278_s26  ;;  %s3375_s26 = smov %s2371_s10 }
 0x512   : > { %s3376_s27 = smov %s2360_s30  ;;  %19 = sbr.rel (!%p17_p3) target bundleno = 3 (0x3), region = 85 }
 0x519   :  { %1903 = vsyncpa [#allocation3], 1 }
 0x51a   :  { %1905 = vsyncpa [#allocation3 + $0x1], 1 }

</bundles_post_ra>
